<compile_context>
chip_gen: v6e
topology: v6e:2x2x1
jax: 0.10.0
libtpu: 0.0.40
codegen_flags: <defaults>
</compile_context>

<pallas_src>
import functools

import jax
import jax.numpy as jnp
from jax.experimental import pallas as pl
from jax.experimental.pallas import tpu as pltpu

EPS = 1e-5


# ---------------------------------------------------------------------------
# Fused kernel: all DS_DDB steps for one group of Bt batch items.
# ---------------------------------------------------------------------------
def _make_ds_ddb_kernel(C, T, F, depth, Bt):
    N = T * F
    BN = Bt * N

    def kernel(*refs):
        x_ref = refs[0]                                   # (1, C, BN)
        m_ref = refs[1]                                   # (2+2*depth, BN) 0/1 planes
        w_refs = refs[2:2 + depth]                        # (C, 9*Ci) folded dw+pw
        g_ref, be_ref, al_ref = refs[2 + depth:5 + depth]  # (depth, C, 1) each
        o_ref = refs[5 + depth]                           # (1, C, BN)
        skip_ref = refs[6 + depth]                        # VMEM (C*(depth+1), BN)

        # block input occupies the last C rows of the skip buffer
        skip_ref[pl.ds(depth * C, C), :] = x_ref[0]

        # hoisted frequency-axis masks (shared by every step)
        f_neg = m_ref[0:1, :]                             # f-1 >= 0
        f_pos = m_ref[1:2, :]                             # f+1 <  F

        for i in range(depth):
            dil = 2 ** i
            Ci = C * (i + 1)
            off_in = (depth - i) * C

            xin = skip_ref[pl.ds(off_in, Ci), :]          # (Ci, BN) = [x_{i-1},..,x_0,x]

            # hoisted per-step time-axis / corner masks
            t_neg = m_ref[2 + 2 * i:3 + 2 * i, :]         # t-dil >= 0
            t_pos = m_ref[3 + 2 * i:4 + 2 * i, :]         # t+dil <  T
            tap_mask = {
                (-1, -1): t_neg * f_neg, (-1, 0): t_neg, (-1, 1): t_neg * f_pos,
                (0, -1): f_neg,          (0, 0): None,   (0, 1): f_pos,
                (1, -1): t_pos * f_neg,  (1, 0): t_pos,  (1, 1): t_pos * f_pos,
            }

            # ---- 9 masked lane-rolls -> tap stack (9*Ci, BN) ----------------
            taps = []
            for kh in range(3):
                dt = (kh - 1) * dil
                for kw in range(3):
                    df = kw - 1
                    delta = dt * F + df                   # source index = n + delta
                    if delta == 0:
                        taps.append(xin)                  # center tap, no mask
                    else:
                        shifted = pltpu.roll(xin, (-delta) % BN, axis=1)
                        taps.append(shifted * tap_mask[(kh - 1, df)])
            stack = jnp.concatenate(taps, axis=0)         # (9*Ci, BN)

            # ---- fused depthwise+pointwise on the MXU -----------------------
            y = jnp.dot(w_refs[i][...], stack,
                        preferred_element_type=jnp.float32)           # (C, BN)

            # ---- InstanceNorm (two-pass, per batch item) + affine + PReLU ---
            g, be, al = g_ref[i], be_ref[i], al_ref[i]                 # (C, 1)
            zs = []
            for bt in range(Bt):
                seg = y[:, bt * N:(bt + 1) * N]                        # (C, N)
                mean = jnp.mean(seg, axis=1, keepdims=True)
                d = seg - mean
                var = jnp.mean(d * d, axis=1, keepdims=True)
                z = d * jax.lax.rsqrt(var + EPS)
                z = z * g + be
                z = jnp.where(z > 0, z, al * z)
                zs.append(z)
            zfull = zs[0] if Bt == 1 else jnp.concatenate(zs, axis=1)  # (C, BN)

            if i < depth - 1:
                # "skip = cat([x_i, skip], 1)" == in-place VMEM write in front
                skip_ref[pl.ds((depth - 1 - i) * C, C), :] = zfull
            else:
                o_ref[0] = zfull

    return kernel


# ---------------------------------------------------------------------------
# Wrapper: host-side weight folding, mask planes, batch folding.
# ---------------------------------------------------------------------------
def ds_ddb_forward(x, params, C, depth=4, batch_per_step=None):
    """x: (B, C, T, F) in NCHW, same layout as the PyTorch module."""
    B, Cin, T, F = x.shape
    assert Cin == C, "DS_DDB input channel count must equal dense_channel"
    N = T * F
    assert N % 128 == 0, "demo kernel keeps T*F lane-dense; pad F or chunk otherwise"
    assert C % 8 == 0, "channel rows must be sublane-aligned"

    # Fold batch items onto lanes (bounded so transients stay small).
    if batch_per_step is None:
        bt = 1
        for cand in range(1, B + 1):
            if B % cand == 0 and cand * N <= 4096:
                bt = cand
        # NOTE(v7x): prefer a bt that keeps the parallel grid (B // bt) a
        # multiple of 2 so both TensorCores get work.
    else:
        bt = batch_per_step
    assert B % bt == 0
    G = B // bt
    BN = bt * N

    # batch-folded activations: lane order is [bt, t, f]
    x2 = x.reshape(G, bt, C, N).transpose(0, 2, 1, 3).reshape(G, C, BN)

    # host-precomputed 0/1 validity planes (SAME zero padding), tiled over bt
    t_idx = jnp.repeat(jnp.arange(T), F)
    f_idx = jnp.tile(jnp.arange(F), T)
    planes = [(f_idx - 1 >= 0), (f_idx + 1 < F)]
    for i in range(depth):
        dil = 2 ** i
        planes += [(t_idx - dil >= 0), (t_idx + dil < T)]
    masks = jnp.stack([jnp.tile(p.astype(jnp.float32), bt) for p in planes], axis=0)

    # fold depthwise into pointwise: W_eff[o, k*Ci + c] = pw[o, c] * dw[k, c]
    w_eff = []
    for i in range(depth):
        Ci = C * (i + 1)
        dw = params[f"dw_w{i}"]                       # (9, Ci)
        pw = params[f"pw_w{i}"]                       # (C, Ci)
        w_eff.append((pw[:, None, :] * dw[None, :, :]).reshape(C, 9 * Ci))

    inputs = [x2, masks] + w_eff + [params["gamma"], params["beta"], params["alpha"]]
    in_specs = [
        pl.BlockSpec((1, C, BN), lambda g: (g, 0, 0)),
        pl.BlockSpec((2 + 2 * depth, BN), lambda g: (0, 0)),
    ]
    for i in range(depth):
        Ci = C * (i + 1)
        in_specs.append(pl.BlockSpec((C, 9 * Ci), lambda g: (0, 0)))
    for _ in range(3):
        in_specs.append(pl.BlockSpec((depth, C, 1), lambda g: (0, 0, 0)))

    # advisory cost estimate so XLA schedules around this fairly long call
    flops = 2 * sum(C * 9 * C * (i + 1) for i in range(depth)) * BN * G
    bytes_accessed = 4 * (2 * B * C * N + masks.size
                          + sum(int(w.size) for w in w_eff) + 3 * depth * C)
    cost = pl.CostEstimate(flops=flops, transcendentals=B * depth * C,
                           bytes_accessed=bytes_accessed)

    out = pl.pallas_call(
        _make_ds_ddb_kernel(C, T, F, depth, bt),
        out_shape=jax.ShapeDtypeStruct((G, C, BN), jnp.float32),
        grid=(G,),
        in_specs=in_specs,
        out_specs=pl.BlockSpec((1, C, BN), lambda g: (g, 0, 0)),
        scratch_shapes=[pltpu.VMEM((C * (depth + 1), BN), jnp.float32)],
        compiler_params=pltpu.CompilerParams(
            dimension_semantics=("parallel",),
            vmem_limit_bytes=48 * 1024 * 1024),   # explicit; fits v5e/v6e/v7x
        cost_estimate=cost,
    )(*inputs)
    return out.reshape(G, C, bt, N).transpose(0, 2, 1, 3).reshape(B, C, T, F)


# ---------------------------------------------------------------------------
# Parameters (deterministic, in-script).
# ---------------------------------------------------------------------------
def init_params(key, C, depth=4):
    params = {}
    keys = iter(jax.random.split(key, 2 * depth + 3))
    for i in range(depth):
        Ci = C * (i + 1)
        params[f"dw_w{i}"] = 0.2 * jax.random.normal(next(keys), (9, Ci), jnp.float32)
        params[f"pw_w{i}"] = 0.2 * jax.random.normal(next(keys), (C, Ci), jnp.float32)
    params["gamma"] = 1.0 + 0.1 * jax.random.normal(next(keys), (depth, C, 1), jnp.float32)
    params["beta"] = 0.1 * jax.random.normal(next(keys), (depth, C, 1), jnp.float32)
    params["alpha"] = 0.25 + 0.05 * jax.random.normal(next(keys), (depth, C, 1), jnp.float32)
    # Conv biases (bias=True in the PyTorch module) are intentionally omitted:
    # a per-channel constant added before InstanceNorm is exactly cancelled by
    # the mean subtraction, so the forward pass is unchanged.
    return params


# ---------------------------------------------------------------------------
# Pure-JAX reference mirroring the PyTorch forward literally (NCHW).
# ---------------------------------------------------------------------------
def ds_ddb_reference(x, params, C, depth=4):
    hp = jax.lax.Precision.HIGHEST
    skip = x
    z = x
    for i in range(depth):
        dil = 2 ** i
        Ci = C * (i + 1)
        w = params[f"dw_w{i}"].reshape(3, 3, Ci)                     # [kh, kw, c]
        w = jnp.transpose(w, (2, 0, 1))[:, None, :, :]              # (Ci, 1, 3, 3)
        dw = jax.lax.conv_general_dilated(
            skip, w, window_strides=(1, 1), padding=((dil, dil), (1, 1)),
            rhs_dilation=(dil, 1),
            dimension_numbers=("NCHW", "OIHW", "NCHW"),
            feature_group_count=Ci, precision=hp)
        y = jnp.einsum("oc,bchw->bohw", params[f"pw_w{i}"], dw, precision=hp)
        mean = jnp.mean(y, axis=(2, 3), keepdims=True)
        var = jnp.mean(jnp.square(y - mean), axis=(2, 3), keepdims=True)
        g = params["gamma"][i].reshape(1, C, 1, 1)
        be = params["beta"][i].reshape(1, C, 1, 1)
        al = params["alpha"][i].reshape(1, C, 1, 1)
        z = (y - mean) * jax.lax.rsqrt(var + EPS) * g + be
        z = jnp.where(z > 0, z, al * z)
        skip = jnp.concatenate([z, skip], axis=1)
    return z


if __name__ == "__main__":
    B, C, T, F = 2, 8, 16, 16            # h.dense_channel = 8; x is (B, C, T, F)
    depth = 4

    key = jax.random.PRNGKey(0)
    kx, kp = jax.random.split(key)
    x = jax.random.normal(kx, (B, C, T, F), jnp.float32)
    params = init_params(kp, C, depth)

    fwd = jax.jit(functools.partial(ds_ddb_forward, C=C, depth=depth))
    out = jax.block_until_ready(fwd(x, params))

    assert out.shape == (B, C, T, F), out.shape
    assert bool(jnp.all(jnp.isfinite(out)))

    ref = ds_ddb_reference(x, params, C, depth)
    max_err = float(jnp.max(jnp.abs(out - ref)))
    assert max_err < 2e-2, f"max abs err vs reference: {max_err}"
    print("KERNEL_OK")
</pallas_src>

<mosaic_0001>
module attributes {stable_mosaic.version = 11 : i64} {
  func.func @kernel(%arg0: i32, %arg1: memref<1x8x512xf32, #tpu.memory_space<vmem>>, %arg2: memref<10x512xf32, #tpu.memory_space<vmem>>, %arg3: memref<8x72xf32, #tpu.memory_space<vmem>>, %arg4: memref<8x144xf32, #tpu.memory_space<vmem>>, %arg5: memref<8x216xf32, #tpu.memory_space<vmem>>, %arg6: memref<8x288xf32, #tpu.memory_space<vmem>>, %arg7: memref<4x8x1xf32, #tpu.memory_space<vmem>>, %arg8: memref<4x8x1xf32, #tpu.memory_space<vmem>>, %arg9: memref<4x8x1xf32, #tpu.memory_space<vmem>>, %arg10: memref<1x8x512xf32, #tpu.memory_space<vmem>>, %arg11: memref<40x512xf32, #tpu.memory_space<vmem>>) attributes {dimension_semantics = [#tpu.dimension_semantics<parallel>], iteration_bounds = array<i64: 1>, scalar_prefetch = 0 : i64, scratch_operands = 1 : i64, tpu.core_type = #tpu.core_type<tc>, window_params = [{transform_indices = @transform_0, window_bounds = array<i64: 1, 8, 512>}, {pipeline_mode = #tpu.pipeline_mode<synchronous>, transform_indices = @transform_1, window_bounds = array<i64: 10, 512>}, {pipeline_mode = #tpu.pipeline_mode<synchronous>, transform_indices = @transform_2, window_bounds = array<i64: 8, 72>}, {pipeline_mode = #tpu.pipeline_mode<synchronous>, transform_indices = @transform_3, window_bounds = array<i64: 8, 144>}, {pipeline_mode = #tpu.pipeline_mode<synchronous>, transform_indices = @transform_4, window_bounds = array<i64: 8, 216>}, {pipeline_mode = #tpu.pipeline_mode<synchronous>, transform_indices = @transform_5, window_bounds = array<i64: 8, 288>}, {pipeline_mode = #tpu.pipeline_mode<synchronous>, transform_indices = @transform_6, window_bounds = array<i64: 4, 8, 1>}, {pipeline_mode = #tpu.pipeline_mode<synchronous>, transform_indices = @transform_7, window_bounds = array<i64: 4, 8, 1>}, {pipeline_mode = #tpu.pipeline_mode<synchronous>, transform_indices = @transform_8, window_bounds = array<i64: 4, 8, 1>}, {transform_indices = @transform_9, window_bounds = array<i64: 1, 8, 512>}]} {
    %c0 = arith.constant 0 : index
    %c0_0 = arith.constant 0 : index
    %c0_1 = arith.constant 0 : index
    %0 = vector.load %arg1[%c0, %c0_0, %c0_1] : memref<1x8x512xf32, #tpu.memory_space<vmem>>, vector<1x8x512xf32>
    %1 = vector.shape_cast %0 : vector<1x8x512xf32> to vector<8x512xf32>
    %c32 = arith.constant 32 : index
    %c0_2 = arith.constant 0 : index
    %2 = vector.load %arg11[%c32, %c0_2] : memref<40x512xf32, #tpu.memory_space<vmem>>, vector<8x512xf32>
    tpu.vector_store %arg11[%c32, %c0_2], %1 {strides = array<i32>} : memref<40x512xf32, #tpu.memory_space<vmem>>, vector<8x512xf32>,
    %c0_3 = arith.constant 0 : index
    %c0_4 = arith.constant 0 : index
    %3 = vector.load %arg2[%c0_3, %c0_4] : memref<10x512xf32, #tpu.memory_space<vmem>>, vector<1x512xf32>
    %c1 = arith.constant 1 : index
    %c0_5 = arith.constant 0 : index
    %4 = vector.load %arg2[%c1, %c0_5] : memref<10x512xf32, #tpu.memory_space<vmem>>, vector<1x512xf32>
    %c32_6 = arith.constant 32 : index
    %c0_7 = arith.constant 0 : index
    %5 = vector.load %arg11[%c32_6, %c0_7] : memref<40x512xf32, #tpu.memory_space<vmem>>, vector<8x512xf32>
    %c2 = arith.constant 2 : index
    %c0_8 = arith.constant 0 : index
    %6 = vector.load %arg2[%c2, %c0_8] : memref<10x512xf32, #tpu.memory_space<vmem>>, vector<1x512xf32>
    %c3 = arith.constant 3 : index
    %c0_9 = arith.constant 0 : index
    %7 = vector.load %arg2[%c3, %c0_9] : memref<10x512xf32, #tpu.memory_space<vmem>>, vector<1x512xf32>
    %8 = arith.mulf %6, %3 : vector<1x512xf32>
    %9 = arith.mulf %6, %4 : vector<1x512xf32>
    %10 = arith.mulf %7, %3 : vector<1x512xf32>
    %11 = arith.mulf %7, %4 : vector<1x512xf32>
    %c17_i32 = arith.constant 17 : i32
    %12 = tpu.dynamic_rotate %5 by %c17_i32 dim 1 : vector<8x512xf32>, i32 -> vector<8x512xf32>
    %13 = vector.broadcast %8 : vector<1x512xf32> to vector<8x512xf32>
    %14 = arith.mulf %12, %13 : vector<8x512xf32>
    %c16_i32 = arith.constant 16 : i32
    %15 = tpu.dynamic_rotate %5 by %c16_i32 dim 1 : vector<8x512xf32>, i32 -> vector<8x512xf32>
    %16 = vector.broadcast %6 : vector<1x512xf32> to vector<8x512xf32>
    %17 = arith.mulf %15, %16 : vector<8x512xf32>
    %c15_i32 = arith.constant 15 : i32
    %18 = tpu.dynamic_rotate %5 by %c15_i32 dim 1 : vector<8x512xf32>, i32 -> vector<8x512xf32>
    %19 = vector.broadcast %9 : vector<1x512xf32> to vector<8x512xf32>
    %20 = arith.mulf %18, %19 : vector<8x512xf32>
    %c1_i32 = arith.constant 1 : i32
    %21 = tpu.dynamic_rotate %5 by %c1_i32 dim 1 : vector<8x512xf32>, i32 -> vector<8x512xf32>
    %22 = vector.broadcast %3 : vector<1x512xf32> to vector<8x512xf32>
    %23 = arith.mulf %21, %22 : vector<8x512xf32>
    %c511_i32 = arith.constant 511 : i32
    %24 = tpu.dynamic_rotate %5 by %c511_i32 dim 1 : vector<8x512xf32>, i32 -> vector<8x512xf32>
    %25 = vector.broadcast %4 : vector<1x512xf32> to vector<8x512xf32>
    %26 = arith.mulf %24, %25 : vector<8x512xf32>
    %c497_i32 = arith.constant 497 : i32
    %27 = tpu.dynamic_rotate %5 by %c497_i32 dim 1 : vector<8x512xf32>, i32 -> vector<8x512xf32>
    %28 = vector.broadcast %10 : vector<1x512xf32> to vector<8x512xf32>
    %29 = arith.mulf %27, %28 : vector<8x512xf32>
    %c496_i32 = arith.constant 496 : i32
    %30 = tpu.dynamic_rotate %5 by %c496_i32 dim 1 : vector<8x512xf32>, i32 -> vector<8x512xf32>
    %31 = vector.broadcast %7 : vector<1x512xf32> to vector<8x512xf32>
    %32 = arith.mulf %30, %31 : vector<8x512xf32>
    %c495_i32 = arith.constant 495 : i32
    %33 = tpu.dynamic_rotate %5 by %c495_i32 dim 1 : vector<8x512xf32>, i32 -> vector<8x512xf32>
    %34 = vector.broadcast %11 : vector<1x512xf32> to vector<8x512xf32>
    %35 = arith.mulf %33, %34 : vector<8x512xf32>
    %36 = tpu.concatenate %14, %17, %20, %23, %5, %26, %29, %32, %35 in 0 : vector<8x512xf32>, vector<8x512xf32>, vector<8x512xf32>, vector<8x512xf32>, vector<8x512xf32>, vector<8x512xf32>, vector<8x512xf32>, vector<8x512xf32>, vector<8x512xf32> -> vector<72x512xf32>
    %c0_10 = arith.constant 0 : index
    %c0_11 = arith.constant 0 : index
    %37 = vector.load %arg3[%c0_10, %c0_11] : memref<8x72xf32, #tpu.memory_space<vmem>>, vector<8x72xf32>
    %cst = arith.constant dense<0.000000e+00> : vector<8x512xf32>
    %38 = tpu.matmul %37, %36, %cst {dimension_numbers = #tpu.dot_dimension_numbers<[1], [0], [0], [1], [0, 0, 1, 1], [], []>} : vector<8x72xf32>, vector<72x512xf32>, vector<8x512xf32> -> vector<8x512xf32>
    %c0_12 = arith.constant 0 : index
    %c0_13 = arith.constant 0 : index
    %c0_14 = arith.constant 0 : index
    %39 = vector.load %arg7[%c0_12, %c0_13, %c0_14] : memref<4x8x1xf32, #tpu.memory_space<vmem>>, vector<1x8x1xf32>
    %40 = vector.shape_cast %39 : vector<1x8x1xf32> to vector<8x1xf32>
    %c0_15 = arith.constant 0 : index
    %c0_16 = arith.constant 0 : index
    %c0_17 = arith.constant 0 : index
    %41 = vector.load %arg8[%c0_15, %c0_16, %c0_17] : memref<4x8x1xf32, #tpu.memory_space<vmem>>, vector<1x8x1xf32>
    %42 = vector.shape_cast %41 : vector<1x8x1xf32> to vector<8x1xf32>
    %c0_18 = arith.constant 0 : index
    %c0_19 = arith.constant 0 : index
    %c0_20 = arith.constant 0 : index
    %43 = vector.load %arg9[%c0_18, %c0_19, %c0_20] : memref<4x8x1xf32, #tpu.memory_space<vmem>>, vector<1x8x1xf32>
    %44 = vector.shape_cast %43 : vector<1x8x1xf32> to vector<8x1xf32>
    %45 = vector.extract_strided_slice %38 {offsets = [0, 0], sizes = [8, 256], strides = [1, 1]} : vector<8x512xf32> to vector<8x256xf32>
    %cst_21 = arith.constant dense<0.000000e+00> : vector<8xf32>
    %46 = vector.multi_reduction <add>, %45, %cst_21 [1] : vector<8x256xf32> to vector<8xf32>
    %47 = vector.shape_cast %46 : vector<8xf32> to vector<8x1xf32>
    %cst_22 = arith.constant 2.560000e+02 : f32
    %48 = vector.broadcast %cst_22 : f32 to vector<8x1xf32>
    %49 = arith.divf %47, %48 : vector<8x1xf32>
    %50 = vector.broadcast %49 : vector<8x1xf32> to vector<8x256xf32>
    %51 = arith.subf %45, %50 : vector<8x256xf32>
    %52 = arith.mulf %51, %51 : vector<8x256xf32>
    %cst_23 = arith.constant dense<0.000000e+00> : vector<8xf32>
    %53 = vector.multi_reduction <add>, %52, %cst_23 [1] : vector<8x256xf32> to vector<8xf32>
    %54 = vector.shape_cast %53 : vector<8xf32> to vector<8x1xf32>
    %cst_24 = arith.constant 2.560000e+02 : f32
    %55 = vector.broadcast %cst_24 : f32 to vector<8x1xf32>
    %56 = arith.divf %54, %55 : vector<8x1xf32>
    %cst_25 = arith.constant 9.99999974E-6 : f32
    %57 = vector.broadcast %cst_25 : f32 to vector<8x1xf32>
    %58 = arith.addf %56, %57 : vector<8x1xf32>
    %59 = math.rsqrt %58 : vector<8x1xf32>
    %60 = vector.broadcast %59 : vector<8x1xf32> to vector<8x256xf32>
    %61 = arith.mulf %51, %60 : vector<8x256xf32>
    %62 = vector.broadcast %40 : vector<8x1xf32> to vector<8x256xf32>
    %63 = arith.mulf %61, %62 : vector<8x256xf32>
    %64 = vector.broadcast %42 : vector<8x1xf32> to vector<8x256xf32>
    %65 = arith.addf %63, %64 : vector<8x256xf32>
    %cst_26 = arith.constant 0.000000e+00 : f32
    %66 = vector.broadcast %cst_26 : f32 to vector<8x256xf32>
    %67 = arith.cmpf ogt, %65, %66 : vector<8x256xf32>
    %68 = vector.broadcast %44 : vector<8x1xf32> to vector<8x256xf32>
    %69 = arith.mulf %68, %65 : vector<8x256xf32>
    %70 = arith.select %67, %65, %69 : vector<8x256xi1>, vector<8x256xf32>
    %71 = vector.extract_strided_slice %38 {offsets = [0, 256], sizes = [8, 256], strides = [1, 1]} : vector<8x512xf32> to vector<8x256xf32>
    %cst_27 = arith.constant dense<0.000000e+00> : vector<8xf32>
    %72 = vector.multi_reduction <add>, %71, %cst_27 [1] : vector<8x256xf32> to vector<8xf32>
    %73 = vector.shape_cast %72 : vector<8xf32> to vector<8x1xf32>
    %cst_28 = arith.constant 2.560000e+02 : f32
    %74 = vector.broadcast %cst_28 : f32 to vector<8x1xf32>
    %75 = arith.divf %73, %74 : vector<8x1xf32>
    %76 = vector.broadcast %75 : vector<8x1xf32> to vector<8x256xf32>
    %77 = arith.subf %71, %76 : vector<8x256xf32>
    %78 = arith.mulf %77, %77 : vector<8x256xf32>
    %cst_29 = arith.constant dense<0.000000e+00> : vector<8xf32>
    %79 = vector.multi_reduction <add>, %78, %cst_29 [1] : vector<8x256xf32> to vector<8xf32>
    %80 = vector.shape_cast %79 : vector<8xf32> to vector<8x1xf32>
    %cst_30 = arith.constant 2.560000e+02 : f32
    %81 = vector.broadcast %cst_30 : f32 to vector<8x1xf32>
    %82 = arith.divf %80, %81 : vector<8x1xf32>
    %cst_31 = arith.constant 9.99999974E-6 : f32
    %83 = vector.broadcast %cst_31 : f32 to vector<8x1xf32>
    %84 = arith.addf %82, %83 : vector<8x1xf32>
    %85 = math.rsqrt %84 : vector<8x1xf32>
    %86 = vector.broadcast %85 : vector<8x1xf32> to vector<8x256xf32>
    %87 = arith.mulf %77, %86 : vector<8x256xf32>
    %88 = vector.broadcast %40 : vector<8x1xf32> to vector<8x256xf32>
    %89 = arith.mulf %87, %88 : vector<8x256xf32>
    %90 = vector.broadcast %42 : vector<8x1xf32> to vector<8x256xf32>
    %91 = arith.addf %89, %90 : vector<8x256xf32>
    %cst_32 = arith.constant 0.000000e+00 : f32
    %92 = vector.broadcast %cst_32 : f32 to vector<8x256xf32>
    %93 = arith.cmpf ogt, %91, %92 : vector<8x256xf32>
    %94 = vector.broadcast %44 : vector<8x1xf32> to vector<8x256xf32>
    %95 = arith.mulf %94, %91 : vector<8x256xf32>
    %96 = arith.select %93, %91, %95 : vector<8x256xi1>, vector<8x256xf32>
    %97 = tpu.concatenate %70, %96 in 1 : vector<8x256xf32>, vector<8x256xf32> -> vector<8x512xf32>
    %c24 = arith.constant 24 : index
    %c0_33 = arith.constant 0 : index
    %98 = vector.load %arg11[%c24, %c0_33] : memref<40x512xf32, #tpu.memory_space<vmem>>, vector<8x512xf32>
    tpu.vector_store %arg11[%c24, %c0_33], %97 {strides = array<i32>} : memref<40x512xf32, #tpu.memory_space<vmem>>, vector<8x512xf32>,
    %c24_34 = arith.constant 24 : index
    %c0_35 = arith.constant 0 : index
    %99 = vector.load %arg11[%c24_34, %c0_35] : memref<40x512xf32, #tpu.memory_space<vmem>>, vector<16x512xf32>
    %c4 = arith.constant 4 : index
    %c0_36 = arith.constant 0 : index
    %100 = vector.load %arg2[%c4, %c0_36] : memref<10x512xf32, #tpu.memory_space<vmem>>, vector<1x512xf32>
    %c5 = arith.constant 5 : index
    %c0_37 = arith.constant 0 : index
    %101 = vector.load %arg2[%c5, %c0_37] : memref<10x512xf32, #tpu.memory_space<vmem>>, vector<1x512xf32>
    %102 = arith.mulf %100, %3 : vector<1x512xf32>
    %103 = arith.mulf %100, %4 : vector<1x512xf32>
    %104 = arith.mulf %101, %3 : vector<1x512xf32>
    %105 = arith.mulf %101, %4 : vector<1x512xf32>
    %c33_i32 = arith.constant 33 : i32
    %106 = tpu.dynamic_rotate %99 by %c33_i32 dim 1 : vector<16x512xf32>, i32 -> vector<16x512xf32>
    %107 = vector.broadcast %102 : vector<1x512xf32> to vector<16x512xf32>
    %108 = arith.mulf %106, %107 : vector<16x512xf32>
    %c32_i32 = arith.constant 32 : i32
    %109 = tpu.dynamic_rotate %99 by %c32_i32 dim 1 : vector<16x512xf32>, i32 -> vector<16x512xf32>
    %110 = vector.broadcast %100 : vector<1x512xf32> to vector<16x512xf32>
    %111 = arith.mulf %109, %110 : vector<16x512xf32>
    %c31_i32 = arith.constant 31 : i32
    %112 = tpu.dynamic_rotate %99 by %c31_i32 dim 1 : vector<16x512xf32>, i32 -> vector<16x512xf32>
    %113 = vector.broadcast %103 : vector<1x512xf32> to vector<16x512xf32>
    %114 = arith.mulf %112, %113 : vector<16x512xf32>
    %c1_i32_38 = arith.constant 1 : i32
    %115 = tpu.dynamic_rotate %99 by %c1_i32_38 dim 1 : vector<16x512xf32>, i32 -> vector<16x512xf32>
    %116 = vector.broadcast %3 : vector<1x512xf32> to vector<16x512xf32>
    %117 = arith.mulf %115, %116 : vector<16x512xf32>
    %c511_i32_39 = arith.constant 511 : i32
    %118 = tpu.dynamic_rotate %99 by %c511_i32_39 dim 1 : vector<16x512xf32>, i32 -> vector<16x512xf32>
    %119 = vector.broadcast %4 : vector<1x512xf32> to vector<16x512xf32>
    %120 = arith.mulf %118, %119 : vector<16x512xf32>
    %c481_i32 = arith.constant 481 : i32
    %121 = tpu.dynamic_rotate %99 by %c481_i32 dim 1 : vector<16x512xf32>, i32 -> vector<16x512xf32>
    %122 = vector.broadcast %104 : vector<1x512xf32> to vector<16x512xf32>
    %123 = arith.mulf %121, %122 : vector<16x512xf32>
    %c480_i32 = arith.constant 480 : i32
    %124 = tpu.dynamic_rotate %99 by %c480_i32 dim 1 : vector<16x512xf32>, i32 -> vector<16x512xf32>
    %125 = vector.broadcast %101 : vector<1x512xf32> to vector<16x512xf32>
    %126 = arith.mulf %124, %125 : vector<16x512xf32>
    %c479_i32 = arith.constant 479 : i32
    %127 = tpu.dynamic_rotate %99 by %c479_i32 dim 1 : vector<16x512xf32>, i32 -> vector<16x512xf32>
    %128 = vector.broadcast %105 : vector<1x512xf32> to vector<16x512xf32>
    %129 = arith.mulf %127, %128 : vector<16x512xf32>
    %130 = tpu.concatenate %108, %111, %114, %117, %99, %120, %123, %126, %129 in 0 : vector<16x512xf32>, vector<16x512xf32>, vector<16x512xf32>, vector<16x512xf32>, vector<16x512xf32>, vector<16x512xf32>, vector<16x512xf32>, vector<16x512xf32>, vector<16x512xf32> -> vector<144x512xf32>
    %c0_40 = arith.constant 0 : index
    %c0_41 = arith.constant 0 : index
    %131 = vector.load %arg4[%c0_40, %c0_41] : memref<8x144xf32, #tpu.memory_space<vmem>>, vector<8x144xf32>
    %cst_42 = arith.constant dense<0.000000e+00> : vector<8x512xf32>
    %132 = tpu.matmul %131, %130, %cst_42 {dimension_numbers = #tpu.dot_dimension_numbers<[1], [0], [0], [1], [0, 0, 1, 1], [], []>} : vector<8x144xf32>, vector<144x512xf32>, vector<8x512xf32> -> vector<8x512xf32>
    %c1_43 = arith.constant 1 : index
    %c0_44 = arith.constant 0 : index
    %c0_45 = arith.constant 0 : index
    %133 = vector.load %arg7[%c1_43, %c0_44, %c0_45] : memref<4x8x1xf32, #tpu.memory_space<vmem>>, vector<1x8x1xf32>
    %134 = vector.shape_cast %133 : vector<1x8x1xf32> to vector<8x1xf32>
    %c1_46 = arith.constant 1 : index
    %c0_47 = arith.constant 0 : index
    %c0_48 = arith.constant 0 : index
    %135 = vector.load %arg8[%c1_46, %c0_47, %c0_48] : memref<4x8x1xf32, #tpu.memory_space<vmem>>, vector<1x8x1xf32>
    %136 = vector.shape_cast %135 : vector<1x8x1xf32> to vector<8x1xf32>
    %c1_49 = arith.constant 1 : index
    %c0_50 = arith.constant 0 : index
    %c0_51 = arith.constant 0 : index
    %137 = vector.load %arg9[%c1_49, %c0_50, %c0_51] : memref<4x8x1xf32, #tpu.memory_space<vmem>>, vector<1x8x1xf32>
    %138 = vector.shape_cast %137 : vector<1x8x1xf32> to vector<8x1xf32>
    %139 = vector.extract_strided_slice %132 {offsets = [0, 0], sizes = [8, 256], strides = [1, 1]} : vector<8x512xf32> to vector<8x256xf32>
    %cst_52 = arith.constant dense<0.000000e+00> : vector<8xf32>
    %140 = vector.multi_reduction <add>, %139, %cst_52 [1] : vector<8x256xf32> to vector<8xf32>
    %141 = vector.shape_cast %140 : vector<8xf32> to vector<8x1xf32>
    %cst_53 = arith.constant 2.560000e+02 : f32
    %142 = vector.broadcast %cst_53 : f32 to vector<8x1xf32>
    %143 = arith.divf %141, %142 : vector<8x1xf32>
    %144 = vector.broadcast %143 : vector<8x1xf32> to vector<8x256xf32>
    %145 = arith.subf %139, %144 : vector<8x256xf32>
    %146 = arith.mulf %145, %145 : vector<8x256xf32>
    %cst_54 = arith.constant dense<0.000000e+00> : vector<8xf32>
    %147 = vector.multi_reduction <add>, %146, %cst_54 [1] : vector<8x256xf32> to vector<8xf32>
    %148 = vector.shape_cast %147 : vector<8xf32> to vector<8x1xf32>
    %cst_55 = arith.constant 2.560000e+02 : f32
    %149 = vector.broadcast %cst_55 : f32 to vector<8x1xf32>
    %150 = arith.divf %148, %149 : vector<8x1xf32>
    %cst_56 = arith.constant 9.99999974E-6 : f32
    %151 = vector.broadcast %cst_56 : f32 to vector<8x1xf32>
    %152 = arith.addf %150, %151 : vector<8x1xf32>
    %153 = math.rsqrt %152 : vector<8x1xf32>
    %154 = vector.broadcast %153 : vector<8x1xf32> to vector<8x256xf32>
    %155 = arith.mulf %145, %154 : vector<8x256xf32>
    %156 = vector.broadcast %134 : vector<8x1xf32> to vector<8x256xf32>
    %157 = arith.mulf %155, %156 : vector<8x256xf32>
    %158 = vector.broadcast %136 : vector<8x1xf32> to vector<8x256xf32>
    %159 = arith.addf %157, %158 : vector<8x256xf32>
    %cst_57 = arith.constant 0.000000e+00 : f32
    %160 = vector.broadcast %cst_57 : f32 to vector<8x256xf32>
    %161 = arith.cmpf ogt, %159, %160 : vector<8x256xf32>
    %162 = vector.broadcast %138 : vector<8x1xf32> to vector<8x256xf32>
    %163 = arith.mulf %162, %159 : vector<8x256xf32>
    %164 = arith.select %161, %159, %163 : vector<8x256xi1>, vector<8x256xf32>
    %165 = vector.extract_strided_slice %132 {offsets = [0, 256], sizes = [8, 256], strides = [1, 1]} : vector<8x512xf32> to vector<8x256xf32>
    %cst_58 = arith.constant dense<0.000000e+00> : vector<8xf32>
    %166 = vector.multi_reduction <add>, %165, %cst_58 [1] : vector<8x256xf32> to vector<8xf32>
    %167 = vector.shape_cast %166 : vector<8xf32> to vector<8x1xf32>
    %cst_59 = arith.constant 2.560000e+02 : f32
    %168 = vector.broadcast %cst_59 : f32 to vector<8x1xf32>
    %169 = arith.divf %167, %168 : vector<8x1xf32>
    %170 = vector.broadcast %169 : vector<8x1xf32> to vector<8x256xf32>
    %171 = arith.subf %165, %170 : vector<8x256xf32>
    %172 = arith.mulf %171, %171 : vector<8x256xf32>
    %cst_60 = arith.constant dense<0.000000e+00> : vector<8xf32>
    %173 = vector.multi_reduction <add>, %172, %cst_60 [1] : vector<8x256xf32> to vector<8xf32>
    %174 = vector.shape_cast %173 : vector<8xf32> to vector<8x1xf32>
    %cst_61 = arith.constant 2.560000e+02 : f32
    %175 = vector.broadcast %cst_61 : f32 to vector<8x1xf32>
    %176 = arith.divf %174, %175 : vector<8x1xf32>
    %cst_62 = arith.constant 9.99999974E-6 : f32
    %177 = vector.broadcast %cst_62 : f32 to vector<8x1xf32>
    %178 = arith.addf %176, %177 : vector<8x1xf32>
    %179 = math.rsqrt %178 : vector<8x1xf32>
    %180 = vector.broadcast %179 : vector<8x1xf32> to vector<8x256xf32>
    %181 = arith.mulf %171, %180 : vector<8x256xf32>
    %182 = vector.broadcast %134 : vector<8x1xf32> to vector<8x256xf32>
    %183 = arith.mulf %181, %182 : vector<8x256xf32>
    %184 = vector.broadcast %136 : vector<8x1xf32> to vector<8x256xf32>
    %185 = arith.addf %183, %184 : vector<8x256xf32>
    %cst_63 = arith.constant 0.000000e+00 : f32
    %186 = vector.broadcast %cst_63 : f32 to vector<8x256xf32>
    %187 = arith.cmpf ogt, %185, %186 : vector<8x256xf32>
    %188 = vector.broadcast %138 : vector<8x1xf32> to vector<8x256xf32>
    %189 = arith.mulf %188, %185 : vector<8x256xf32>
    %190 = arith.select %187, %185, %189 : vector<8x256xi1>, vector<8x256xf32>
    %191 = tpu.concatenate %164, %190 in 1 : vector<8x256xf32>, vector<8x256xf32> -> vector<8x512xf32>
    %c16 = arith.constant 16 : index
    %c0_64 = arith.constant 0 : index
    %192 = vector.load %arg11[%c16, %c0_64] : memref<40x512xf32, #tpu.memory_space<vmem>>, vector<8x512xf32>
    tpu.vector_store %arg11[%c16, %c0_64], %191 {strides = array<i32>} : memref<40x512xf32, #tpu.memory_space<vmem>>, vector<8x512xf32>,
    %c16_65 = arith.constant 16 : index
    %c0_66 = arith.constant 0 : index
    %193 = vector.load %arg11[%c16_65, %c0_66] : memref<40x512xf32, #tpu.memory_space<vmem>>, vector<24x512xf32>
    %c6 = arith.constant 6 : index
    %c0_67 = arith.constant 0 : index
    %194 = vector.load %arg2[%c6, %c0_67] : memref<10x512xf32, #tpu.memory_space<vmem>>, vector<1x512xf32>
    %c7 = arith.constant 7 : index
    %c0_68 = arith.constant 0 : index
    %195 = vector.load %arg2[%c7, %c0_68] : memref<10x512xf32, #tpu.memory_space<vmem>>, vector<1x512xf32>
    %196 = arith.mulf %194, %3 : vector<1x512xf32>
    %197 = arith.mulf %194, %4 : vector<1x512xf32>
    %198 = arith.mulf %195, %3 : vector<1x512xf32>
    %199 = arith.mulf %195, %4 : vector<1x512xf32>
    %c65_i32 = arith.constant 65 : i32
    %200 = tpu.dynamic_rotate %193 by %c65_i32 dim 1 : vector<24x512xf32>, i32 -> vector<24x512xf32>
    %201 = vector.broadcast %196 : vector<1x512xf32> to vector<24x512xf32>
    %202 = arith.mulf %200, %201 : vector<24x512xf32>
    %c64_i32 = arith.constant 64 : i32
    %203 = tpu.dynamic_rotate %193 by %c64_i32 dim 1 : vector<24x512xf32>, i32 -> vector<24x512xf32>
    %204 = vector.broadcast %194 : vector<1x512xf32> to vector<24x512xf32>
    %205 = arith.mulf %203, %204 : vector<24x512xf32>
    %c63_i32 = arith.constant 63 : i32
    %206 = tpu.dynamic_rotate %193 by %c63_i32 dim 1 : vector<24x512xf32>, i32 -> vector<24x512xf32>
    %207 = vector.broadcast %197 : vector<1x512xf32> to vector<24x512xf32>
    %208 = arith.mulf %206, %207 : vector<24x512xf32>
    %c1_i32_69 = arith.constant 1 : i32
    %209 = tpu.dynamic_rotate %193 by %c1_i32_69 dim 1 : vector<24x512xf32>, i32 -> vector<24x512xf32>
    %210 = vector.broadcast %3 : vector<1x512xf32> to vector<24x512xf32>
    %211 = arith.mulf %209, %210 : vector<24x512xf32>
    %c511_i32_70 = arith.constant 511 : i32
    %212 = tpu.dynamic_rotate %193 by %c511_i32_70 dim 1 : vector<24x512xf32>, i32 -> vector<24x512xf32>
    %213 = vector.broadcast %4 : vector<1x512xf32> to vector<24x512xf32>
    %214 = arith.mulf %212, %213 : vector<24x512xf32>
    %c449_i32 = arith.constant 449 : i32
    %215 = tpu.dynamic_rotate %193 by %c449_i32 dim 1 : vector<24x512xf32>, i32 -> vector<24x512xf32>
    %216 = vector.broadcast %198 : vector<1x512xf32> to vector<24x512xf32>
    %217 = arith.mulf %215, %216 : vector<24x512xf32>
    %c448_i32 = arith.constant 448 : i32
    %218 = tpu.dynamic_rotate %193 by %c448_i32 dim 1 : vector<24x512xf32>, i32 -> vector<24x512xf32>
    %219 = vector.broadcast %195 : vector<1x512xf32> to vector<24x512xf32>
    %220 = arith.mulf %218, %219 : vector<24x512xf32>
    %c447_i32 = arith.constant 447 : i32
    %221 = tpu.dynamic_rotate %193 by %c447_i32 dim 1 : vector<24x512xf32>, i32 -> vector<24x512xf32>
    %222 = vector.broadcast %199 : vector<1x512xf32> to vector<24x512xf32>
    %223 = arith.mulf %221, %222 : vector<24x512xf32>
    %224 = tpu.concatenate %202, %205, %208, %211, %193, %214, %217, %220, %223 in 0 : vector<24x512xf32>, vector<24x512xf32>, vector<24x512xf32>, vector<24x512xf32>, vector<24x512xf32>, vector<24x512xf32>, vector<24x512xf32>, vector<24x512xf32>, vector<24x512xf32> -> vector<216x512xf32>
    %c0_71 = arith.constant 0 : index
    %c0_72 = arith.constant 0 : index
    %225 = vector.load %arg5[%c0_71, %c0_72] : memref<8x216xf32, #tpu.memory_space<vmem>>, vector<8x216xf32>
    %cst_73 = arith.constant dense<0.000000e+00> : vector<8x512xf32>
    %226 = tpu.matmul %225, %224, %cst_73 {dimension_numbers = #tpu.dot_dimension_numbers<[1], [0], [0], [1], [0, 0, 1, 1], [], []>} : vector<8x216xf32>, vector<216x512xf32>, vector<8x512xf32> -> vector<8x512xf32>
    %c2_74 = arith.constant 2 : index
    %c0_75 = arith.constant 0 : index
    %c0_76 = arith.constant 0 : index
    %227 = vector.load %arg7[%c2_74, %c0_75, %c0_76] : memref<4x8x1xf32, #tpu.memory_space<vmem>>, vector<1x8x1xf32>
    %228 = vector.shape_cast %227 : vector<1x8x1xf32> to vector<8x1xf32>
    %c2_77 = arith.constant 2 : index
    %c0_78 = arith.constant 0 : index
    %c0_79 = arith.constant 0 : index
    %229 = vector.load %arg8[%c2_77, %c0_78, %c0_79] : memref<4x8x1xf32, #tpu.memory_space<vmem>>, vector<1x8x1xf32>
    %230 = vector.shape_cast %229 : vector<1x8x1xf32> to vector<8x1xf32>
    %c2_80 = arith.constant 2 : index
    %c0_81 = arith.constant 0 : index
    %c0_82 = arith.constant 0 : index
    %231 = vector.load %arg9[%c2_80, %c0_81, %c0_82] : memref<4x8x1xf32, #tpu.memory_space<vmem>>, vector<1x8x1xf32>
    %232 = vector.shape_cast %231 : vector<1x8x1xf32> to vector<8x1xf32>
    %233 = vector.extract_strided_slice %226 {offsets = [0, 0], sizes = [8, 256], strides = [1, 1]} : vector<8x512xf32> to vector<8x256xf32>
    %cst_83 = arith.constant dense<0.000000e+00> : vector<8xf32>
    %234 = vector.multi_reduction <add>, %233, %cst_83 [1] : vector<8x256xf32> to vector<8xf32>
    %235 = vector.shape_cast %234 : vector<8xf32> to vector<8x1xf32>
    %cst_84 = arith.constant 2.560000e+02 : f32
    %236 = vector.broadcast %cst_84 : f32 to vector<8x1xf32>
    %237 = arith.divf %235, %236 : vector<8x1xf32>
    %238 = vector.broadcast %237 : vector<8x1xf32> to vector<8x256xf32>
    %239 = arith.subf %233, %238 : vector<8x256xf32>
    %240 = arith.mulf %239, %239 : vector<8x256xf32>
    %cst_85 = arith.constant dense<0.000000e+00> : vector<8xf32>
    %241 = vector.multi_reduction <add>, %240, %cst_85 [1] : vector<8x256xf32> to vector<8xf32>
    %242 = vector.shape_cast %241 : vector<8xf32> to vector<8x1xf32>
    %cst_86 = arith.constant 2.560000e+02 : f32
    %243 = vector.broadcast %cst_86 : f32 to vector<8x1xf32>
    %244 = arith.divf %242, %243 : vector<8x1xf32>
    %cst_87 = arith.constant 9.99999974E-6 : f32
    %245 = vector.broadcast %cst_87 : f32 to vector<8x1xf32>
    %246 = arith.addf %244, %245 : vector<8x1xf32>
    %247 = math.rsqrt %246 : vector<8x1xf32>
    %248 = vector.broadcast %247 : vector<8x1xf32> to vector<8x256xf32>
    %249 = arith.mulf %239, %248 : vector<8x256xf32>
    %250 = vector.broadcast %228 : vector<8x1xf32> to vector<8x256xf32>
    %251 = arith.mulf %249, %250 : vector<8x256xf32>
    %252 = vector.broadcast %230 : vector<8x1xf32> to vector<8x256xf32>
    %253 = arith.addf %251, %252 : vector<8x256xf32>
    %cst_88 = arith.constant 0.000000e+00 : f32
    %254 = vector.broadcast %cst_88 : f32 to vector<8x256xf32>
    %255 = arith.cmpf ogt, %253, %254 : vector<8x256xf32>
    %256 = vector.broadcast %232 : vector<8x1xf32> to vector<8x256xf32>
    %257 = arith.mulf %256, %253 : vector<8x256xf32>
    %258 = arith.select %255, %253, %257 : vector<8x256xi1>, vector<8x256xf32>
    %259 = vector.extract_strided_slice %226 {offsets = [0, 256], sizes = [8, 256], strides = [1, 1]} : vector<8x512xf32> to vector<8x256xf32>
    %cst_89 = arith.constant dense<0.000000e+00> : vector<8xf32>
    %260 = vector.multi_reduction <add>, %259, %cst_89 [1] : vector<8x256xf32> to vector<8xf32>
    %261 = vector.shape_cast %260 : vector<8xf32> to vector<8x1xf32>
    %cst_90 = arith.constant 2.560000e+02 : f32
    %262 = vector.broadcast %cst_90 : f32 to vector<8x1xf32>
    %263 = arith.divf %261, %262 : vector<8x1xf32>
    %264 = vector.broadcast %263 : vector<8x1xf32> to vector<8x256xf32>
    %265 = arith.subf %259, %264 : vector<8x256xf32>
    %266 = arith.mulf %265, %265 : vector<8x256xf32>
    %cst_91 = arith.constant dense<0.000000e+00> : vector<8xf32>
    %267 = vector.multi_reduction <add>, %266, %cst_91 [1] : vector<8x256xf32> to vector<8xf32>
    %268 = vector.shape_cast %267 : vector<8xf32> to vector<8x1xf32>
    %cst_92 = arith.constant 2.560000e+02 : f32
    %269 = vector.broadcast %cst_92 : f32 to vector<8x1xf32>
    %270 = arith.divf %268, %269 : vector<8x1xf32>
    %cst_93 = arith.constant 9.99999974E-6 : f32
    %271 = vector.broadcast %cst_93 : f32 to vector<8x1xf32>
    %272 = arith.addf %270, %271 : vector<8x1xf32>
    %273 = math.rsqrt %272 : vector<8x1xf32>
    %274 = vector.broadcast %273 : vector<8x1xf32> to vector<8x256xf32>
    %275 = arith.mulf %265, %274 : vector<8x256xf32>
    %276 = vector.broadcast %228 : vector<8x1xf32> to vector<8x256xf32>
    %277 = arith.mulf %275, %276 : vector<8x256xf32>
    %278 = vector.broadcast %230 : vector<8x1xf32> to vector<8x256xf32>
    %279 = arith.addf %277, %278 : vector<8x256xf32>
    %cst_94 = arith.constant 0.000000e+00 : f32
    %280 = vector.broadcast %cst_94 : f32 to vector<8x256xf32>
    %281 = arith.cmpf ogt, %279, %280 : vector<8x256xf32>
    %282 = vector.broadcast %232 : vector<8x1xf32> to vector<8x256xf32>
    %283 = arith.mulf %282, %279 : vector<8x256xf32>
    %284 = arith.select %281, %279, %283 : vector<8x256xi1>, vector<8x256xf32>
    %285 = tpu.concatenate %258, %284 in 1 : vector<8x256xf32>, vector<8x256xf32> -> vector<8x512xf32>
    %c8 = arith.constant 8 : index
    %c0_95 = arith.constant 0 : index
    %286 = vector.load %arg11[%c8, %c0_95] : memref<40x512xf32, #tpu.memory_space<vmem>>, vector<8x512xf32>
    tpu.vector_store %arg11[%c8, %c0_95], %285 {strides = array<i32>} : memref<40x512xf32, #tpu.memory_space<vmem>>, vector<8x512xf32>,
    %c8_96 = arith.constant 8 : index
    %c0_97 = arith.constant 0 : index
    %287 = vector.load %arg11[%c8_96, %c0_97] : memref<40x512xf32, #tpu.memory_space<vmem>>, vector<32x512xf32>
    %c8_98 = arith.constant 8 : index
    %c0_99 = arith.constant 0 : index
    %288 = vector.load %arg2[%c8_98, %c0_99] : memref<10x512xf32, #tpu.memory_space<vmem>>, vector<1x512xf32>
    %c9 = arith.constant 9 : index
    %c0_100 = arith.constant 0 : index
    %289 = vector.load %arg2[%c9, %c0_100] : memref<10x512xf32, #tpu.memory_space<vmem>>, vector<1x512xf32>
    %290 = arith.mulf %288, %3 : vector<1x512xf32>
    %291 = arith.mulf %288, %4 : vector<1x512xf32>
    %292 = arith.mulf %289, %3 : vector<1x512xf32>
    %293 = arith.mulf %289, %4 : vector<1x512xf32>
    %c129_i32 = arith.constant 129 : i32
    %294 = tpu.dynamic_rotate %287 by %c129_i32 dim 1 : vector<32x512xf32>, i32 -> vector<32x512xf32>
    %295 = vector.broadcast %290 : vector<1x512xf32> to vector<32x512xf32>
    %296 = arith.mulf %294, %295 : vector<32x512xf32>
    %c128_i32 = arith.constant 128 : i32
    %297 = tpu.dynamic_rotate %287 by %c128_i32 dim 1 : vector<32x512xf32>, i32 -> vector<32x512xf32>
    %298 = vector.broadcast %288 : vector<1x512xf32> to vector<32x512xf32>
    %299 = arith.mulf %297, %298 : vector<32x512xf32>
    %c127_i32 = arith.constant 127 : i32
    %300 = tpu.dynamic_rotate %287 by %c127_i32 dim 1 : vector<32x512xf32>, i32 -> vector<32x512xf32>
    %301 = vector.broadcast %291 : vector<1x512xf32> to vector<32x512xf32>
    %302 = arith.mulf %300, %301 : vector<32x512xf32>
    %c1_i32_101 = arith.constant 1 : i32
    %303 = tpu.dynamic_rotate %287 by %c1_i32_101 dim 1 : vector<32x512xf32>, i32 -> vector<32x512xf32>
    %304 = vector.broadcast %3 : vector<1x512xf32> to vector<32x512xf32>
    %305 = arith.mulf %303, %304 : vector<32x512xf32>
    %c511_i32_102 = arith.constant 511 : i32
    %306 = tpu.dynamic_rotate %287 by %c511_i32_102 dim 1 : vector<32x512xf32>, i32 -> vector<32x512xf32>
    %307 = vector.broadcast %4 : vector<1x512xf32> to vector<32x512xf32>
    %308 = arith.mulf %306, %307 : vector<32x512xf32>
    %c385_i32 = arith.constant 385 : i32
    %309 = tpu.dynamic_rotate %287 by %c385_i32 dim 1 : vector<32x512xf32>, i32 -> vector<32x512xf32>
    %310 = vector.broadcast %292 : vector<1x512xf32> to vector<32x512xf32>
    %311 = arith.mulf %309, %310 : vector<32x512xf32>
    %c384_i32 = arith.constant 384 : i32
    %312 = tpu.dynamic_rotate %287 by %c384_i32 dim 1 : vector<32x512xf32>, i32 -> vector<32x512xf32>
    %313 = vector.broadcast %289 : vector<1x512xf32> to vector<32x512xf32>
    %314 = arith.mulf %312, %313 : vector<32x512xf32>
    %c383_i32 = arith.constant 383 : i32
    %315 = tpu.dynamic_rotate %287 by %c383_i32 dim 1 : vector<32x512xf32>, i32 -> vector<32x512xf32>
    %316 = vector.broadcast %293 : vector<1x512xf32> to vector<32x512xf32>
    %317 = arith.mulf %315, %316 : vector<32x512xf32>
    %318 = tpu.concatenate %296, %299, %302, %305, %287, %308, %311, %314, %317 in 0 : vector<32x512xf32>, vector<32x512xf32>, vector<32x512xf32>, vector<32x512xf32>, vector<32x512xf32>, vector<32x512xf32>, vector<32x512xf32>, vector<32x512xf32>, vector<32x512xf32> -> vector<288x512xf32>
    %c0_103 = arith.constant 0 : index
    %c0_104 = arith.constant 0 : index
    %319 = vector.load %arg6[%c0_103, %c0_104] : memref<8x288xf32, #tpu.memory_space<vmem>>, vector<8x288xf32>
    %cst_105 = arith.constant dense<0.000000e+00> : vector<8x512xf32>
    %320 = tpu.matmul %319, %318, %cst_105 {dimension_numbers = #tpu.dot_dimension_numbers<[1], [0], [0], [1], [0, 0, 1, 1], [], []>} : vector<8x288xf32>, vector<288x512xf32>, vector<8x512xf32> -> vector<8x512xf32>
    %c3_106 = arith.constant 3 : index
    %c0_107 = arith.constant 0 : index
    %c0_108 = arith.constant 0 : index
    %321 = vector.load %arg7[%c3_106, %c0_107, %c0_108] : memref<4x8x1xf32, #tpu.memory_space<vmem>>, vector<1x8x1xf32>
    %322 = vector.shape_cast %321 : vector<1x8x1xf32> to vector<8x1xf32>
    %c3_109 = arith.constant 3 : index
    %c0_110 = arith.constant 0 : index
    %c0_111 = arith.constant 0 : index
    %323 = vector.load %arg8[%c3_109, %c0_110, %c0_111] : memref<4x8x1xf32, #tpu.memory_space<vmem>>, vector<1x8x1xf32>
    %324 = vector.shape_cast %323 : vector<1x8x1xf32> to vector<8x1xf32>
    %c3_112 = arith.constant 3 : index
    %c0_113 = arith.constant 0 : index
    %c0_114 = arith.constant 0 : index
    %325 = vector.load %arg9[%c3_112, %c0_113, %c0_114] : memref<4x8x1xf32, #tpu.memory_space<vmem>>, vector<1x8x1xf32>
    %326 = vector.shape_cast %325 : vector<1x8x1xf32> to vector<8x1xf32>
    %327 = vector.extract_strided_slice %320 {offsets = [0, 0], sizes = [8, 256], strides = [1, 1]} : vector<8x512xf32> to vector<8x256xf32>
    %cst_115 = arith.constant dense<0.000000e+00> : vector<8xf32>
    %328 = vector.multi_reduction <add>, %327, %cst_115 [1] : vector<8x256xf32> to vector<8xf32>
    %329 = vector.shape_cast %328 : vector<8xf32> to vector<8x1xf32>
    %cst_116 = arith.constant 2.560000e+02 : f32
    %330 = vector.broadcast %cst_116 : f32 to vector<8x1xf32>
    %331 = arith.divf %329, %330 : vector<8x1xf32>
    %332 = vector.broadcast %331 : vector<8x1xf32> to vector<8x256xf32>
    %333 = arith.subf %327, %332 : vector<8x256xf32>
    %334 = arith.mulf %333, %333 : vector<8x256xf32>
    %cst_117 = arith.constant dense<0.000000e+00> : vector<8xf32>
    %335 = vector.multi_reduction <add>, %334, %cst_117 [1] : vector<8x256xf32> to vector<8xf32>
    %336 = vector.shape_cast %335 : vector<8xf32> to vector<8x1xf32>
    %cst_118 = arith.constant 2.560000e+02 : f32
    %337 = vector.broadcast %cst_118 : f32 to vector<8x1xf32>
    %338 = arith.divf %336, %337 : vector<8x1xf32>
    %cst_119 = arith.constant 9.99999974E-6 : f32
    %339 = vector.broadcast %cst_119 : f32 to vector<8x1xf32>
    %340 = arith.addf %338, %339 : vector<8x1xf32>
    %341 = math.rsqrt %340 : vector<8x1xf32>
    %342 = vector.broadcast %341 : vector<8x1xf32> to vector<8x256xf32>
    %343 = arith.mulf %333, %342 : vector<8x256xf32>
    %344 = vector.broadcast %322 : vector<8x1xf32> to vector<8x256xf32>
    %345 = arith.mulf %343, %344 : vector<8x256xf32>
    %346 = vector.broadcast %324 : vector<8x1xf32> to vector<8x256xf32>
    %347 = arith.addf %345, %346 : vector<8x256xf32>
    %cst_120 = arith.constant 0.000000e+00 : f32
    %348 = vector.broadcast %cst_120 : f32 to vector<8x256xf32>
    %349 = arith.cmpf ogt, %347, %348 : vector<8x256xf32>
    %350 = vector.broadcast %326 : vector<8x1xf32> to vector<8x256xf32>
    %351 = arith.mulf %350, %347 : vector<8x256xf32>
    %352 = arith.select %349, %347, %351 : vector<8x256xi1>, vector<8x256xf32>
    %353 = vector.extract_strided_slice %320 {offsets = [0, 256], sizes = [8, 256], strides = [1, 1]} : vector<8x512xf32> to vector<8x256xf32>
    %cst_121 = arith.constant dense<0.000000e+00> : vector<8xf32>
    %354 = vector.multi_reduction <add>, %353, %cst_121 [1] : vector<8x256xf32> to vector<8xf32>
    %355 = vector.shape_cast %354 : vector<8xf32> to vector<8x1xf32>
    %cst_122 = arith.constant 2.560000e+02 : f32
    %356 = vector.broadcast %cst_122 : f32 to vector<8x1xf32>
    %357 = arith.divf %355, %356 : vector<8x1xf32>
    %358 = vector.broadcast %357 : vector<8x1xf32> to vector<8x256xf32>
    %359 = arith.subf %353, %358 : vector<8x256xf32>
    %360 = arith.mulf %359, %359 : vector<8x256xf32>
    %cst_123 = arith.constant dense<0.000000e+00> : vector<8xf32>
    %361 = vector.multi_reduction <add>, %360, %cst_123 [1] : vector<8x256xf32> to vector<8xf32>
    %362 = vector.shape_cast %361 : vector<8xf32> to vector<8x1xf32>
    %cst_124 = arith.constant 2.560000e+02 : f32
    %363 = vector.broadcast %cst_124 : f32 to vector<8x1xf32>
    %364 = arith.divf %362, %363 : vector<8x1xf32>
    %cst_125 = arith.constant 9.99999974E-6 : f32
    %365 = vector.broadcast %cst_125 : f32 to vector<8x1xf32>
    %366 = arith.addf %364, %365 : vector<8x1xf32>
    %367 = math.rsqrt %366 : vector<8x1xf32>
    %368 = vector.broadcast %367 : vector<8x1xf32> to vector<8x256xf32>
    %369 = arith.mulf %359, %368 : vector<8x256xf32>
    %370 = vector.broadcast %322 : vector<8x1xf32> to vector<8x256xf32>
    %371 = arith.mulf %369, %370 : vector<8x256xf32>
    %372 = vector.broadcast %324 : vector<8x1xf32> to vector<8x256xf32>
    %373 = arith.addf %371, %372 : vector<8x256xf32>
    %cst_126 = arith.constant 0.000000e+00 : f32
    %374 = vector.broadcast %cst_126 : f32 to vector<8x256xf32>
    %375 = arith.cmpf ogt, %373, %374 : vector<8x256xf32>
    %376 = vector.broadcast %326 : vector<8x1xf32> to vector<8x256xf32>
    %377 = arith.mulf %376, %373 : vector<8x256xf32>
    %378 = arith.select %375, %373, %377 : vector<8x256xi1>, vector<8x256xf32>
    %379 = tpu.concatenate %352, %378 in 1 : vector<8x256xf32>, vector<8x256xf32> -> vector<8x512xf32>
    %c0_127 = arith.constant 0 : index
    %c0_128 = arith.constant 0 : index
    %c0_129 = arith.constant 0 : index
    %380 = vector.load %arg10[%c0_127, %c0_128, %c0_129] : memref<1x8x512xf32, #tpu.memory_space<vmem>>, vector<1x8x512xf32>
    %381 = vector.shape_cast %380 : vector<1x8x512xf32> to vector<8x512xf32>
    %382 = vector.shape_cast %379 : vector<8x512xf32> to vector<1x8x512xf32>
    tpu.vector_store %arg10[%c0_127, %c0_128, %c0_129], %382 {strides = array<i32>} : memref<1x8x512xf32, #tpu.memory_space<vmem>>, vector<1x8x512xf32>,
    return
  }
  func.func @transform_0(%arg0: i32) -> (i32, i32, i32) {
    %c0_i32 = arith.constant 0 : i32
    %c0_i32_0 = arith.constant 0 : i32
    %c0_i32_1 = arith.constant 0 : i32
    return %arg0, %c0_i32, %c0_i32_0 : i32, i32, i32
  }
  func.func @transform_1(%arg0: i32) -> (i32, i32) {
    %c0_i32 = arith.constant 0 : i32
    %c0_i32_0 = arith.constant 0 : i32
    %c0_i32_1 = arith.constant 0 : i32
    return %c0_i32, %c0_i32_0 : i32, i32
  }
  func.func @transform_2(%arg0: i32) -> (i32, i32) {
    %c0_i32 = arith.constant 0 : i32
    %c0_i32_0 = arith.constant 0 : i32
    %c0_i32_1 = arith.constant 0 : i32
    return %c0_i32, %c0_i32_0 : i32, i32
  }
  func.func @transform_3(%arg0: i32) -> (i32, i32) {
    %c0_i32 = arith.constant 0 : i32
    %c0_i32_0 = arith.constant 0 : i32
    %c0_i32_1 = arith.constant 0 : i32
    return %c0_i32, %c0_i32_0 : i32, i32
  }
  func.func @transform_4(%arg0: i32) -> (i32, i32) {
    %c0_i32 = arith.constant 0 : i32
    %c0_i32_0 = arith.constant 0 : i32
    %c0_i32_1 = arith.constant 0 : i32
    return %c0_i32, %c0_i32_0 : i32, i32
  }
  func.func @transform_5(%arg0: i32) -> (i32, i32) {
    %c0_i32 = arith.constant 0 : i32
    %c0_i32_0 = arith.constant 0 : i32
    %c0_i32_1 = arith.constant 0 : i32
    return %c0_i32, %c0_i32_0 : i32, i32
  }
  func.func @transform_6(%arg0: i32) -> (i32, i32, i32) {
    %c0_i32 = arith.constant 0 : i32
    %c0_i32_0 = arith.constant 0 : i32
    %c0_i32_1 = arith.constant 0 : i32
    %c0_i32_2 = arith.constant 0 : i32
    return %c0_i32, %c0_i32_0, %c0_i32_1 : i32, i32, i32
  }
  func.func @transform_7(%arg0: i32) -> (i32, i32, i32) {
    %c0_i32 = arith.constant 0 : i32
    %c0_i32_0 = arith.constant 0 : i32
    %c0_i32_1 = arith.constant 0 : i32
    %c0_i32_2 = arith.constant 0 : i32
    return %c0_i32, %c0_i32_0, %c0_i32_1 : i32, i32, i32
  }
  func.func @transform_8(%arg0: i32) -> (i32, i32, i32) {
    %c0_i32 = arith.constant 0 : i32
    %c0_i32_0 = arith.constant 0 : i32
    %c0_i32_1 = arith.constant 0 : i32
    %c0_i32_2 = arith.constant 0 : i32
    return %c0_i32, %c0_i32_0, %c0_i32_1 : i32, i32, i32
  }
  func.func @transform_9(%arg0: i32) -> (i32, i32, i32) {
    %c0_i32 = arith.constant 0 : i32
    %c0_i32_0 = arith.constant 0 : i32
    %c0_i32_1 = arith.constant 0 : i32
    return %arg0, %c0_i32, %c0_i32_0 : i32, i32, i32
  }
}

</mosaic_0001>

<bundles_post_ra>
// kernel: ds_ddb_forward.1
= control target key start
LH: loop header
LB: loop body
LE: loop exit
PB: predicated region body
PF: predicated region fallthrough
CT: control target
= control target key end

     0   :  { %s2683_s13 = smov 111   ;;  %s2684_s18 = smov 112   ;;  %v4863_v4 = vmov 0.0   ;;  %v63_v5 = vlaneseq  ;;  %vm362_vm8 = vcmask 588800   ;;  %vm989_vm14 = vcmask 130048   ;;  %s4853_s0 = inlined_call_operand.vmem [shape: f32[1,8,512], index: 0, kind: input, shape index: {}]   ;;  %s4854_s1 = inlined_call_operand.vmem [shape: f32[10,512], index: 1, kind: input, shape index: {}]   ;;  %s4855_s2 = inlined_call_operand.vmem [shape: f32[8,72], index: 2, kind: input, shape index: {}]   ;;  %s4856_s6 = inlined_call_operand.vmem [shape: f32[4,8,1], index: 6, kind: input, shape index: {}]   ;;  %s4857_s8 = inlined_call_operand.vmem [shape: f32[4,8,1], index: 8, kind: input, shape index: {}]   ;;  %s4858_s7 = inlined_call_operand.vmem [shape: f32[4,8,1], index: 7, kind: input, shape index: {}]   ;;  %s4859_s3 = inlined_call_operand.vmem [shape: f32[8,144], index: 3, kind: input, shape index: {}]   ;;  %s4860_s4 = inlined_call_operand.vmem [shape: f32[8,216], index: 4, kind: input, shape index: {}]   ;;  %s4861_s5 = inlined_call_operand.vmem [shape: f32[8,288], index: 5, kind: input, shape index: {}]   ;;  %s4862_s9 = inlined_call_operand.vmem [shape: f32[1,8,512], index: 9, kind: output, shape index: {}]  }
   0x1   :  { %v2755_v0 = vld [vmem:[%s4853_s0 + $0x10] sm:$0xff]  ;;  %v2760_v1 = vld [vmem:[%s4853_s0] sm:$0xff]  ;;  %v2767_v2 = vld [vmem:[%s4853_s0 + $0x18] sm:$0xff]  ;;  %s2685_s19 = smov 113   ;;  %s2686_s20 = smov 127   ;;  %430 = vmatprep.mubr.f32.mxu0 %v4863_v4  ;;  %501 = vmatprep.mubr.f32.mxu1 %v4863_v4 }
   0x2   :  { %327 = vrot.lane.b32.xlu1 %v2755_v0, %s2683_s13  ;;  %323 = vrot.lane.b32.xlu0 %v2760_v1, %s2683_s13  ;;  %v2772_v3 = vld [vmem:[%s4853_s0 + $0x8] sm:$0xff]  ;;  %s2687_s21 = smov 1   ;;  %s2688_s22 = smov 15   ;;  %v72_v8 = vshrl.u32 %v63_v5, 7  ;;  %v2823_v10 = vand.u32 127, %v63_v5 }
   0x3   :  { %s2689_s23 = smov 16   ;;  %s2691_s24 = smov 17   ;;  %v2817_v6 = vld [vmem:[%s4854_s1 + $0x1] ss:$8 sm:$0xf] }
   0x4   :  { %v2610_v7 = vld [vmem:[%s4854_s1 + $0x3] ss:$8 sm:$0xf]  ;;  %v2825_v11 = vsub.s32 0, %v72_v8  ;;  %v2827_v12 = vsub.s32 1, %v72_v8  ;;  %v2829_v13 = vsub.s32 2, %v72_v8 }
   0x5   :  { %v54_v9 = vmul.f32 %v2610_v7, %v2817_v6  ;;  %v2831_v14 = vsub.s32 3, %v72_v8  ;;  %vm331_vm0 = vcmp.lt.s32.totalorder %v2823_v10, 111  ;;  %vm293_vm1 = vcmp.lt.s32.totalorder %v2823_v10, 112  ;;  %v2846_v40 = vld [vmem:[%s4854_s1] ss:$8 sm:$0xf] }
   0x6   :  { %329 = vrot.lane.b32.xlu1 %v2767_v2, %s2683_s13  ;;  %325 = vrot.lane.b32.xlu0 %v2772_v3, %s2683_s13  ;;  %v306_v33 = vrot.slane %v2610_v7, %v2827_v12  ;;  %v310_v35 = vrot.slane %v2610_v7, %v2829_v13  ;;  %v302_v36 = vrot.slane %v2610_v7, %v2825_v11  ;;  %vm255_vm2 = vcmp.lt.s32.totalorder %v2823_v10, 113  ;;  %s2697_s25 = smov 33   ;;  %s2698_s26 = smov 95  }
   0x7   :  { %v344_v17 = vrot.slane %v54_v9, %v2827_v12  ;;  %v352_v18 = vrot.slane %v54_v9, %v2831_v14  ;;  %v340_v19 = vrot.slane %v54_v9, %v2825_v11  ;;  %v348_v20 = vrot.slane %v54_v9, %v2829_v13  ;;  %s2699_s30 = smov 63   ;;  %s2700_s10 = smov 64  }
   0x8   :  { %v314_v34 = vrot.slane %v2610_v7, %v2831_v14  ;;  %v53_v48 = vmul.f32 %v2610_v7, %v2846_v40  ;;  %vm217_vm3 = vcmp.lt.s32.totalorder %v2823_v10, 127  ;;  %v2857_v9 = vrot.slane %v2817_v6, %v2827_v12  ;;  %s2701_s11 = smov 65  }
   0x9   :  { %vm179_vm4 = vcmp.lt.s32.totalorder %v2823_v10, 1  ;;  %vm141_vm5 = vcmp.lt.s32.totalorder %v2823_v10, 15  ;;  %vm103_vm6 = vcmp.lt.s32.totalorder %v2823_v10, 16  ;;  %vm65_vm7 = vcmp.lt.s32.totalorder %v2823_v10, 17 }
   0xa   :  { %287 = vrot.lane.b32.xlu1 %v2772_v3, %s2684_s18  ;;  %285 = vrot.lane.b32.xlu0 %v2760_v1, %s2684_s18  ;;  %v268_v51 = vrot.slane %v53_v48, %v2827_v12  ;;  %v276_v52 = vrot.slane %v53_v48, %v2831_v14  ;;  %v272_v53 = vrot.slane %v53_v48, %v2829_v13  ;;  %vm895_vm9 = vcmp.lt.s32.totalorder %v2823_v10, 96 }
   0xb   :  { %v264_v54 = vrot.slane %v53_v48, %v2825_v11  ;;  %4953 = vst [vmem:[#allocation3_spill] sm:$0xff] %v2857_v9  ;;  %vm841_vm15 = vcmp.lt.s32.totalorder %v2823_v10, 97 }
   0xe   :  { %291 = vrot.lane.b32.xlu1 %v2767_v2, %s2684_s18  ;;  %289 = vrot.lane.b32.xlu0 %v2755_v0, %s2684_s18 }
  0x12   :  { %249 = vrot.lane.b32.xlu1 %v2772_v3, %s2685_s19  ;;  %247 = vrot.lane.b32.xlu0 %v2760_v1, %s2685_s19 }
  0x16   :  { %253 = vrot.lane.b32.xlu1 %v2767_v2, %s2685_s19  ;;  %251 = vrot.lane.b32.xlu0 %v2755_v0, %s2685_s19  ;;  %s2693_s19 = smov 96  }
  0x1a   :  { %211 = vrot.lane.b32.xlu1 %v2772_v3, %s2686_s20  ;;  %209 = vrot.lane.b32.xlu0 %v2760_v1, %s2686_s20 }
  0x1e   :  { %215 = vrot.lane.b32.xlu1 %v2767_v2, %s2686_s20  ;;  %213 = vrot.lane.b32.xlu0 %v2755_v0, %s2686_s20 }
  0x22   :  { %173 = vrot.lane.b32.xlu1 %v2772_v3, %s2687_s21  ;;  %171 = vrot.lane.b32.xlu0 %v2760_v1, %s2687_s21 }
  0x26   :  { %177 = vrot.lane.b32.xlu1 %v2767_v2, %s2687_s21  ;;  %175 = vrot.lane.b32.xlu0 %v2755_v0, %s2687_s21 }
  0x2a   :  { %135 = vrot.lane.b32.xlu1 %v2772_v3, %s2688_s22  ;;  %133 = vrot.lane.b32.xlu0 %v2760_v1, %s2688_s22 }
  0x2e   :  { %139 = vrot.lane.b32.xlu1 %v2767_v2, %s2688_s22  ;;  %137 = vrot.lane.b32.xlu0 %v2755_v0, %s2688_s22  ;;  %s2694_s22 = smov 97  }
  0x32   :  { %97 = vrot.lane.b32.xlu1 %v2772_v3, %s2689_s23  ;;  %95 = vrot.lane.b32.xlu0 %v2760_v1, %s2689_s23 }
  0x36   :  { %101 = vrot.lane.b32.xlu1 %v2767_v2, %s2689_s23  ;;  %99 = vrot.lane.b32.xlu0 %v2755_v0, %s2689_s23  ;;  %s2695_s23 = smov 31  }
  0x3a   :  { %57 = vrot.lane.b32.xlu1 %v2772_v3, %s2691_s24  ;;  %55 = vrot.lane.b32.xlu0 %v2760_v1, %s2691_s24 }
  0x3e   :  { %61 = vrot.lane.b32.xlu1 %v2767_v2, %s2691_s24  ;;  %59 = vrot.lane.b32.xlu0 %v2755_v0, %s2691_s24  ;;  %s2696_s24 = smov 32  }
  0x74   :  { %v328_v15 = vpop.permute.xlu1 %327  ;;  %v324_v16 = vpop.permute.xlu0 %323 }
  0x78   :  { %v330_v21 = vpop.permute.xlu1 %329  ;;  %v326_v22 = vpop.permute.xlu0 %325 }
  0x79   :  { %v333_v23 = vsel %vm331_vm0, %v326_v22, %v328_v15  ;;  %v335_v24 = vsel %vm331_vm0, %v330_v21, %v324_v16  ;;  %v334_v25 = vsel %vm331_vm0, %v324_v16, %v326_v22  ;;  %v332_v26 = vsel %vm331_vm0, %v328_v15, %v330_v21 }
  0x7a   :  { %v358_v27 = vmul.f32 %v344_v17, %v333_v23  ;;  %v360_v28 = vmul.f32 %v352_v18, %v335_v24  ;;  %v357_v29 = vmul.f32 %v340_v19, %v334_v25  ;;  %v359_v30 = vmul.f32 %v348_v20, %v332_v26 }
  0x7b   :  { %v2861_v15 = vrot.slane %v2817_v6, %v2831_v14  ;;  %v2865_v16 = vrot.slane %v2817_v6, %v2829_v13  ;;  %v2869_v17 = vrot.slane %v2817_v6, %v2825_v11  ;;  %vm723_vm0 = vcmp.lt.s32.totalorder %v2823_v10, 31 }
  0x7c   :  { %v288_v31 = vpop.permute.xlu1 %287  ;;  %380 = vmatprep.subr.mxu0 %v358_v27  ;;  %451 = vmatprep.subr.mxu1 %v360_v28  ;;  %v286_v32 = vpop.permute.xlu0 %285  ;;  %v2885_v27 = vrot.slane %v2846_v40, %v2827_v12 }
  0x7d   :  { %381 = vmatpush1.msra.mxu0 %v357_v29  ;;  %452 = vmatpush1.msra.mxu1 %v359_v30  ;;  %v296_v37 = vsel %vm293_vm1, %v286_v32, %v288_v31  ;;  %4954 = vst [vmem:[#allocation4_spill] sm:$0xff] %v2861_v15  ;;  %4955 = vst [vmem:[#allocation5_spill] sm:$0xff] %v2865_v16  ;;  %v2891_v29 = vld [vmem:[%s4854_s1 + $0x2] ss:$8 sm:$0xf] }
  0x7e   :  { %v319_v47 = vmul.f32 %v302_v36, %v296_v37  ;;  %4956 = vst [vmem:[#allocation6_spill] sm:$0xff] %v2869_v17  ;;  %4957 = vst [vmem:[#allocation7_spill] sm:$0xff] %v2885_v27  ;;  %v2908_v36 = vrot.slane %v2846_v40, %v2829_v13  ;;  %v52_v37 = vmul.f32 %v2891_v29, %v2817_v6 }
  0x80   :  { %v292_v38 = vpop.permute.xlu1 %291  ;;  %v290_v39 = vpop.permute.xlu0 %289  ;;  %4960 = vst [vmem:[#allocation10_spill] sm:$0xff] %v2908_v36 }
  0x81   :  { %v297_v41 = vsel %vm293_vm1, %v292_v38, %v286_v32  ;;  %v294_v42 = vsel %vm293_vm1, %v290_v39, %v292_v38  ;;  %v295_v43 = vsel %vm293_vm1, %v288_v31, %v290_v39  ;;  %vm669_vm1 = vcmp.lt.s32.totalorder %v2823_v10, 32 }
  0x82   :  { %v320_v44 = vmul.f32 %v306_v33, %v295_v43  ;;  %v322_v45 = vmul.f32 %v314_v34, %v297_v41  ;;  %v321_v46 = vmul.f32 %v310_v35, %v294_v42  ;;  %v2897_v33 = vrot.slane %v2846_v40, %v2825_v11 }
  0x83   :  { %v2901_v34 = vrot.slane %v2846_v40, %v2831_v14 }
  0x84   :  { %v250_v49 = vpop.permute.xlu1 %249  ;;  %382 = vmatprep.subr.mxu0 %v320_v44  ;;  %453 = vmatprep.subr.mxu1 %v322_v45  ;;  %v248_v50 = vpop.permute.xlu0 %247  ;;  %4958 = vst [vmem:[#allocation8_spill] sm:$0xff] %v2897_v33 }
  0x85   :  { %383 = vmatpush1.msra.mxu0 %v319_v47  ;;  %454 = vmatpush1.msra.mxu1 %v321_v46  ;;  %v258_v55 = vsel %vm255_vm2, %v248_v50, %v250_v49  ;;  %4959 = vst [vmem:[#allocation9_spill] sm:$0xff] %v2901_v34  ;;  %v154_v47 = vrot.slane %v52_v37, %v2827_v12 }
  0x86   :  { %v281_v5 = vmul.f32 %v264_v54, %v258_v55  ;;  %v158_v54 = vrot.slane %v52_v37, %v2829_v13 }
  0x88   :  { %v254_v56 = vpop.permute.xlu1 %253  ;;  %v252_v57 = vpop.permute.xlu0 %251 }
  0x89   :  { %v259_v58 = vsel %vm255_vm2, %v254_v56, %v248_v50  ;;  %v256_v59 = vsel %vm255_vm2, %v252_v57, %v254_v56  ;;  %v257_v60 = vsel %vm255_vm2, %v250_v49, %v252_v57  ;;  %vm615_vm2 = vcmp.lt.s32.totalorder %v2823_v10, 33 }
  0x8a   :  { %v282_v61 = vmul.f32 %v268_v51, %v257_v60  ;;  %v284_v62 = vmul.f32 %v276_v52, %v259_v58  ;;  %v283_v63 = vmul.f32 %v272_v53, %v256_v59  ;;  %v150_v52 = vrot.slane %v52_v37, %v2825_v11 }
  0x8b   :  { %v162_v53 = vrot.slane %v52_v37, %v2831_v14 }
  0x8c   :  { %v212_v7 = vpop.permute.xlu1 %211  ;;  %384 = vmatprep.subr.mxu0 %v282_v61  ;;  %455 = vmatprep.subr.mxu1 %v284_v62  ;;  %v210_v8 = vpop.permute.xlu0 %209 }
  0x8d   :  { %385 = vmatpush1.msra.mxu0 %v281_v5  ;;  %456 = vmatpush1.msra.mxu1 %v283_v63  ;;  %v220_v18 = vsel %vm217_vm3, %v210_v8, %v212_v7  ;;  %v116_v63 = vrot.slane %v2891_v29, %v2827_v12 }
  0x8e   :  { %v243_v28 = vmul.f32 %v2869_v17, %v220_v18  ;;  %v112_v18 = vrot.slane %v2891_v29, %v2825_v11 }
  0x90   :  { %v216_v19 = vpop.permute.xlu1 %215  ;;  %v214_v20 = vpop.permute.xlu0 %213 }
  0x91   :  { %v221_v21 = vsel %vm217_vm3, %v216_v19, %v210_v8  ;;  %v218_v22 = vsel %vm217_vm3, %v214_v20, %v216_v19  ;;  %v219_v23 = vsel %vm217_vm3, %v212_v7, %v214_v20  ;;  %v124_v20 = vrot.slane %v2891_v29, %v2831_v14 }
  0x92   :  { %v244_v24 = vmul.f32 %v2857_v9, %v219_v23  ;;  %v246_v25 = vmul.f32 %v2861_v15, %v221_v21  ;;  %v245_v26 = vmul.f32 %v2865_v16, %v218_v22  ;;  %v120_v21 = vrot.slane %v2891_v29, %v2829_v13 }
  0x93   :  { %v51_v22 = vmul.f32 %v2891_v29, %v2846_v40 }
  0x94   :  { %v174_v30 = vpop.permute.xlu1 %173  ;;  %386 = vmatprep.subr.mxu0 %v244_v24  ;;  %457 = vmatprep.subr.mxu1 %v246_v25  ;;  %v172_v31 = vpop.permute.xlu0 %171 }
  0x95   :  { %v182_v32 = vsel %vm179_vm4, %v172_v31, %v174_v30  ;;  %387 = vmatpush1.msra.mxu0 %v243_v28  ;;  %458 = vmatpush1.msra.mxu1 %v245_v26 }
  0x96   :  { %388 = vmatprep.subr.mxu0 %v2772_v3  ;;  %v206_v35 = vmul.f32 %v2885_v27, %v182_v32  ;;  %459 = vmatprep.subr.mxu1 %v2767_v2 }
  0x97   :  { %389 = vmatpush1.msra.mxu0 %v2760_v1  ;;  %460 = vmatpush1.msra.mxu1 %v2755_v0 }
  0x98   :  { %v178_v38 = vpop.permute.xlu1 %177  ;;  %390 = vmatprep.subr.mxu0 %v206_v35  ;;  %v176_v39 = vpop.permute.xlu0 %175  ;;  %v78_v35 = vrot.slane %v51_v22, %v2827_v12 }
  0x99   :  { %v183_v41 = vsel %vm179_vm4, %v178_v38, %v172_v31  ;;  %v180_v42 = vsel %vm179_vm4, %v176_v39, %v178_v38  ;;  %v181_v43 = vsel %vm179_vm4, %v174_v30, %v176_v39 }
  0x9a   :  { %v205_v44 = vmul.f32 %v2897_v33, %v183_v41  ;;  %v208_v45 = vmul.f32 %v2901_v34, %v180_v42  ;;  %v207_v46 = vmul.f32 %v2908_v36, %v181_v43  ;;  %v74_v41 = vrot.slane %v51_v22, %v2825_v11 }
  0x9b   :  { %v86_v42 = vrot.slane %v51_v22, %v2831_v14  ;;  %v82_v43 = vrot.slane %v51_v22, %v2829_v13 }
  0x9c   :  { %v136_v48 = vpop.permute.xlu1 %135  ;;  %391 = vmatpush1.msra.mxu0 %v205_v44  ;;  %461 = vmatprep.subr.mxu1 %v208_v45  ;;  %v134_v49 = vpop.permute.xlu0 %133 }
  0x9d   :  { %v144_v50 = vsel %vm141_vm5, %v134_v49, %v136_v48  ;;  %462 = vmatpush1.msra.mxu1 %v207_v46 }
  0x9e   :  { %v168_v51 = vmul.f32 %v154_v47, %v144_v50 }
  0xa0   :  { %v140_v55 = vpop.permute.xlu1 %139  ;;  %392 = vmatprep.subr.mxu0 %v168_v51  ;;  %v138_v56 = vpop.permute.xlu0 %137  ;;  %v361_v51 = vld [vmem:[%s4855_s2] sm:$0xff] }
  0xa1   :  { %v145_v57 = vsel %vm141_vm5, %v140_v55, %v134_v49  ;;  %v142_v58 = vsel %vm141_vm5, %v138_v56, %v140_v55  ;;  %v143_v59 = vsel %vm141_vm5, %v136_v48, %v138_v56  ;;  %vm949_vm5 = vcmp.lt.s32.totalorder %v2823_v10, 95 }
  0xa2   :  { %v167_v60 = vmul.f32 %v150_v52, %v145_v57  ;;  %v170_v61 = vmul.f32 %v162_v53, %v142_v58  ;;  %v169_v62 = vmul.f32 %v158_v54, %v143_v59  ;;  %v2692_v53 = vmov 0  }
  0xa3   :  { %2653 = vset.pattern.permute.xlu1 %v2692_v53  ;;  %2654 = vset.pattern.permute.xlu0 %v2692_v53 }
  0xa4   :  { %v98_v5 = vpop.permute.xlu1 %97  ;;  %393 = vmatpush1.msra.mxu0 %v167_v60  ;;  %463 = vmatprep.subr.mxu1 %v170_v61  ;;  %v96_v7 = vpop.permute.xlu0 %95  ;;  %v508_v60 = vld [vmem:[%s4856_s6] sm:$0xff] }
  0xa5   :  { %v106_v8 = vsel %vm103_vm6, %v96_v7, %v98_v5  ;;  %464 = vmatpush1.msra.mxu1 %v169_v62  ;;  %v510_v61 = vld [vmem:[%s4857_s8] sm:$0xff] }
  0xa6   :  { %v130_v19 = vmul.f32 %v116_v63, %v106_v8  ;;  %v509_v62 = vld [vmem:[%s4858_s7] sm:$0xff] }
  0xa8   :  { %v102_v23 = vpop.permute.xlu1 %101  ;;  %394 = vmatprep.subr.mxu0 %v130_v19  ;;  %v100_v24 = vpop.permute.xlu0 %99 }
  0xa9   :  { %v107_v25 = vsel %vm103_vm6, %v102_v23, %v96_v7  ;;  %v104_v26 = vsel %vm103_vm6, %v100_v24, %v102_v23  ;;  %v105_v28 = vsel %vm103_vm6, %v98_v5, %v100_v24  ;;  %vm1396_vm6 = vcmp.lt.s32.totalorder %v2823_v10, 63 }
  0xaa   :  { %v129_v30 = vmul.f32 %v112_v18, %v107_v25  ;;  %v132_v31 = vmul.f32 %v124_v20, %v104_v26  ;;  %v131_v32 = vmul.f32 %v120_v21, %v105_v28 }
  0xac   :  { %v58_v29 = vpop.permute.xlu1 %57  ;;  %395 = vmatpush1.msra.mxu0 %v129_v30  ;;  %465 = vmatprep.subr.mxu1 %v132_v31  ;;  %v56_v37 = vpop.permute.xlu0 %55 }
  0xad   :  { %v68_v38 = vsel %vm65_vm7, %v56_v37, %v58_v29  ;;  %466 = vmatpush1.msra.mxu1 %v131_v32 }
  0xae   :  { %v92_v39 = vmul.f32 %v78_v35, %v68_v38  ;;  %v3066_v35 = vld [vmem:[%s4854_s1 + $0x5] ss:$8 sm:$0xf] }
  0xaf   :  { %4961 = vst [vmem:[#allocation11_spill] sm:$0xff] %v3066_v35 }
  0xb0   :  { %v62_v44 = vpop.permute.xlu1 %61  ;;  %396 = vmatprep.subr.mxu0 %v92_v39  ;;  %v60_v45 = vpop.permute.xlu0 %59 }
  0xb1   :  { %v69_v46 = vsel %vm65_vm7, %v62_v44, %v56_v37  ;;  %v66_v47 = vsel %vm65_vm7, %v60_v45, %v62_v44  ;;  %v67_v48 = vsel %vm65_vm7, %v58_v29, %v60_v45  ;;  %v3070_v29 = vrot.slane %v3066_v35, %v2825_v11 }
  0xb2   :  { %v91_v49 = vmul.f32 %v74_v41, %v69_v46  ;;  %v94_v50 = vmul.f32 %v86_v42, %v66_v47  ;;  %v93_v52 = vmul.f32 %v82_v43, %v67_v48  ;;  %v3086_v42 = vrot.slane %v3066_v35, %v2827_v12 }
  0xb3   :  { %v3091_v44 = vrot.slane %v3066_v35, %v2831_v14 }
  0xb4   :  { %397 = vmatpush1.msra.mxu0 %v91_v49  ;;  %467 = vmatprep.subr.mxu1 %v94_v50 }
  0xb5   :  { %2611 = vmatmul.mubr.msk.f32.vlgmr.msra.gmra.mxu0 %vm362_vm8, %v361_v51  ;;  %468 = vmatpush1.msra.mxu1 %v93_v52 }
  0xb6   :  { %2612 = vmatmul.mubr.msk.f32.vlgmr.msra.gmra.mxu1 %vm362_vm8, %v361_v51 }
 0x175   :  { %v432_v54 = vpop.f32.mrf.mxu0 }
 0x176   :  { %v503_v55 = vpop.f32.mrf.mxu1 }
 0x177   :  { %v434_v56 = vpop.f32.mrf.mxu0 }
 0x178   :  { %v505_v57 = vpop.f32.mrf.mxu1  ;;  %v511_v58 = vadd.f32 %v434_v56, %v432_v54 }
 0x179   :  { %v553_v59 = vadd.f32 %v505_v57, %v503_v55 }
 0x17a   :  { %512 = vadd.xlane.f32.xlu0 %v511_v58 }
 0x17b   :  { %554 = vadd.xlane.f32.xlu1 %v553_v59 }
 0x18c   :  { %530 = vperm.xlu1 %2653, %v508_v60  }
 0x190   :  { %546 = vperm.xlu1 %2653, %v510_v61   ;;  %537 = vperm.xlu0 %2654, %v509_v62  }
 0x194   :  { %881 = vrot.lane.b32.xlu1 %v2760_v1, %s2693_s19  ;;  %831 = vrot.lane.b32.xlu0 %v2772_v3, %s2694_s22 }
 0x198   :  { %885 = vrot.lane.b32.xlu1 %v2772_v3, %s2693_s19  ;;  %839 = vrot.lane.b32.xlu0 %v2767_v2, %s2694_s22 }
 0x19c   :  { %889 = vrot.lane.b32.xlu1 %v2755_v0, %s2693_s19  ;;  %799 = vrot.lane.b32.xlu0 %v2772_v3, %s2686_s20 }
 0x1a0   :  { %893 = vrot.lane.b32.xlu1 %v2767_v2, %s2693_s19 }
 0x1a4   :  { %827 = vrot.lane.b32.xlu1 %v2760_v1, %s2694_s22 }
 0x1a8   :  { %835 = vrot.lane.b32.xlu1 %v2755_v0, %s2694_s22 }
 0x1ac   :  { %795 = vrot.lane.b32.xlu1 %v2760_v1, %s2686_s20 }
 0x1b0   :  { %803 = vrot.lane.b32.xlu1 %v2755_v0, %s2686_s20 }
 0x1b4   :  { %763 = vrot.lane.b32.xlu1 %v2760_v1, %s2687_s21 }
 0x1b8   :  { %771 = vrot.lane.b32.xlu1 %v2755_v0, %s2687_s21 }
 0x1bc   :  { %709 = vrot.lane.b32.xlu1 %v2760_v1, %s2695_s23 }
 0x1c0   :  { %717 = vrot.lane.b32.xlu1 %v2755_v0, %s2695_s23 }
 0x1c4   :  { %655 = vrot.lane.b32.xlu1 %v2760_v1, %s2696_s24 }
 0x1c8   :  { %663 = vrot.lane.b32.xlu1 %v2755_v0, %s2696_s24 }
 0x1cc   :  { %601 = vrot.lane.b32.xlu1 %v2760_v1, %s2697_s25 }
 0x1d0   :  { %609 = vrot.lane.b32.xlu1 %v2755_v0, %s2697_s25 }
 0x1d4   :  { %935 = vrot.lane.b32.xlu1 %v2760_v1, %s2698_s26 }
 0x1d8   :  { %943 = vrot.lane.b32.xlu1 %v2755_v0, %s2698_s26 }
 0x203   :  { %v513_v63 = vpop.xlane.xlu0 %512 }
 0x204   :  { %v515_v5 = vmul.f32 0.00390625, %v513_v63  ;;  %v555_v7 = vpop.xlane.xlu1 %554 }
 0x205   :  { %v556_v8 = vmul.f32 0.00390625, %v555_v7 }
 0x206   :  { %v3014_v18 = vsub.f32 %v432_v54, %v515_v5  ;;  %v3016_v19 = vsub.f32 %v434_v56, %v515_v5 }
 0x207   :  { %v3018_v20 = vsub.f32 %v503_v55, %v556_v8  ;;  %v3020_v21 = vsub.f32 %v505_v57, %v556_v8 }
 0x208   :  { %v518_v22 = vmul.f32 %v3014_v18, %v3014_v18  ;;  %v519_v23 = vmul.f32 %v3016_v19, %v3016_v19  ;;  %v531_v30 = vpop.permute.xlu1 %530 }
 0x209   :  { %v559_v25 = vmul.f32 %v3018_v20, %v3018_v20  ;;  %v560_v26 = vmul.f32 %v3020_v21, %v3020_v21 }
 0x20a   :  { %v520_v24 = vadd.f32 %v519_v23, %v518_v22 }
 0x20b   :  { %v561_v28 = vadd.f32 %v560_v26, %v559_v25  ;;  %v538_v48 = vpop.permute.xlu0 %537 }
 0x20c   :  { %521 = vadd.xlane.f32.xlu0 %v520_v24  ;;  %v3052_v1 = vpop.permute.xlu1 %546 }
 0x20f   :  { %v3096_v49 = vpop.permute.xlu0 %831 }
 0x210   :  { %562 = vadd.xlane.f32.xlu0 %v561_v28  ;;  %v882_v0 = vpop.permute.xlu1 %881 }
 0x213   :  { %v3098_v50 = vpop.permute.xlu0 %839 }
 0x214   :  { %v886_v31 = vpop.permute.xlu1 %885 }
 0x215   :  { %v901_v37 = vsel %vm895_vm9, %v882_v0, %v886_v31 }
 0x216   :  { %v929_v43 = vmul.f32 %v3070_v29, %v901_v37 }
 0x217   :  { %v3100_v51 = vpop.permute.xlu0 %799 }
 0x218   :  { %v890_v32 = vpop.permute.xlu1 %889 }
 0x219   :  { %v899_v38 = vsel %vm895_vm9, %v886_v31, %v890_v32 }
 0x21a   :  { %v930_v46 = vmul.f32 %v3086_v42, %v899_v38 }
 0x21c   :  { %993 = vmatprep.subr.mxu0 %v930_v46 }
 0x21d   :  { %994 = vmatpush1.msra.mxu0 %v929_v43 }
 0x226   :  { %807 = vrot.lane.b32.xlu0 %v2767_v2, %s2686_s20 }
 0x22a   :  { %767 = vrot.lane.b32.xlu0 %v2772_v3, %s2687_s21 }
 0x22e   :  { %775 = vrot.lane.b32.xlu0 %v2767_v2, %s2687_s21 }
 0x232   :  { %713 = vrot.lane.b32.xlu0 %v2772_v3, %s2695_s23 }
 0x236   :  { %721 = vrot.lane.b32.xlu0 %v2767_v2, %s2695_s23 }
 0x23a   :  { %659 = vrot.lane.b32.xlu0 %v2772_v3, %s2696_s24 }
 0x23e   :  { %667 = vrot.lane.b32.xlu0 %v2767_v2, %s2696_s24 }
 0x242   :  { %605 = vrot.lane.b32.xlu0 %v2772_v3, %s2697_s25 }
 0x246   :  { %613 = vrot.lane.b32.xlu0 %v2767_v2, %s2697_s25 }
 0x24a   :  { %939 = vrot.lane.b32.xlu0 %v2772_v3, %s2698_s26  ;;  %v3076_v3 = vrot.slane %v3066_v35, %v2829_v13 }
 0x24e   :  { %947 = vrot.lane.b32.xlu0 %v2767_v2, %s2698_s26  ;;  %v894_v2 = vpop.permute.xlu1 %893 }
 0x24f   :  { %v897_v39 = vsel %vm895_vm9, %v890_v32, %v894_v2  ;;  %v903_v41 = vsel %vm895_vm9, %v894_v2, %v882_v0 }
 0x250   :  { %v931_v45 = vmul.f32 %v3076_v3, %v897_v39  ;;  %v932_v47 = vmul.f32 %v3091_v44, %v903_v41  ;;  %v988_v39 = vld [vmem:[%s4859_s3 + $0x8] sm:$0xff] }
 0x251   :  { %2616 = vmatprep.mubr.msk.f32.mxu1 %vm989_vm14, %v988_v39  ;;  %2615 = vmatprep.mubr.msk.f32.mxu0 %vm989_vm14, %v988_v39 }
 0x252   :  { %1064 = vmatprep.subr.mxu1 %v932_v47 }
 0x253   :  { %1065 = vmatpush1.msra.mxu1 %v931_v45 }
 0x295   :  { %v522_v52 = vpop.xlane.xlu0 %521 }
 0x296   :  { %v523_v53 = vmul.f32 0.00390625, %v522_v52 }
 0x298   :  { %v524_v54 = vadd.f32 1e-05, %v523_v53 }
 0x299   :  { %v563_v55 = vpop.xlane.xlu0 %562 }
 0x29a   :  { %2655 = vrsqrt.f32 %v524_v54  ;;  %v564_v56 = vmul.f32 0.00390625, %v563_v55 }
 0x29c   :  { %v565_v57 = vadd.f32 1e-05, %v564_v56 }
 0x29d   :  { %v3183_v41 = vpop.permute.xlu0 %807 }
 0x29e   :  { %2657 = vrsqrt.f32 %v565_v57 }
 0x2a1   :  { %v3195_v45 = vpop.permute.xlu0 %767 }
 0x2a5   :  { %v3201_v47 = vpop.permute.xlu0 %775 }
 0x2a7   :  { %v2656_v58 = vpop.eup %2655 }
 0x2a8   :  { %v526_v59 = vmul.f32 %v2656_v58, %v3014_v18  ;;  %v527_v60 = vmul.f32 %v2656_v58, %v3016_v19 }
 0x2a9   :  { %v3205_v52 = vpop.permute.xlu0 %713 }
 0x2aa   :  { %v533_v61 = vmul.f32 %v531_v30, %v526_v59  ;;  %v534_v62 = vmul.f32 %v531_v30, %v527_v60 }
 0x2ab   :  { %v2658_v63 = vpop.eup %2657 }
 0x2ac   :  { %v540_v5 = vadd.f32 %v538_v48, %v533_v61  ;;  %v541_v7 = vadd.f32 %v538_v48, %v534_v62  ;;  %v567_v8 = vmul.f32 %v2658_v63, %v3018_v20  ;;  %v568_v22 = vmul.f32 %v2658_v63, %v3020_v21 }
 0x2ad   :  { %v3209_v54 = vpop.permute.xlu0 %721 }
 0x2ae   :  { %vm542_vm10 = vcmp.gt.f32.partialorder %v540_v5, 0.0  ;;  %v549_v23 = vmul.f32 %v3052_v1, %v540_v5  ;;  %v569_v24 = vmul.f32 %v567_v8, %v531_v30  ;;  %v570_v25 = vmul.f32 %v568_v22, %v531_v30 }
 0x2af   :  { %v550_v26 = vmul.f32 %v3052_v1, %v541_v7  ;;  %vm543_vm11 = vcmp.gt.f32.partialorder %v541_v7, 0.0  ;;  %v597_v22 = vmul.f32 %v3066_v35, %v2846_v40 }
 0x2b0   :  { %v3108_v28 = vsel %vm542_vm10, %v540_v5, %v549_v23  ;;  %v571_v18 = vadd.f32 %v569_v24, %v538_v48  ;;  %v572_v19 = vadd.f32 %v570_v25, %v538_v48 }
 0x2b1   :  { %879 = vrot.lane.b32.xlu1 %v3108_v28, %s2693_s19  ;;  %v3113_v0 = vsel %vm543_vm11, %v541_v7, %v550_v26  ;;  %v3213_v56 = vpop.permute.xlu0 %659  ;;  %v854_v26 = vrot.slane %v597_v22, %v2825_v11  ;;  %vm1639_vm11 = vcmask 719872  }
 0x2b2   :  { %vm574_vm12 = vcmp.gt.f32.partialorder %v572_v19, 0.0  ;;  %v576_v20 = vmul.f32 %v572_v19, %v3052_v1  ;;  %4962 = vst [vmem:[#allocation12_spill] sm:$0xff] %v3113_v0  ;;  %v575_v21 = vmul.f32 %v571_v18, %v3052_v1  ;;  %vm573_vm13 = vcmp.gt.f32.partialorder %v571_v18, 0.0  ;;  %v3148_v1 = vpop.permute.xlu1 %827 }
 0x2b4   :  { %v3116_v31 = vsel %vm574_vm12, %v572_v19, %v576_v20  ;;  %v3122_v30 = vsel %vm573_vm13, %v571_v18, %v575_v21  ;;  %v866_v19 = vrot.slane %v597_v22, %v2831_v14  ;;  %v862_v20 = vrot.slane %v597_v22, %v2829_v13 }
 0x2b5   :  { %4963 = vst [vmem:[#allocation13_spill] sm:$0xff] %v3116_v31  ;;  %883 = vrot.lane.b32.xlu1 %v3113_v0, %s2693_s19  ;;  %891 = vrot.lane.b32.xlu0 %v3116_v31, %s2693_s19  ;;  %4964 = vst [vmem:[#allocation14_spill] sm:$0xff] %v3122_v30  ;;  %v3217_v58 = vpop.permute.xlu0 %667  ;;  %v849_v21 = vsel %vm841_vm15, %v3098_v50, %v3148_v1  ;;  %vm1326_vm12 = vcmp.lt.s32.totalorder %v2823_v10, 64  ;;  %vm1256_vm13 = vcmp.lt.s32.totalorder %v2823_v10, 65 }
 0x2b6   :  { %v836_v32 = vpop.permute.xlu1 %835 }
 0x2b9   :  { %887 = vrot.lane.b32.xlu1 %v3122_v30, %s2693_s19  ;;  %829 = vrot.lane.b32.xlu0 %v3113_v0, %s2694_s22  ;;  %v3221_v60 = vpop.permute.xlu0 %605 }
 0x2ba   :  { %v3162_v37 = vpop.permute.xlu1 %795 }
 0x2bd   :  { %825 = vrot.lane.b32.xlu1 %v3108_v28, %s2694_s22  ;;  %837 = vrot.lane.b32.xlu0 %v3116_v31, %s2694_s22  ;;  %v3225_v62 = vpop.permute.xlu0 %613 }
 0x2be   :  { %v3172_v2 = vpop.permute.xlu1 %803  ;;  %4967 = vst [vmem:[#allocation17_spill] sm:$0xff] %v3225_v62 }
 0x2c1   :  { %833 = vrot.lane.b32.xlu1 %v3122_v30, %s2694_s22  ;;  %797 = vrot.lane.b32.xlu0 %v3113_v0, %s2686_s20  ;;  %v3229_v5 = vpop.permute.xlu0 %939 }
 0x2c2   :  { %v3178_v38 = vpop.permute.xlu1 %763  ;;  %4969 = vst [vmem:[#allocation19_spill] sm:$0xff] %v3229_v5 }
 0x2c5   :  { %793 = vrot.lane.b32.xlu1 %v3108_v28, %s2686_s20  ;;  %805 = vrot.lane.b32.xlu0 %v3116_v31, %s2686_s20  ;;  %v3231_v8 = vpop.permute.xlu0 %947 }
 0x2c6   :  { %v3191_v43 = vpop.permute.xlu1 %771  ;;  %4970 = vst [vmem:[#allocation20_spill] sm:$0xff] %v3231_v8  ;;  %v858_v8 = vrot.slane %v597_v22, %v2827_v12 }
 0x2c9   :  { %801 = vrot.lane.b32.xlu1 %v3122_v30, %s2686_s20  ;;  %765 = vrot.lane.b32.xlu0 %v3113_v0, %s2687_s21 }
 0x2ca   :  { %v3199_v46 = vpop.permute.xlu1 %709 }
 0x2cd   :  { %761 = vrot.lane.b32.xlu1 %v3108_v28, %s2687_s21  ;;  %773 = vrot.lane.b32.xlu0 %v3116_v31, %s2687_s21 }
 0x2ce   :  { %v3203_v48 = vpop.permute.xlu1 %717 }
 0x2d1   :  { %769 = vrot.lane.b32.xlu1 %v3122_v30, %s2687_s21  ;;  %711 = vrot.lane.b32.xlu0 %v3113_v0, %s2695_s23 }
 0x2d2   :  { %v3207_v53 = vpop.permute.xlu1 %655 }
 0x2d5   :  { %707 = vrot.lane.b32.xlu1 %v3108_v28, %s2695_s23  ;;  %719 = vrot.lane.b32.xlu0 %v3116_v31, %s2695_s23 }
 0x2d6   :  { %v3211_v55 = vpop.permute.xlu1 %663 }
 0x2d9   :  { %715 = vrot.lane.b32.xlu1 %v3122_v30, %s2695_s23  ;;  %657 = vrot.lane.b32.xlu0 %v3113_v0, %s2696_s24 }
 0x2da   :  { %v3215_v57 = vpop.permute.xlu1 %601 }
 0x2dd   :  { %653 = vrot.lane.b32.xlu1 %v3108_v28, %s2696_s24  ;;  %665 = vrot.lane.b32.xlu0 %v3116_v31, %s2696_s24 }
 0x2de   :  { %v3219_v59 = vpop.permute.xlu1 %609 }
 0x2df   :  { %4965 = vst [vmem:[#allocation15_spill] sm:$0xff] %v3219_v59 }
 0x2e1   :  { %661 = vrot.lane.b32.xlu1 %v3122_v30, %s2696_s24  ;;  %603 = vrot.lane.b32.xlu0 %v3113_v0, %s2697_s25 }
 0x2e2   :  { %v3223_v61 = vpop.permute.xlu1 %935 }
 0x2e3   :  { %4966 = vst [vmem:[#allocation16_spill] sm:$0xff] %v3223_v61  ;;  %v845_v61 = vsel %vm841_vm15, %v3096_v49, %v836_v32 }
 0x2e4   :  { %v876_v62 = vmul.f32 %v858_v8, %v845_v61 }
 0x2e5   :  { %599 = vrot.lane.b32.xlu1 %v3108_v28, %s2697_s25  ;;  %611 = vrot.lane.b32.xlu0 %v3116_v31, %s2697_s25 }
 0x2e6   :  { %v3227_v63 = vpop.permute.xlu1 %943 }
 0x2e7   :  { %4968 = vst [vmem:[#allocation18_spill] sm:$0xff] %v3227_v63 }
 0x2e9   :  { %607 = vrot.lane.b32.xlu1 %v3122_v30, %s2697_s25  ;;  %937 = vrot.lane.b32.xlu0 %v3113_v0, %s2698_s26 }
 0x2ed   :  { %933 = vrot.lane.b32.xlu1 %v3108_v28, %s2698_s26  ;;  %945 = vrot.lane.b32.xlu0 %v3116_v31, %s2698_s26 }
 0x2f1   :  { %941 = vrot.lane.b32.xlu1 %v3122_v30, %s2698_s26 }
 0x323   :  { %v880_v7 = vpop.permute.xlu1 %879 }
 0x327   :  { %v884_v23 = vpop.permute.xlu1 %883  ;;  %v892_v24 = vpop.permute.xlu0 %891 }
 0x328   :  { %v902_v25 = vsel %vm895_vm9, %v892_v24, %v880_v7  ;;  %v900_v39 = vsel %vm895_vm9, %v880_v7, %v884_v23  ;;  %v847_v7 = vsel %vm841_vm15, %v3148_v1, %v3096_v49  ;;  %v810_v1 = vsel %vm217_vm3, %v3172_v2, %v3183_v41 }
 0x329   :  { %v928_v18 = vmul.f32 %v3091_v44, %v902_v25  ;;  %v843_v44 = vsel %vm841_vm15, %v836_v32, %v3098_v50  ;;  %v925_v35 = vmul.f32 %v3070_v29, %v900_v39  ;;  %v878_v50 = vmul.f32 %v866_v19, %v849_v21 }
 0x32a   :  { %v877_v32 = vmul.f32 %v862_v20, %v843_v44  ;;  %v816_v29 = vsel %vm217_vm3, %v3183_v41, %v3162_v37 }
 0x32b   :  { %v888_v4 = vpop.permute.xlu1 %887  ;;  %1066 = vmatprep.subr.mxu1 %v928_v18  ;;  %v830_v63 = vpop.permute.xlu0 %829  ;;  %v824_v44 = vmul.f32 %v816_v29, %v2861_v15 }
 0x32c   :  { %v896_v25 = vsel %vm895_vm9, %v888_v4, %v892_v24  ;;  %v898_v5 = vsel %vm895_vm9, %v884_v23, %v888_v4  ;;  %v875_v4 = vmul.f32 %v854_v26, %v847_v7  ;;  %v3297_v7 = vld [vmem:[%s4854_s1 + $0x4] ss:$8 sm:$0xf] }
 0x32d   :  { %v927_v22 = vmul.f32 %v3076_v3, %v896_v25  ;;  %v926_v59 = vmul.f32 %v3086_v42, %v898_v5  ;;  %v814_v5 = vsel %vm217_vm3, %v3162_v37, %v3100_v51 }
 0x32f   :  { %995 = vmatprep.subr.mxu0 %v926_v59  ;;  %v826_v24 = vpop.permute.xlu1 %825  ;;  %1067 = vmatpush1.msra.mxu1 %v927_v22  ;;  %v838_v23 = vpop.permute.xlu0 %837 }
 0x330   :  { %996 = vmatpush1.msra.mxu0 %v925_v35  ;;  %1068 = vmatprep.subr.mxu1 %v878_v50  ;;  %v848_v18 = vsel %vm841_vm15, %v838_v23, %v826_v24  ;;  %v846_v42 = vsel %vm841_vm15, %v826_v24, %v830_v63  ;;  %v812_v35 = vsel %vm217_vm3, %v3100_v51, %v3172_v2 }
 0x331   :  { %997 = vmatprep.subr.mxu0 %v876_v62  ;;  %1069 = vmatpush1.msra.mxu1 %v877_v32  ;;  %v874_v3 = vmul.f32 %v866_v19, %v848_v18  ;;  %v871_v39 = vmul.f32 %v854_v26, %v846_v42  ;;  %v823_v2 = vmul.f32 %v810_v1, %v2865_v16 }
 0x332   :  { %998 = vmatpush1.msra.mxu0 %v875_v4  ;;  %v822_v25 = vmul.f32 %v812_v35, %v2857_v9  ;;  %v596_v26 = vmul.f32 %v3297_v7, %v2817_v6  ;;  %v782_v6 = vsel %vm179_vm4, %v3178_v38, %v3195_v45  ;;  %v784_v18 = vsel %vm179_vm4, %v3201_v47, %v3178_v38 }
 0x333   :  { %v834_v49 = vpop.permute.xlu1 %833  ;;  %1070 = vmatprep.subr.mxu1 %v874_v3  ;;  %v798_v62 = vpop.permute.xlu0 %797  ;;  %v780_v3 = vsel %vm179_vm4, %v3195_v45, %v3191_v43  ;;  %v778_v42 = vsel %vm179_vm4, %v3191_v43, %v3201_v47  ;;  %v3339_v45 = vld [vmem:[%s4853_s0 + $0x18] sm:$0xff] }
 0x334   :  { %v842_v59 = vsel %vm841_vm15, %v834_v49, %v838_v23  ;;  %v844_v61 = vsel %vm841_vm15, %v830_v63, %v834_v49  ;;  %v821_v63 = vmul.f32 %v814_v5, %v2869_v17  ;;  %v3331_v49 = vrot.slane %v596_v26, %v2825_v11  ;;  %v3357_v5 = vld [vmem:[%s4853_s0 + $0x10] sm:$0xff] }
 0x335   :  { %v873_v19 = vmul.f32 %v862_v20, %v842_v59  ;;  %v872_v21 = vmul.f32 %v858_v8, %v844_v61  ;;  %v3334_v38 = vrot.slane %v596_v26, %v2829_v13  ;;  %v740_v43 = vrot.slane %v596_v26, %v2827_v12 }
 0x336   :  { %v3344_v47 = vrot.slane %v596_v26, %v2831_v14  ;;  %v789_v59 = vmul.f32 %v784_v18, %v2897_v33  ;;  %v791_v61 = vmul.f32 %v780_v3, %v2908_v36  ;;  %v675_v18 = vsel %vm669_vm1, %v3207_v53, %v3213_v56 }
 0x337   :  { %v794_v41 = vpop.permute.xlu1 %793  ;;  %999 = vmatprep.subr.mxu0 %v872_v21  ;;  %1071 = vmatpush1.msra.mxu1 %v873_v19  ;;  %v806_v51 = vpop.permute.xlu0 %805  ;;  %v790_v19 = vmul.f32 %v782_v6, %v2885_v27  ;;  %v729_v21 = vsel %vm723_vm0, %v3199_v46, %v3205_v52 }
 0x338   :  { %1000 = vmatpush1.msra.mxu0 %v871_v39  ;;  %1072 = vmatprep.subr.mxu1 %v824_v44  ;;  %v815_v37 = vsel %vm217_vm3, %v806_v51, %v794_v41  ;;  %v813_v20 = vsel %vm217_vm3, %v794_v41, %v798_v62  ;;  %v3370_v44 = vld [vmem:[%s4853_s0] sm:$0xff]  ;;  %v731_v41 = vsel %vm723_vm0, %v3209_v54, %v3199_v46 }
 0x339   :  { %1001 = vmatprep.subr.mxu0 %v822_v25  ;;  %1073 = vmatpush1.msra.mxu1 %v823_v2  ;;  %v820_v8 = vmul.f32 %v815_v37, %v2861_v15  ;;  %v817_v29 = vmul.f32 %v813_v20, %v2869_v17  ;;  %v792_v2 = vmul.f32 %v778_v42, %v2901_v34 }
 0x33a   :  { %1002 = vmatpush1.msra.mxu0 %v821_v63  ;;  %v727_v25 = vsel %vm723_vm0, %v3205_v52, %v3203_v48  ;;  %v725_v37 = vsel %vm723_vm0, %v3203_v48, %v3209_v54  ;;  %v682_v54 = vrot.slane %v3297_v7, %v2825_v11  ;;  %v757_v6 = vmul.f32 %v3331_v49, %v731_v41 }
 0x33b   :  { %v802_v22 = vpop.permute.xlu1 %801  ;;  %1074 = vmatprep.subr.mxu1 %v820_v8  ;;  %v766_v24 = vpop.permute.xlu0 %765  ;;  %v677_v42 = vsel %vm669_vm1, %v3217_v58, %v3207_v53  ;;  %v694_v53 = vrot.slane %v3297_v7, %v2831_v14 }
 0x33c   :  { %v809_v50 = vsel %vm217_vm3, %v802_v22, %v806_v51  ;;  %v811_v32 = vsel %vm217_vm3, %v798_v62, %v802_v22  ;;  %v3351_v62 = vld [vmem:[%s4853_s0 + $0x8] sm:$0xff] }
 0x33d   :  { %v819_v4 = vmul.f32 %v809_v50, %v2865_v16  ;;  %v818_v23 = vmul.f32 %v811_v32, %v2857_v9  ;;  %v686_v50 = vrot.slane %v3297_v7, %v2827_v12  ;;  %v759_v32 = vmul.f32 %v3334_v38, %v727_v25 }
 0x33f   :  { %v762_v35 = vpop.permute.xlu1 %761  ;;  %1003 = vmatprep.subr.mxu0 %v818_v23  ;;  %1075 = vmatpush1.msra.mxu1 %v819_v4  ;;  %v774_v1 = vpop.permute.xlu0 %773  ;;  %v758_v4 = vmul.f32 %v740_v43, %v729_v21  ;;  %v760_v23 = vmul.f32 %v3344_v47, %v725_v37 }
 0x340   :  { %1004 = vmatpush1.msra.mxu0 %v817_v29  ;;  %1076 = vmatprep.subr.mxu1 %v3339_v45  ;;  %v781_v39 = vsel %vm179_vm4, %v762_v35, %v766_v24  ;;  %v783_v63 = vsel %vm179_vm4, %v774_v1, %v762_v35 }
 0x341   :  { %1005 = vmatprep.subr.mxu0 %v3351_v62  ;;  %1077 = vmatpush1.msra.mxu1 %v3357_v5  ;;  %v786_v20 = vmul.f32 %v781_v39, %v2885_v27  ;;  %v785_v22 = vmul.f32 %v783_v63, %v2897_v33  ;;  %v704_v39 = vmul.f32 %v686_v50, %v675_v18 }
 0x342   :  { %1006 = vmatpush1.msra.mxu0 %v3370_v44  ;;  %1078 = vmatprep.subr.mxu1 %v3116_v31 }
 0x343   :  { %v770_v51 = vpop.permute.xlu1 %769  ;;  %1007 = vmatprep.subr.mxu0 %v3113_v0  ;;  %1079 = vmatpush1.msra.mxu1 %v3122_v30  ;;  %v712_v52 = vpop.permute.xlu0 %711 }
 0x344   :  { %v777_v46 = vsel %vm179_vm4, %v770_v51, %v774_v1  ;;  %v779_v8 = vsel %vm179_vm4, %v766_v24, %v770_v51  ;;  %1008 = vmatpush1.msra.mxu0 %v3108_v28  ;;  %1080 = vmatprep.subr.mxu1 %v792_v2  ;;  %v703_v2 = vmul.f32 %v682_v54, %v677_v42 }
 0x345   :  { %v787_v26 = vmul.f32 %v779_v8, %v2908_v36  ;;  %1009 = vmatprep.subr.mxu0 %v790_v19  ;;  %1081 = vmatpush1.msra.mxu1 %v791_v61  ;;  %v788_v48 = vmul.f32 %v777_v46, %v2901_v34  ;;  %v690_v61 = vrot.slane %v3297_v7, %v2829_v13 }
 0x346   :  { %1010 = vmatpush1.msra.mxu0 %v789_v59  ;;  %v595_v19 = vmul.f32 %v3297_v7, %v2846_v40  ;;  %v673_v40 = vsel %vm669_vm1, %v3213_v56, %v3211_v55  ;;  %v621_v8 = vsel %vm615_vm2, %v3215_v57, %v3221_v60 }
 0x347   :  { %v708_v24 = vpop.permute.xlu1 %707  ;;  %1011 = vmatprep.subr.mxu0 %v786_v20  ;;  %1082 = vmatprep.subr.mxu1 %v788_v48  ;;  %v720_v29 = vpop.permute.xlu0 %719  ;;  %v705_v46 = vmul.f32 %v690_v61, %v673_v40 }
 0x348   :  { %v728_v3 = vsel %vm723_vm0, %v708_v24, %v712_v52  ;;  %1012 = vmatpush1.msra.mxu0 %v785_v22  ;;  %1083 = vmatpush1.msra.mxu1 %v787_v26  ;;  %v730_v35 = vsel %vm723_vm0, %v720_v29, %v708_v24  ;;  %v632_v37 = vrot.slane %v595_v19, %v2827_v12  ;;  %v4972_v24 = vld [vmem:[#allocation11_spill] sm:$0xff] }
 0x349   :  { %1013 = vmatprep.subr.mxu0 %v758_v4  ;;  %1084 = vmatprep.subr.mxu1 %v760_v23  ;;  %v754_v1 = vmul.f32 %v740_v43, %v728_v3  ;;  %v753_v59 = vmul.f32 %v3331_v49, %v730_v35  ;;  %v671_v49 = vsel %vm669_vm1, %v3211_v55, %v3217_v58 }
 0x34a   :  { %1014 = vmatpush1.msra.mxu0 %v757_v6  ;;  %1085 = vmatpush1.msra.mxu1 %v759_v32  ;;  %v706_v51 = vmul.f32 %v694_v53, %v671_v49  ;;  %v628_v55 = vrot.slane %v595_v19, %v2825_v11  ;;  %v636_v22 = vrot.slane %v595_v19, %v2829_v13  ;;  %v3460_v32 = vld [vmem:[%s4854_s1 + $0x1] ss:$8 sm:$0xf] }
 0x34b   :  { %v716_v21 = vpop.permute.xlu1 %715  ;;  %1015 = vmatprep.subr.mxu0 %v754_v1  ;;  %v658_v25 = vpop.permute.xlu0 %657  ;;  %v598_v4 = vmul.f32 %v3460_v32, %v4972_v24  ;;  %v640_v6 = vrot.slane %v595_v19, %v2831_v14 }
 0x34c   :  { %v724_v43 = vsel %vm723_vm0, %v716_v21, %v720_v29  ;;  %v726_v41 = vsel %vm723_vm0, %v712_v52, %v716_v21  ;;  %1016 = vmatpush1.msra.mxu0 %v753_v59 }
 0x34d   :  { %v755_v7 = vmul.f32 %v3334_v38, %v726_v41  ;;  %1017 = vmatprep.subr.mxu0 %v704_v39  ;;  %v756_v58 = vmul.f32 %v3344_v47, %v724_v43  ;;  %v4971_v47 = vld [vmem:[#allocation17_spill] sm:$0xff]  ;;  %v966_v39 = vrot.slane %v598_v4, %v2827_v12  ;;  %v962_v49 = vrot.slane %v598_v4, %v2825_v11  ;;  %v4974_v43 = vld [vmem:[#allocation18_spill] sm:$0xff]  ;;  %v4975_v41 = vld [vmem:[#allocation19_spill] sm:$0xff] }
 0x34e   :  { %1018 = vmatpush1.msra.mxu0 %v703_v2  ;;  %v623_v52 = vsel %vm615_vm2, %v4971_v47, %v3215_v57  ;;  %v650_v57 = vmul.f32 %v632_v37, %v621_v8 }
 0x34f   :  { %v654_v63 = vpop.permute.xlu1 %653  ;;  %1086 = vmatprep.subr.mxu1 %v756_v58  ;;  %v666_v38 = vpop.permute.xlu0 %665  ;;  %v649_v18 = vmul.f32 %v628_v55, %v623_v52 }
 0x350   :  { %v674_v56 = vsel %vm669_vm1, %v654_v63, %v658_v25  ;;  %1087 = vmatpush1.msra.mxu1 %v755_v7  ;;  %v676_v26 = vsel %vm669_vm1, %v666_v38, %v654_v63 }
 0x351   :  { %1088 = vmatprep.subr.mxu1 %v706_v51  ;;  %v700_v20 = vmul.f32 %v686_v50, %v674_v56  ;;  %v699_v48 = vmul.f32 %v682_v54, %v676_v26  ;;  %v4973_v50 = vld [vmem:[#allocation15_spill] sm:$0xff]  ;;  %v970_v51 = vrot.slane %v598_v4, %v2829_v13  ;;  %v974_v56 = vrot.slane %v598_v4, %v2831_v14 }
 0x352   :  { %1089 = vmatpush1.msra.mxu1 %v705_v46  ;;  %v617_v54 = vsel %vm615_vm2, %v4973_v50, %v4971_v47  ;;  %v619_v35 = vsel %vm615_vm2, %v3221_v60, %v4973_v50  ;;  %v4977_v47 = vld [vmem:[#allocation20_spill] sm:$0xff] }
 0x353   :  { %v662_v23 = vpop.permute.xlu1 %661  ;;  %1019 = vmatprep.subr.mxu0 %v700_v20  ;;  %v604_v42 = vpop.permute.xlu0 %603  ;;  %v652_v21 = vmul.f32 %v640_v6, %v617_v54  ;;  %v651_v2 = vmul.f32 %v636_v22, %v619_v35  ;;  %v951_v20 = vsel %vm949_vm5, %v4974_v43, %v4977_v47 }
 0x354   :  { %v670_v3 = vsel %vm669_vm1, %v662_v23, %v666_v38  ;;  %v672_v29 = vsel %vm669_vm1, %v658_v25, %v662_v23  ;;  %1020 = vmatpush1.msra.mxu0 %v699_v48  ;;  %v953_v25 = vsel %vm949_vm5, %v4975_v41, %v4974_v43 }
 0x355   :  { %v701_v1 = vmul.f32 %v690_v61, %v672_v29  ;;  %1021 = vmatprep.subr.mxu0 %v650_v57  ;;  %v702_v59 = vmul.f32 %v694_v53, %v670_v3  ;;  %v4976_v53 = vld [vmem:[#allocation16_spill] sm:$0xff]  ;;  %v984_v8 = vmul.f32 %v966_v39, %v953_v25  ;;  %v985_v57 = vmul.f32 %v970_v51, %v951_v20 }
 0x356   :  { %1022 = vmatpush1.msra.mxu0 %v649_v18  ;;  %v955_v40 = vsel %vm949_vm5, %v4976_v53, %v4975_v41  ;;  %v957_v52 = vsel %vm949_vm5, %v4977_v47, %v4976_v53 }
 0x357   :  { %v600_v19 = vpop.permute.xlu1 %599  ;;  %1090 = vmatprep.subr.mxu1 %v702_v59  ;;  %v612_v61 = vpop.permute.xlu0 %611  ;;  %v983_v38 = vmul.f32 %v962_v49, %v955_v40  ;;  %v986_v23 = vmul.f32 %v974_v56, %v957_v52 }
 0x358   :  { %v620_v60 = vsel %vm615_vm2, %v600_v19, %v604_v42  ;;  %1091 = vmatpush1.msra.mxu1 %v701_v1  ;;  %v622_v7 = vsel %vm615_vm2, %v612_v61, %v600_v19  ;;  %v987_v1 = vld [vmem:[%s4859_s3] sm:$0xff] }
 0x359   :  { %1092 = vmatprep.subr.mxu1 %v652_v21  ;;  %v646_v58 = vmul.f32 %v632_v37, %v620_v60  ;;  %v645_v63 = vmul.f32 %v628_v55, %v622_v7  ;;  %v2617_v60 = vld [vmem:[%s4856_s6 + $0x8] sm:$0xff] }
 0x35a   :  { %1093 = vmatpush1.msra.mxu1 %v651_v2 }
 0x35b   :  { %v608_v46 = vpop.permute.xlu1 %607  ;;  %1023 = vmatprep.subr.mxu0 %v646_v58  ;;  %v938_v55 = vpop.permute.xlu0 %937 }
 0x35c   :  { %v616_v26 = vsel %vm615_vm2, %v608_v46, %v612_v61  ;;  %v618_v37 = vsel %vm615_vm2, %v604_v42, %v608_v46  ;;  %1024 = vmatpush1.msra.mxu0 %v645_v63  ;;  %vm2239_vm2 = vcmask 261120  }
 0x35d   :  { %v647_v48 = vmul.f32 %v636_v22, %v618_v37  ;;  %1053 = vmatprep.subr.mxu0 %v984_v8  ;;  %v648_v24 = vmul.f32 %v640_v6, %v616_v26 }
 0x35e   :  { %1054 = vmatpush2.msra.mxu0 %v983_v38 }
 0x35f   :  { %v934_v4 = vpop.permute.xlu1 %933  ;;  %1094 = vmatprep.subr.mxu1 %v648_v24  ;;  %v946_v18 = vpop.permute.xlu0 %945 }
 0x360   :  { %1095 = vmatpush1.msra.mxu1 %v647_v48  ;;  %v956_v50 = vsel %vm949_vm5, %v946_v18, %v934_v4  ;;  %v954_v3 = vsel %vm949_vm5, %v934_v4, %v938_v55 }
 0x361   :  { %1124 = vmatprep.subr.mxu1 %v986_v23  ;;  %v982_v54 = vmul.f32 %v974_v56, %v956_v50  ;;  %v979_v59 = vmul.f32 %v962_v49, %v954_v3  ;;  %v2619_v49 = vld [vmem:[%s4857_s8 + $0x8] sm:$0xff] }
 0x362   :  { %1125 = vmatpush2.msra.mxu1 %v985_v57 }
 0x363   :  { %v942_v29 = vpop.permute.xlu1 %941  ;;  %1126 = vmatprep.subr.mxu1 %v982_v54 }
 0x364   :  { %v950_v22 = vsel %vm949_vm5, %v942_v29, %v946_v18  ;;  %v952_v6 = vsel %vm949_vm5, %v938_v55, %v942_v29 }
 0x365   :  { %v981_v42 = vmul.f32 %v970_v51, %v950_v22  ;;  %v980_v35 = vmul.f32 %v966_v39, %v952_v6  ;;  %v2618_v39 = vld [vmem:[%s4858_s7 + $0x8] sm:$0xff] }
 0x367   :  { %1055 = vmatprep.subr.mxu0 %v980_v35  ;;  %1127 = vmatpush2.msra.mxu1 %v981_v42 }
 0x368   :  { %1056 = vmatpush2.msra.mxu0 %v979_v59  ;;  %1129 = vmatmul.mubr.f32.vlgmr.msra.gmra.mxu1 %v987_v1 }
 0x369   :  { %1058 = vmatmul.mubr.f32.vlgmr.msra.gmra.mxu0 %v987_v1 }
 0x428   :  { %v1130_v19 = vpop.f32.mrf.mxu1 }
 0x429   :  { %v1059_v21 = vpop.f32.mrf.mxu0 }
 0x42a   :  { %v1132_v2 = vpop.f32.mrf.mxu1 }
 0x42b   :  { %v1182_v43 = vadd.f32 %v1132_v2, %v1130_v19  ;;  %v1061_v41 = vpop.f32.mrf.mxu0 }
 0x42c   :  { %v1141_v25 = vadd.f32 %v1061_v41, %v1059_v21 }
 0x42d   :  { %1183 = vadd.xlane.f32.xlu0 %v1182_v43 }
 0x42e   :  { %1142 = vadd.xlane.f32.xlu1 %v1141_v25 }
 0x43f   :  { %1166 = vperm.xlu1 %2653, %v2618_v39  }
 0x443   :  { %1175 = vperm.xlu1 %2653, %v2619_v49   ;;  %1159 = vperm.xlu0 %2654, %v2617_v60  }
 0x447   :  { %1452 = vrot.lane.b32.xlu1 %v3351_v62, %s2687_s21  ;;  %1446 = vrot.lane.b32.xlu0 %v3370_v44, %s2687_s21 }
 0x44b   :  { %1464 = vrot.lane.b32.xlu1 %v3339_v45, %s2687_s21 }
 0x4b6   :  { %v1184_v61 = vpop.xlane.xlu0 %1183 }
 0x4b7   :  { %v1185_v53 = vmul.f32 0.00390625, %v1184_v61  ;;  %v1143_v40 = vpop.xlane.xlu1 %1142 }
 0x4b8   :  { %v1144_v7 = vmul.f32 0.00390625, %v1143_v40 }
 0x4b9   :  { %v3532_v58 = vsub.f32 %v1130_v19, %v1185_v53  ;;  %v3534_v63 = vsub.f32 %v1132_v2, %v1185_v53 }
 0x4ba   :  { %v3536_v51 = vsub.f32 %v1059_v21, %v1144_v7  ;;  %v3538_v46 = vsub.f32 %v1061_v41, %v1144_v7 }
 0x4bb   :  { %v1188_v8 = vmul.f32 %v3532_v58, %v3532_v58  ;;  %v1189_v56 = vmul.f32 %v3534_v63, %v3534_v63  ;;  %v1167_v37 = vpop.permute.xlu1 %1166 }
 0x4bc   :  { %v1147_v38 = vmul.f32 %v3536_v51, %v3536_v51  ;;  %v1148_v47 = vmul.f32 %v3538_v46, %v3538_v46 }
 0x4bd   :  { %v1190_v52 = vadd.f32 %v1189_v56, %v1188_v8 }
 0x4be   :  { %v1149_v26 = vadd.f32 %v1148_v47, %v1147_v38  ;;  %v1160_v48 = vpop.permute.xlu0 %1159 }
 0x4bf   :  { %1191 = vadd.xlane.f32.xlu1 %v1190_v52  ;;  %v1176_v55 = vpop.permute.xlu1 %1175 }
 0x4c0   :  { %1150 = vadd.xlane.f32.xlu0 %v1149_v26 }
 0x4c2   :  { %v3610_v4 = vpop.permute.xlu0 %1446 }
 0x4c3   :  { %v3606_v20 = vpop.permute.xlu1 %1452 }
 0x4c7   :  { %v3608_v24 = vpop.permute.xlu1 %1464 }
 0x4d0   :  { %1450 = vrot.lane.b32.xlu1 %v3113_v0, %s2687_s21 }
 0x4d4   :  { %1462 = vrot.lane.b32.xlu1 %v3116_v31, %s2687_s21 }
 0x4d6   :  { %1458 = vrot.lane.b32.xlu0 %v3357_v5, %s2687_s21 }
 0x4d8   :  { %1382 = vrot.lane.b32.xlu1 %v3351_v62, %s2699_s30 }
 0x4da   :  { %1444 = vrot.lane.b32.xlu0 %v3108_v28, %s2687_s21 }
 0x4dc   :  { %1394 = vrot.lane.b32.xlu1 %v3339_v45, %s2699_s30 }
 0x4de   :  { %1456 = vrot.lane.b32.xlu0 %v3122_v30, %s2687_s21 }
 0x4e0   :  { %1380 = vrot.lane.b32.xlu1 %v3113_v0, %s2699_s30 }
 0x4e2   :  { %1376 = vrot.lane.b32.xlu0 %v3370_v44, %s2699_s30 }
 0x4e4   :  { %1392 = vrot.lane.b32.xlu1 %v3116_v31, %s2699_s30 }
 0x4e6   :  { %1388 = vrot.lane.b32.xlu0 %v3357_v5, %s2699_s30 }
 0x4e8   :  { %1312 = vrot.lane.b32.xlu1 %v3351_v62, %s2700_s10 }
 0x4ea   :  { %1374 = vrot.lane.b32.xlu0 %v3108_v28, %s2699_s30 }
 0x4ec   :  { %1324 = vrot.lane.b32.xlu1 %v3339_v45, %s2700_s10 }
 0x4ee   :  { %1386 = vrot.lane.b32.xlu0 %v3122_v30, %s2699_s30 }
 0x4f0   :  { %1310 = vrot.lane.b32.xlu1 %v3113_v0, %s2700_s10 }
 0x4f2   :  { %1306 = vrot.lane.b32.xlu0 %v3370_v44, %s2700_s10 }
 0x4f4   :  { %1322 = vrot.lane.b32.xlu1 %v3116_v31, %s2700_s10 }
 0x4f6   :  { %1318 = vrot.lane.b32.xlu0 %v3357_v5, %s2700_s10 }
 0x4f8   :  { %1242 = vrot.lane.b32.xlu1 %v3351_v62, %s2701_s11 }
 0x4fa   :  { %1304 = vrot.lane.b32.xlu0 %v3108_v28, %s2700_s10 }
 0x4fc   :  { %1254 = vrot.lane.b32.xlu1 %v3339_v45, %s2701_s11 }
 0x4fe   :  { %1316 = vrot.lane.b32.xlu0 %v3122_v30, %s2700_s10 }
 0x500   :  { %1240 = vrot.lane.b32.xlu1 %v3113_v0, %s2701_s11 }
 0x502   :  { %1236 = vrot.lane.b32.xlu0 %v3370_v44, %s2701_s11 }
 0x504   :  { %1252 = vrot.lane.b32.xlu1 %v3116_v31, %s2701_s11 }
 0x506   :  { %1248 = vrot.lane.b32.xlu0 %v3357_v5, %s2701_s11 }
 0x50a   :  { %1234 = vrot.lane.b32.xlu0 %v3108_v28, %s2701_s11 }
 0x50e   :  { %1246 = vrot.lane.b32.xlu0 %v3122_v30, %s2701_s11 }
 0x548   :  { %v1192_v23 = vpop.xlane.xlu1 %1191 }
 0x549   :  { %v1193_v57 = vmul.f32 0.00390625, %v1192_v23  ;;  %v1151_v18 = vpop.xlane.xlu0 %1150 }
 0x54a   :  { %v1152_v50 = vmul.f32 0.00390625, %v1151_v18 }
 0x54b   :  { %v1194_v54 = vadd.f32 1e-05, %v1193_v57 }
 0x54c   :  { %v1153_v3 = vadd.f32 1e-05, %v1152_v50  ;;  %v3614_v22 = vpop.permute.xlu1 %1450 }
 0x54d   :  { %2659 = vrsqrt.f32 %v1194_v54  ;;  %v3612_v29 = vpop.permute.xlu0 %1458 }
 0x54e   :  { %2661 = vrsqrt.f32 %v1153_v3 }
 0x550   :  { %v3620_v35 = vpop.permute.xlu1 %1462 }
 0x551   :  { %v3616_v6 = vpop.permute.xlu0 %1444 }
 0x554   :  { %v3628_v49 = vpop.permute.xlu1 %1382 }
 0x555   :  { %v3618_v42 = vpop.permute.xlu0 %1456 }
 0x559   :  { %v3622_v1 = vpop.permute.xlu0 %1376 }
 0x55a   :  { %v2660_v59 = vpop.eup %2659 }
 0x55b   :  { %v2662_v19 = vpop.eup %2661  ;;  %v1196_v21 = vmul.f32 %v2660_v59, %v3532_v58  ;;  %v1197_v2 = vmul.f32 %v2660_v59, %v3534_v63 }
 0x55c   :  { %v1155_v43 = vmul.f32 %v2662_v19, %v3536_v51  ;;  %v1156_v41 = vmul.f32 %v2662_v19, %v3538_v46 }
 0x55d   :  { %v1198_v25 = vmul.f32 %v1196_v21, %v1160_v48  ;;  %v1199_v39 = vmul.f32 %v1197_v2, %v1160_v48  ;;  %v3631_v60 = vpop.permute.xlu0 %1388 }
 0x55e   :  { %v1162_v61 = vmul.f32 %v1160_v48, %v1155_v43  ;;  %v1163_v53 = vmul.f32 %v1160_v48, %v1156_v41  ;;  %v3637_v40 = vsel %vm1396_vm6, %v3628_v49, %v3631_v60  ;;  %v3702_v48 = vpop.permute.xlu1 %1394 }
 0x55f   :  { %v1200_v7 = vadd.f32 %v1198_v25, %v1167_v37  ;;  %v1201_v58 = vadd.f32 %v1199_v39, %v1167_v37 }
 0x560   :  { %v1169_v63 = vadd.f32 %v1167_v37, %v1162_v61  ;;  %v1170_v51 = vadd.f32 %v1167_v37, %v1163_v53 }
 0x561   :  { %v1204_v56 = vmul.f32 %v1200_v7, %v1176_v55  ;;  %v1205_v38 = vmul.f32 %v1201_v58, %v1176_v55  ;;  %vm1202_vm9 = vcmp.gt.f32.partialorder %v1200_v7, 0.0  ;;  %vm1203_vm10 = vcmp.gt.f32.partialorder %v1201_v58, 0.0  ;;  %v3710_v57 = vpop.permute.xlu0 %1374 }
 0x562   :  { %vm1171_vm7 = vcmp.gt.f32.partialorder %v1169_v63, 0.0  ;;  %vm1172_vm8 = vcmp.gt.f32.partialorder %v1170_v51, 0.0  ;;  %v1178_v46 = vmul.f32 %v1176_v55, %v1169_v63  ;;  %v1179_v8 = vmul.f32 %v1176_v55, %v1170_v51  ;;  %v1638_v55 = vld [vmem:[%s4860_s4 + $0x8] sm:$0xff]  ;;  %v3708_v23 = vpop.permute.xlu1 %1380 }
 0x563   :  { %v3647_v26 = vsel %vm1202_vm9, %v1200_v7, %v1204_v56  ;;  %v3649_v37 = vsel %vm1203_vm10, %v1201_v58, %v1205_v38  ;;  %2622 = vmatprep.mubr.msk.f32.mxu0 %vm1639_vm11, %v1638_v55  ;;  %2623 = vmatprep.mubr.msk.f32.mxu1 %vm1639_vm11, %v1638_v55  ;;  %v1477_v56 = vsel %vm179_vm4, %v3608_v24, %v3610_v4  ;;  %v3763_v55 = vld [vmem:[%s4854_s1 + $0x7] ss:$8 sm:$0xf] }
 0x564   :  { %v3639_v47 = vsel %vm1171_vm7, %v1169_v63, %v1178_v46  ;;  %v3641_v52 = vsel %vm1172_vm8, %v1170_v51, %v1179_v8  ;;  %4980 = vst [vmem:[#allocation15_spill] sm:$0xff] %v3647_v26  ;;  %4981 = vst [vmem:[#allocation18_spill] sm:$0xff] %v3649_v37  ;;  %v2620_v63 = vld [vmem:[%s4854_s1 + $0x6] ss:$8 sm:$0xf]  ;;  %v1474_v8 = vsel %vm179_vm4, %v3610_v4, %v3606_v20 }
 0x565   :  { %4978 = vst [vmem:[#allocation17_spill] sm:$0xff] %v3639_v47  ;;  %4979 = vst [vmem:[#allocation11_spill] sm:$0xff] %v3641_v52  ;;  %1496 = vrot.lane.b32.xlu1 %v3641_v52, %s2686_s20  ;;  %1490 = vrot.lane.b32.xlu0 %v3639_v47, %s2686_s20  ;;  %v3714_v50 = vpop.permute.xlu0 %1386  ;;  %v1229_v38 = vmul.f32 %v3460_v32, %v2620_v63 }
 0x566   :  { %v3712_v18 = vpop.permute.xlu1 %1392  ;;  %4996 = vst [vmem:[#allocation32_spill] sm:$0xff] %v3763_v55 }
 0x567   :  { %v3776_v4 = vrot.slane %v1229_v38, %v2825_v11 }
 0x569   :  { %1508 = vrot.lane.b32.xlu1 %v3649_v37, %s2686_s20  ;;  %1502 = vrot.lane.b32.xlu0 %v3647_v26, %s2686_s20  ;;  %v3718_v3 = vpop.permute.xlu0 %1306 }
 0x56a   :  { %v3716_v54 = vpop.permute.xlu1 %1312 }
 0x56d   :  { %1448 = vrot.lane.b32.xlu1 %v3641_v52, %s2687_s21  ;;  %1442 = vrot.lane.b32.xlu0 %v3639_v47, %s2687_s21  ;;  %v3722_v19 = vpop.permute.xlu0 %1318 }
 0x56e   :  { %v3720_v59 = vpop.permute.xlu1 %1324  ;;  %4983 = vst [vmem:[#allocation16_spill] sm:$0xff] %v3722_v19 }
 0x56f   :  { %4982 = vst [vmem:[#allocation19_spill] sm:$0xff] %v3720_v59 }
 0x571   :  { %1460 = vrot.lane.b32.xlu1 %v3649_v37, %s2687_s21  ;;  %1454 = vrot.lane.b32.xlu0 %v3647_v26, %s2687_s21  ;;  %v3726_v2 = vpop.permute.xlu0 %1304 }
 0x572   :  { %v3724_v21 = vpop.permute.xlu1 %1310  ;;  %4985 = vst [vmem:[#allocation21_spill] sm:$0xff] %v3726_v2 }
 0x573   :  { %4984 = vst [vmem:[#allocation20_spill] sm:$0xff] %v3724_v21  ;;  %v3808_v21 = vrot.slane %v2620_v63, %v2829_v13 }
 0x575   :  { %1378 = vrot.lane.b32.xlu1 %v3641_v52, %s2699_s30  ;;  %1372 = vrot.lane.b32.xlu0 %v3639_v47, %s2699_s30  ;;  %v3730_v41 = vpop.permute.xlu0 %1316 }
 0x576   :  { %v3728_v43 = vpop.permute.xlu1 %1322  ;;  %4987 = vst [vmem:[#allocation23_spill] sm:$0xff] %v3730_v41 }
 0x577   :  { %4986 = vst [vmem:[#allocation22_spill] sm:$0xff] %v3728_v43  ;;  %v3799_v43 = vrot.slane %v2620_v63, %v2827_v12 }
 0x579   :  { %1390 = vrot.lane.b32.xlu1 %v3649_v37, %s2699_s30  ;;  %1384 = vrot.lane.b32.xlu0 %v3647_v26, %s2699_s30  ;;  %v3734_v39 = vpop.permute.xlu0 %1236  ;;  %5000 = vst [vmem:[#allocation36_spill] sm:$0xff] %v3799_v43  ;;  %v3814_v43 = vrot.slane %v2620_v63, %v2831_v14 }
 0x57a   :  { %v3732_v25 = vpop.permute.xlu1 %1242  ;;  %4989 = vst [vmem:[#allocation25_spill] sm:$0xff] %v3734_v39  ;;  %v3784_v39 = vld [vmem:[%s4854_s1] ss:$8 sm:$0xf] }
 0x57b   :  { %4988 = vst [vmem:[#allocation24_spill] sm:$0xff] %v3732_v25  ;;  %4998 = vst [vmem:[#allocation34_spill] sm:$0xff] %v3784_v39  ;;  %v3791_v25 = vrot.slane %v1229_v38, %v2831_v14 }
 0x57d   :  { %1308 = vrot.lane.b32.xlu1 %v3641_v52, %s2700_s10  ;;  %1302 = vrot.lane.b32.xlu0 %v3639_v47, %s2700_s10  ;;  %v3738_v53 = vpop.permute.xlu0 %1248 }
 0x57e   :  { %v3736_v61 = vpop.permute.xlu1 %1254  ;;  %4991 = vst [vmem:[#allocation27_spill] sm:$0xff] %v3738_v53  ;;  %v3773_v53 = vmul.f32 %v3460_v32, %v3763_v55  ;;  %v3794_v32 = vrot.slane %v2620_v63, %v2825_v11 }
 0x57f   :  { %4990 = vst [vmem:[#allocation26_spill] sm:$0xff] %v3736_v61  ;;  %v3779_v61 = vrot.slane %v1229_v38, %v2827_v12 }
 0x580   :  { %4997 = vst [vmem:[#allocation33_spill] sm:$0xff] %v3773_v53  ;;  %4999 = vst [vmem:[#allocation35_spill] sm:$0xff] %v3794_v32 }
 0x581   :  { %1320 = vrot.lane.b32.xlu1 %v3649_v37, %s2700_s10  ;;  %1314 = vrot.lane.b32.xlu0 %v3647_v26, %s2700_s10  ;;  %v3742_v58 = vpop.permute.xlu0 %1234 }
 0x582   :  { %v3740_v7 = vpop.permute.xlu1 %1240  ;;  %4993 = vst [vmem:[#allocation29_spill] sm:$0xff] %v3742_v58 }
 0x583   :  { %4992 = vst [vmem:[#allocation28_spill] sm:$0xff] %v3740_v7  ;;  %v3769_v7 = vmul.f32 %v1474_v8, %v2885_v27  ;;  %v3788_v8 = vrot.slane %v1229_v38, %v2829_v13 }
 0x585   :  { %1238 = vrot.lane.b32.xlu1 %v3641_v52, %s2701_s11  ;;  %1232 = vrot.lane.b32.xlu0 %v3639_v47, %s2701_s11  ;;  %v3749_v46 = vpop.permute.xlu0 %1246 }
 0x586   :  { %v3747_v51 = vpop.permute.xlu1 %1252  ;;  %4995 = vst [vmem:[#allocation31_spill] sm:$0xff] %v3749_v46  ;;  %v3766_v46 = vmul.f32 %v1477_v56, %v2897_v33  ;;  %v1228_v56 = vmul.f32 %v3784_v39, %v2620_v63 }
 0x587   :  { %4994 = vst [vmem:[#allocation30_spill] sm:$0xff] %v3747_v51 }
 0x589   :  { %1250 = vrot.lane.b32.xlu1 %v3649_v37, %s2701_s11  ;;  %1244 = vrot.lane.b32.xlu0 %v3647_v26, %s2701_s11 }
 0x58d   :  { %1500 = vrot.lane.b32.xlu1 %v3351_v62, %s2686_s20  ;;  %1494 = vrot.lane.b32.xlu0 %v3370_v44, %s2686_s20 }
 0x591   :  { %1512 = vrot.lane.b32.xlu1 %v3339_v45, %s2686_s20  ;;  %1506 = vrot.lane.b32.xlu0 %v3357_v5, %s2686_s20 }
 0x595   :  { %1498 = vrot.lane.b32.xlu1 %v3113_v0, %s2686_s20  ;;  %1492 = vrot.lane.b32.xlu0 %v3108_v28, %s2686_s20 }
 0x599   :  { %1510 = vrot.lane.b32.xlu1 %v3116_v31, %s2686_s20  ;;  %1504 = vrot.lane.b32.xlu0 %v3122_v30, %s2686_s20 }
 0x5d7   :  { %v1497_v51 = vpop.permute.xlu1 %1496  ;;  %v1491_v58 = vpop.permute.xlu0 %1490 }
 0x5d8   :  { %v1520_v55 = vsel %vm217_vm3, %v1491_v58, %v1497_v51 }
 0x5db   :  { %v1509_v53 = vpop.permute.xlu1 %1508  ;;  %v1503_v41 = vpop.permute.xlu0 %1502 }
 0x5dc   :  { %v1523_v39 = vsel %vm217_vm3, %v1509_v53, %v1491_v58  ;;  %v1514_v2 = vsel %vm217_vm3, %v1503_v41, %v1509_v53  ;;  %v1517_v38 = vsel %vm217_vm3, %v1497_v51, %v1503_v41  ;;  %v3817_v58 = vrot.slane %v1228_v56, %v2825_v11 }
 0x5dd   :  { %v1529_v19 = vmul.f32 %v1523_v39, %v2861_v15  ;;  %v1527_v32 = vmul.f32 %v1517_v38, %v2857_v9  ;;  %v1528_v59 = vmul.f32 %v1514_v2, %v2865_v16  ;;  %v3820_v53 = vrot.slane %v1228_v56, %v2827_v12 }
 0x5de   :  { %v1526_v41 = vmul.f32 %v1520_v55, %v2869_v17  ;;  %v1471_v39 = vsel %vm179_vm4, %v3606_v20, %v3612_v29  ;;  %v3828_v51 = vrot.slane %v1228_v56, %v2829_v13  ;;  %v3831_v2 = vrot.slane %v1228_v56, %v2831_v14 }
 0x5df   :  { %v1449_v63 = vpop.permute.xlu1 %1448  ;;  %1643 = vmatprep.subr.mxu0 %v1527_v32  ;;  %1714 = vmatprep.subr.mxu1 %v1529_v19  ;;  %v1443_v38 = vpop.permute.xlu0 %1442  ;;  %v1468_v55 = vsel %vm179_vm4, %v3612_v29, %v3608_v24  ;;  %v1473_v20 = vsel %vm179_vm4, %v3616_v6, %v3614_v22  ;;  %v1476_v56 = vsel %vm179_vm4, %v3620_v35, %v3616_v6 }
 0x5e0   :  { %1644 = vmatpush1.msra.mxu0 %v1526_v41  ;;  %1715 = vmatpush1.msra.mxu1 %v1528_v59  ;;  %v1467_v19 = vsel %vm179_vm4, %v3618_v42, %v3620_v35  ;;  %v1470_v24 = vsel %vm179_vm4, %v3614_v22, %v3618_v42  ;;  %v3857_v29 = vsel %vm1396_vm6, %v3702_v48, %v3622_v1 }
 0x5e1   :  { %1645 = vmatprep.subr.mxu0 %v3351_v62  ;;  %1716 = vmatprep.subr.mxu1 %v3339_v45  ;;  %v1488_v6 = vmul.f32 %v1471_v39, %v2908_v36  ;;  %v3866_v35 = vsel %vm1396_vm6, %v3622_v1, %v3628_v49  ;;  %v3872_v22 = vsel %vm1396_vm6, %v3631_v60, %v3702_v48 }
 0x5e2   :  { %1646 = vmatpush1.msra.mxu0 %v3370_v44  ;;  %1717 = vmatpush1.msra.mxu1 %v3357_v5  ;;  %v1482_v45 = vmul.f32 %v1476_v56, %v2897_v33  ;;  %v1489_v1 = vmul.f32 %v1468_v55, %v2901_v34  ;;  %v1483_v49 = vmul.f32 %v1473_v20, %v2885_v27 }
 0x5e3   :  { %v1461_v62 = vpop.permute.xlu1 %1460  ;;  %1647 = vmatprep.subr.mxu0 %v3113_v0  ;;  %1718 = vmatprep.subr.mxu1 %v3116_v31  ;;  %v1455_v42 = vpop.permute.xlu0 %1454  ;;  %v1484_v59 = vmul.f32 %v1470_v24, %v2908_v36  ;;  %v1438_v60 = vmul.f32 %v3776_v4, %v3857_v29  ;;  %v1485_v5 = vmul.f32 %v1467_v19, %v2901_v34 }
 0x5e4   :  { %1648 = vmatpush1.msra.mxu0 %v3108_v28  ;;  %1719 = vmatpush1.msra.mxu1 %v3122_v30  ;;  %v1440_v44 = vmul.f32 %v3788_v8, %v3637_v40  ;;  %v1441_v48 = vmul.f32 %v3791_v25, %v3872_v22  ;;  %v1439_v32 = vmul.f32 %v3779_v61, %v3866_v35 }
 0x5e5   :  { %1649 = vmatprep.subr.mxu0 %v3641_v52  ;;  %1720 = vmatprep.subr.mxu1 %v3649_v37  ;;  %v3899_v41 = vsel %vm1396_vm6, %v3710_v57, %v3708_v23  ;;  %v1472_v39 = vsel %vm179_vm4, %v1443_v38, %v1449_v63  ;;  %v1466_v55 = vsel %vm179_vm4, %v1455_v42, %v1461_v62 }
 0x5e6   :  { %1650 = vmatpush1.msra.mxu0 %v3639_v47  ;;  %1721 = vmatpush1.msra.mxu1 %v3647_v26  ;;  %v3911_v20 = vsel %vm1396_vm6, %v3712_v18, %v3710_v57  ;;  %v1475_v56 = vsel %vm179_vm4, %v1461_v62, %v1443_v38  ;;  %v1469_v19 = vsel %vm179_vm4, %v1449_v63, %v1455_v42 }
 0x5e7   :  { %v1379_v24 = vpop.permute.xlu1 %1378  ;;  %1651 = vmatprep.subr.mxu0 %v3769_v7  ;;  %1722 = vmatprep.subr.mxu1 %v1489_v1  ;;  %v1373_v52 = vpop.permute.xlu0 %1372  ;;  %v3923_v0 = vsel %vm1396_vm6, %v3714_v50, %v3712_v18  ;;  %v3929_v57 = vsel %vm1396_vm6, %v3708_v23, %v3714_v50  ;;  %v3935_v63 = vsel %vm1326_vm12, %v3718_v3, %v3716_v54  ;;  %v5001_v7 = vld [vmem:[#allocation19_spill] sm:$0xff] }
 0x5e8   :  { %1652 = vmatpush1.msra.mxu0 %v3766_v46  ;;  %1723 = vmatpush1.msra.mxu1 %v1488_v6  ;;  %v3942_v18 = vsel %vm1326_vm12, %v5001_v7, %v3718_v3  ;;  %v1479_v38 = vmul.f32 %v1472_v39, %v2885_v27  ;;  %v1481_v23 = vmul.f32 %v1466_v55, %v2901_v34  ;;  %v5003_v55 = vld [vmem:[#allocation36_spill] sm:$0xff]  ;;  %v5007_v34 = vld [vmem:[#allocation22_spill] sm:$0xff] }
 0x5e9   :  { %1653 = vmatprep.subr.mxu0 %v1483_v49  ;;  %1724 = vmatprep.subr.mxu1 %v1485_v5  ;;  %v1434_v50 = vmul.f32 %v3776_v4, %v3911_v20  ;;  %v1478_v62 = vmul.f32 %v1475_v56, %v2897_v33  ;;  %v1480_v46 = vmul.f32 %v1469_v19, %v2908_v36  ;;  %v5002_v5 = vld [vmem:[#allocation35_spill] sm:$0xff]  ;;  %v5004_v56 = vld [vmem:[#allocation16_spill] sm:$0xff]  ;;  %v5006_v36 = vld [vmem:[#allocation21_spill] sm:$0xff] }
 0x5ea   :  { %1654 = vmatpush1.msra.mxu0 %v1482_v45  ;;  %1725 = vmatpush1.msra.mxu1 %v1484_v59  ;;  %v1435_v6 = vmul.f32 %v3779_v61, %v3899_v41  ;;  %v1436_v3 = vmul.f32 %v3788_v8, %v3929_v57  ;;  %v1437_v42 = vmul.f32 %v3791_v25, %v3923_v0 }
 0x5eb   :  { %v1391_v1 = vpop.permute.xlu1 %1390  ;;  %1655 = vmatprep.subr.mxu0 %v1479_v38  ;;  %1726 = vmatprep.subr.mxu1 %v1481_v23  ;;  %v1385_v49 = vpop.permute.xlu0 %1384  ;;  %v1368_v39 = vmul.f32 %v5002_v5, %v3942_v18  ;;  %v1369_v45 = vmul.f32 %v5003_v55, %v3935_v63  ;;  %v3962_v59 = vsel %vm1396_vm6, %v1373_v52, %v1379_v24 }
 0x5ec   :  { %1656 = vmatpush1.msra.mxu0 %v1478_v62  ;;  %1727 = vmatpush1.msra.mxu1 %v1480_v46  ;;  %v3968_v19 = vsel %vm1326_vm12, %v5004_v56, %v5001_v7  ;;  %v3974_v38 = vsel %vm1326_vm12, %v3716_v54, %v5004_v56  ;;  %v3978_v23 = vsel %vm1396_vm6, %v1391_v1, %v1373_v52  ;;  %v5005_v46 = vld [vmem:[#allocation20_spill] sm:$0xff] }
 0x5ed   :  { %v3982_v62 = vsel %vm1396_vm6, %v1385_v49, %v1391_v1  ;;  %1657 = vmatprep.subr.mxu0 %v1439_v32  ;;  %v3988_v7 = vsel %vm1326_vm12, %v5006_v36, %v5005_v46  ;;  %v3994_v54 = vsel %vm1326_vm12, %v5007_v34, %v5006_v36  ;;  %v3998_v52 = vsel %vm1396_vm6, %v1379_v24, %v1385_v49  ;;  %v5008_v32 = vld [vmem:[#allocation23_spill] sm:$0xff] }
 0x5ee   :  { %1728 = vmatprep.subr.mxu1 %v1441_v48  ;;  %1658 = vmatpush1.msra.mxu0 %v1438_v60  ;;  %v4004_v1 = vsel %vm1326_vm12, %v5008_v32, %v5007_v34  ;;  %v4010_v56 = vsel %vm1326_vm12, %v5005_v46, %v5008_v32  ;;  %v1431_v36 = vmul.f32 %v3779_v61, %v3962_v59  ;;  %v5012_v32 = vld [vmem:[#allocation27_spill] sm:$0xff] }
 0x5ef   :  { %1729 = vmatpush1.msra.mxu1 %v1440_v44  ;;  %v1309_v24 = vpop.permute.xlu1 %1308  ;;  %1659 = vmatprep.subr.mxu0 %v1435_v6  ;;  %v1303_v48 = vpop.permute.xlu0 %1302  ;;  %v1370_v60 = vmul.f32 %v3808_v21, %v3974_v38  ;;  %v1430_v34 = vmul.f32 %v3776_v4, %v3978_v23  ;;  %v1433_v49 = vmul.f32 %v3791_v25, %v3982_v62 }
 0x5f0   :  { %1730 = vmatprep.subr.mxu1 %v1437_v42  ;;  %1660 = vmatpush1.msra.mxu0 %v1434_v50  ;;  %v1371_v46 = vmul.f32 %v3814_v43, %v3968_v19  ;;  %v1364_v61 = vmul.f32 %v5002_v5, %v3994_v54  ;;  %v1432_v44 = vmul.f32 %v3788_v8, %v3998_v52  ;;  %v5009_v50 = vld [vmem:[#allocation24_spill] sm:$0xff]  ;;  %v5010_v42 = vld [vmem:[#allocation25_spill] sm:$0xff] }
 0x5f1   :  { %1731 = vmatpush1.msra.mxu1 %v1436_v3  ;;  %1661 = vmatprep.subr.mxu0 %v1431_v36  ;;  %v1365_v6 = vmul.f32 %v5003_v55, %v3988_v7  ;;  %v1366_v4 = vmul.f32 %v3808_v21, %v4010_v56  ;;  %v1367_v25 = vmul.f32 %v3814_v43, %v4004_v1  ;;  %v5011_v3 = vld [vmem:[#allocation26_spill] sm:$0xff] }
 0x5f2   :  { %1732 = vmatprep.subr.mxu1 %v1433_v49  ;;  %1662 = vmatpush1.msra.mxu0 %v1430_v34  ;;  %v4037_v8 = vsel %vm1256_vm13, %v5010_v42, %v5009_v50  ;;  %v4043_v36 = vsel %vm1256_vm13, %v5012_v32, %v5011_v3  ;;  %v4047_v27 = vsel %vm1326_vm12, %v1303_v48, %v1309_v24 }
 0x5f3   :  { %1733 = vmatpush1.msra.mxu1 %v1432_v44  ;;  %v1321_v33 = vpop.permute.xlu1 %1320  ;;  %1663 = vmatprep.subr.mxu0 %v1369_v45  ;;  %v1315_v34 = vpop.permute.xlu0 %1314  ;;  %v4065_v45 = vsel %vm1256_vm13, %v5011_v3, %v5010_v42  ;;  %v1361_v44 = vmul.f32 %v5003_v55, %v4047_v27  ;;  %v5015_v42 = vld [vmem:[#allocation30_spill] sm:$0xff]  ;;  %v5016_v3 = vld [vmem:[#allocation31_spill] sm:$0xff] }
 0x5f4   :  { %v4051_v49 = vsel %vm1326_vm12, %v1321_v33, %v1303_v48  ;;  %1734 = vmatprep.subr.mxu1 %v1371_v46  ;;  %v4055_v37 = vsel %vm1326_vm12, %v1315_v34, %v1321_v33  ;;  %v4059_v26 = vsel %vm1326_vm12, %v1309_v24, %v1315_v34  ;;  %1664 = vmatpush1.msra.mxu0 %v1368_v39 }
 0x5f5   :  { %v1360_v48 = vmul.f32 %v5002_v5, %v4051_v49  ;;  %v1362_v46 = vmul.f32 %v3808_v21, %v4059_v26  ;;  %v1363_v33 = vmul.f32 %v3814_v43, %v4055_v37  ;;  %1735 = vmatpush1.msra.mxu1 %v1370_v60  ;;  %v1299_v24 = vmul.f32 %v3820_v53, %v4037_v8  ;;  %v5013_v5 = vld [vmem:[#allocation28_spill] sm:$0xff]  ;;  %v5014_v43 = vld [vmem:[#allocation29_spill] sm:$0xff] }
 0x5f6   :  { %v4079_v39 = vsel %vm1256_vm13, %v5009_v50, %v5012_v32  ;;  %1665 = vmatprep.subr.mxu0 %v1365_v6  ;;  %1736 = vmatprep.subr.mxu1 %v1367_v25  ;;  %v1301_v21 = vmul.f32 %v3831_v2, %v4043_v36  ;;  %v4089_v60 = vsel %vm1256_vm13, %v5014_v43, %v5013_v5 }
 0x5f7   :  { %v4095_v50 = vsel %vm1256_vm13, %v5016_v3, %v5015_v42  ;;  %1666 = vmatpush1.msra.mxu0 %v1364_v61  ;;  %1737 = vmatpush1.msra.mxu1 %v1366_v4  ;;  %v1239_v55 = vpop.permute.xlu1 %1238  ;;  %v1233_v6 = vpop.permute.xlu0 %1232  ;;  %v4101_v25 = vsel %vm1256_vm13, %v5015_v42, %v5014_v43  ;;  %v4107_v32 = vsel %vm1256_vm13, %v5013_v5, %v5016_v3  ;;  %v5017_v4 = vld [vmem:[#allocation33_spill] sm:$0xff] }
 0x5f8   :  { %1667 = vmatprep.subr.mxu0 %v1361_v44  ;;  %1738 = vmatprep.subr.mxu1 %v1363_v33  ;;  %v4111_v61 = vsel %vm1256_vm13, %v1233_v6, %v1239_v55  ;;  %v1608_v34 = vrot.slane %v5017_v4, %v2825_v11  ;;  %v1298_v47 = vmul.f32 %v3817_v58, %v4065_v45 }
 0x5f9   :  { %v1300_v43 = vmul.f32 %v3828_v51, %v4079_v39  ;;  %1668 = vmatpush1.msra.mxu0 %v1360_v48  ;;  %1739 = vmatpush1.msra.mxu1 %v1362_v46  ;;  %v1612_v5 = vrot.slane %v5017_v4, %v2827_v12  ;;  %v1295_v33 = vmul.f32 %v3820_v53, %v4089_v60 }
 0x5fa   :  { %v1297_v44 = vmul.f32 %v3831_v2, %v4095_v50  ;;  %1669 = vmatprep.subr.mxu0 %v1299_v24  ;;  %1740 = vmatprep.subr.mxu1 %v1301_v21  ;;  %v1294_v42 = vmul.f32 %v3817_v58, %v4101_v25  ;;  %v1296_v3 = vmul.f32 %v3828_v51, %v4107_v32 }
 0x5fb   :  { %v1291_v48 = vmul.f32 %v3820_v53, %v4111_v61  ;;  %1670 = vmatpush1.msra.mxu0 %v1298_v47  ;;  %1741 = vmatpush1.msra.mxu1 %v1300_v43  ;;  %v1251_v46 = vpop.permute.xlu1 %1250  ;;  %v1245_v31 = vpop.permute.xlu0 %1244  ;;  %v1620_v47 = vrot.slane %v5017_v4, %v2831_v14 }
 0x5fc   :  { %v4133_v30 = vsel %vm1256_vm13, %v1251_v46, %v1233_v6  ;;  %1671 = vmatprep.subr.mxu0 %v1295_v33  ;;  %1742 = vmatprep.subr.mxu1 %v1297_v44  ;;  %v4137_v24 = vsel %vm1256_vm13, %v1245_v31, %v1251_v46  ;;  %v4141_v21 = vsel %vm1256_vm13, %v1239_v55, %v1245_v31 }
 0x5fd   :  { %v1290_v53 = vmul.f32 %v3817_v58, %v4133_v30  ;;  %v1292_v6 = vmul.f32 %v3828_v51, %v4141_v21  ;;  %v1293_v43 = vmul.f32 %v3831_v2, %v4137_v24  ;;  %1672 = vmatpush1.msra.mxu0 %v1294_v42  ;;  %v1616_v33 = vrot.slane %v5017_v4, %v2829_v13  ;;  %v5018_v4 = vld [vmem:[#allocation32_spill] sm:$0xff] }
 0x5fe   :  { %v1634_v44 = vmul.f32 %v1612_v5, %v3637_v40  ;;  %1743 = vmatpush1.msra.mxu1 %v1296_v3  ;;  %1673 = vmatprep.subr.mxu0 %v1291_v48  ;;  %v1633_v31 = vmul.f32 %v1608_v34, %v3866_v35  ;;  %v1636_v51 = vmul.f32 %v1620_v47, %v3857_v29  ;;  %v5019_v3 = vld [vmem:[#allocation34_spill] sm:$0xff] }
 0x5ff   :  { %v4155_v55 = vpop.permute.xlu1 %1500  ;;  %1674 = vmatpush1.msra.mxu0 %v1290_v53  ;;  %1744 = vmatprep.subr.mxu1 %v1293_v43  ;;  %v4157_v58 = vpop.permute.xlu0 %1494  ;;  %v1635_v2 = vmul.f32 %v1616_v33, %v3872_v22  ;;  %v1630_v42 = vmul.f32 %v1612_v5, %v3929_v57  ;;  %v1575_v46 = vrot.slane %v5018_v4, %v2825_v11 }
 0x600   :  { %1685 = vmatprep.subr.mxu0 %v1634_v44  ;;  %1745 = vmatpush1.msra.mxu1 %v1292_v6  ;;  %v1629_v40 = vmul.f32 %v1608_v34, %v3899_v41  ;;  %v1632_v35 = vmul.f32 %v1620_v47, %v3911_v20  ;;  %v1230_v48 = vmul.f32 %v5019_v3, %v5018_v4 }
 0x601   :  { %1686 = vmatpush2.msra.mxu0 %v1633_v31  ;;  %1756 = vmatprep.subr.mxu1 %v1636_v51  ;;  %v1631_v29 = vmul.f32 %v1616_v33, %v3923_v0  ;;  %v1579_v22 = vrot.slane %v5018_v4, %v2827_v12  ;;  %v1626_v57 = vmul.f32 %v1612_v5, %v3998_v52 }
 0x602   :  { %1687 = vmatprep.subr.mxu0 %v1630_v42  ;;  %1757 = vmatpush2.msra.mxu1 %v1635_v2  ;;  %v1587_v53 = vrot.slane %v5018_v4, %v2831_v14  ;;  %v1625_v41 = vmul.f32 %v1608_v34, %v3962_v59  ;;  %v1628_v20 = vmul.f32 %v1620_v47, %v3978_v23 }
 0x603   :  { %v4176_v6 = vpop.permute.xlu1 %1512  ;;  %1688 = vmatpush2.msra.mxu0 %v1629_v40  ;;  %1758 = vmatprep.subr.mxu1 %v1632_v35  ;;  %v1507_v43 = vpop.permute.xlu0 %1506  ;;  %v1583_v0 = vrot.slane %v5018_v4, %v2829_v13  ;;  %v1601_v44 = vmul.f32 %v1579_v22, %v3974_v38  ;;  %v1627_v52 = vmul.f32 %v1616_v33, %v3982_v62 }
 0x604   :  { %1689 = vmatprep.subr.mxu0 %v1626_v57  ;;  %1759 = vmatpush2.msra.mxu1 %v1631_v29  ;;  %v1600_v5 = vmul.f32 %v1575_v46, %v3935_v63  ;;  %v1603_v59 = vmul.f32 %v1587_v53, %v3942_v18  ;;  %v1542_v23 = vrot.slane %v1230_v48, %v2825_v11 }
 0x605   :  { %1690 = vmatpush2.msra.mxu0 %v1625_v41  ;;  %1760 = vmatprep.subr.mxu1 %v1628_v20  ;;  %v1602_v34 = vmul.f32 %v1583_v0, %v3968_v19  ;;  %v1597_v47 = vmul.f32 %v1579_v22, %v4010_v56  ;;  %v1554_v31 = vrot.slane %v1230_v48, %v2831_v14  ;;  %v5020_v20 = vmov 0.0  }
 0x606   :  { %1691 = vmatprep.subr.mxu0 %v1601_v44  ;;  %1761 = vmatpush2.msra.mxu1 %v1627_v52  ;;  %v1596_v38 = vmul.f32 %v1575_v46, %v3988_v7  ;;  %v1599_v62 = vmul.f32 %v1587_v53, %v3994_v54  ;;  %v1546_v63 = vrot.slane %v1230_v48, %v2827_v12 }
 0x607   :  { %v1499_v33 = vpop.permute.xlu1 %1498  ;;  %1692 = vmatpush2.msra.mxu0 %v1600_v5  ;;  %1762 = vmatprep.subr.mxu1 %v1603_v59  ;;  %v1493_v18 = vpop.permute.xlu0 %1492  ;;  %v1598_v51 = vmul.f32 %v1583_v0, %v4004_v1  ;;  %v1550_v19 = vrot.slane %v1230_v48, %v2829_v13  ;;  %v1593_v56 = vmul.f32 %v1579_v22, %v4059_v26  ;;  %v2624_v59 = vld [vmem:[%s4856_s6 + $0x10] sm:$0xff] }
 0x608   :  { %1693 = vmatprep.subr.mxu0 %v1597_v47  ;;  %1763 = vmatpush2.msra.mxu1 %v1602_v34  ;;  %v1592_v2 = vmul.f32 %v1575_v46, %v4047_v27  ;;  %v1595_v7 = vmul.f32 %v1587_v53, %v4051_v49  ;;  %v1567_v54 = vmul.f32 %v1542_v23, %v4037_v8  ;;  %v1637_v53 = vld [vmem:[%s4860_s4] sm:$0xff]  ;;  %v4259_v47 = vld [vmem:[%s4853_s0 + $0x10] sm:$0xff] }
 0x609   :  { %1694 = vmatpush2.msra.mxu0 %v1596_v38  ;;  %1764 = vmatprep.subr.mxu1 %v1599_v62  ;;  %v1568_v42 = vmul.f32 %v1546_v63, %v4079_v39  ;;  %v1594_v4 = vmul.f32 %v1583_v0, %v4055_v37  ;;  %v1570_v1 = vmul.f32 %v1554_v31, %v4065_v45  ;;  %v4252_v34 = vld [vmem:[%s4853_s0] sm:$0xff]  ;;  %v5021_v38 = vld [vmem:[#allocation14_spill] sm:$0xff]  ;;  %v5022_v62 = vld [vmem:[#allocation13_spill] sm:$0xff] }
 0x60a   :  { %1695 = vmatprep.subr.mxu0 %v1593_v56  ;;  %1765 = vmatpush2.msra.mxu1 %v1598_v51  ;;  %v1569_v26 = vmul.f32 %v1550_v19, %v4043_v36  ;;  %v1563_v40 = vmul.f32 %v1542_v23, %v4089_v60  ;;  %v1566_v27 = vmul.f32 %v1554_v31, %v4101_v25 }
 0x60b   :  { %1696 = vmatpush2.msra.mxu0 %v1592_v2  ;;  %1766 = vmatprep.subr.mxu1 %v1595_v7  ;;  %v1564_v49 = vmul.f32 %v1546_v63, %v4107_v32  ;;  %v1565_v8 = vmul.f32 %v1550_v19, %v4095_v50  ;;  %v1505_v46 = vpop.permute.xlu0 %1504  ;;  %v1559_v37 = vmul.f32 %v1542_v23, %v4111_v61  ;;  %v1511_v45 = vpop.permute.xlu1 %1510  ;;  %v2626_v23 = vld [vmem:[%s4857_s8 + $0x10] sm:$0xff] }
 0x60c   :  { %1697 = vmatprep.subr.mxu0 %v1568_v42  ;;  %1767 = vmatpush2.msra.mxu1 %v1594_v4  ;;  %v1562_v39 = vmul.f32 %v1554_v31, %v4133_v30  ;;  %v1519_v36 = vsel %vm217_vm3, %v4155_v55, %v1507_v43  ;;  %v1560_v60 = vmul.f32 %v1546_v63, %v4141_v21  ;;  %v4266_v31 = vld [vmem:[%s4853_s0 + $0x18] sm:$0xff]  ;;  %v5023_v63 = vld [vmem:[#allocation17_spill] sm:$0xff] }
 0x60d   :  { %1698 = vmatpush2.msra.mxu0 %v1567_v54  ;;  %1768 = vmatprep.subr.mxu1 %v1570_v1  ;;  %v1522_v50 = vsel %vm217_vm3, %v4157_v58, %v4155_v55  ;;  %v1525_v25 = vsel %vm217_vm3, %v4176_v6, %v4157_v58  ;;  %v1561_v30 = vmul.f32 %v1550_v19, %v4137_v24 }
 0x60e   :  { %1699 = vmatprep.subr.mxu0 %v1564_v49  ;;  %1769 = vmatpush2.msra.mxu1 %v1569_v26  ;;  %v1516_v32 = vsel %vm217_vm3, %v1507_v43, %v4176_v6  ;;  %v1518_v61 = vsel %vm217_vm3, %v1499_v33, %v1505_v46  ;;  %v1535_v21 = vmul.f32 %v1519_v36, %v2857_v9  ;;  %v5027_v36 = vld [vmem:[#allocation11_spill] sm:$0xff] }
 0x60f   :  { %1700 = vmatpush2.msra.mxu0 %v1563_v40  ;;  %1770 = vmatprep.subr.mxu1 %v1566_v27  ;;  %v1521_v55 = vsel %vm217_vm3, %v1493_v18, %v1499_v33  ;;  %v1524_v58 = vsel %vm217_vm3, %v1511_v45, %v1493_v18  ;;  %v1534_v24 = vmul.f32 %v1522_v50, %v2869_v17  ;;  %v5024_v33 = vld [vmem:[#allocation15_spill] sm:$0xff]  ;;  %v5025_v18 = vld [vmem:[#allocation18_spill] sm:$0xff] }
 0x610   :  { %1701 = vmatprep.subr.mxu0 %v1560_v60  ;;  %1771 = vmatpush2.msra.mxu1 %v1565_v8  ;;  %v1537_v35 = vmul.f32 %v1525_v25, %v2861_v15  ;;  %v1515_v3 = vsel %vm217_vm3, %v1505_v46, %v1511_v45  ;;  %v1536_v48 = vmul.f32 %v1516_v32, %v2865_v16  ;;  %v2625_v46 = vld [vmem:[%s4858_s7 + $0x10] sm:$0xff] }
 0x611   :  { %1702 = vmatpush2.msra.mxu0 %v1559_v37  ;;  %1772 = vmatprep.subr.mxu1 %v1562_v39  ;;  %v1531_v29 = vmul.f32 %v1518_v61, %v2857_v9  ;;  %v1530_v22 = vmul.f32 %v1521_v55, %v2869_v17  ;;  %v1533_v57 = vmul.f32 %v1524_v58, %v2861_v15  ;;  %v4292_v37 = vld [vmem:[%s4853_s0 + $0x8] sm:$0xff] }
 0x612   :  { %1703 = vmatprep.subr.mxu0 %v1535_v21  ;;  %1773 = vmatpush2.msra.mxu1 %v1561_v30  ;;  %v1532_v41 = vmul.f32 %v1515_v3, %v2865_v16  ;;  %v5026_v39 = vld [vmem:[#allocation12_spill] sm:$0xff] }
 0x613   :  { %1704 = vmatpush2.msra.mxu0 %v1534_v24  ;;  %1774 = vmatprep.subr.mxu1 %v1537_v35  ;;  %v4539_v15 = vld [vmem:[%s4854_s1 + $0x20] ss:$8 sm:$0xf] }
 0x614   :  { %1705 = vmatprep.subr.mxu0 %v1531_v29  ;;  %1775 = vmatpush2.msra.mxu1 %v1536_v48  ;;  %v4325_v29 = vld [vmem:[%s4854_s1 + $0x21] ss:$8 sm:$0xf] }
 0x615   :  { %1706 = vmatpush2.msra.mxu0 %v1530_v22  ;;  %1776 = vmatprep.subr.mxu1 %v1533_v57  ;;  %v4335_v57 = vld [vmem:[%s4854_s1 + $0x1] ss:$8 sm:$0xf] }
 0x616   :  { %1708 = vmatmul.mubr.f32.vlgmr.msra.gmra.mxu0 %v1637_v53  ;;  %1777 = vmatpush2.msra.mxu1 %v1532_v41  ;;  %v4545_v9 = vmul.f32 %v4335_v57, %v4539_v15 }
 0x617   :  { %1779 = vmatmul.mubr.f32.vlgmr.msra.gmra.mxu1 %v1637_v53  ;;  %v4339_v53 = vmul.f32 %v4335_v57, %v4325_v29 }
 0x618   :  { %2378 = vmatprep.mubr.f32.mxu1 %v5020_v20  ;;  %v2064_v57 = vrot.slane %v4545_v9, %v2827_v12  ;;  %v2068_v10 = vrot.slane %v4545_v9, %v2829_v13 }
 0x6d6   :  { %v1709_v6 = vpop.f32.mrf.mxu0 }
 0x6d7   :  { %v1780_v43 = vpop.f32.mrf.mxu1 }
 0x6d8   :  { %v1711_v0 = vpop.f32.mrf.mxu0 }
 0x6d9   :  { %v1791_v44 = vadd.f32 %v1711_v0, %v1709_v6  ;;  %v1782_v52 = vpop.f32.mrf.mxu1 }
 0x6da   :  { %v1832_v5 = vadd.f32 %v1782_v52, %v1780_v43 }
 0x6db   :  { %1792 = vadd.xlane.f32.xlu0 %v1791_v44 }
 0x6dc   :  { %1833 = vadd.xlane.f32.xlu1 %v1832_v5 }
 0x6ed   :  { %1809 = vperm.xlu1 %2653, %v2624_v59   ;;  %v4354_v59 = vrot.slane %v4339_v53, %v2827_v12 }
 0x6f1   :  { %1825 = vperm.xlu1 %2653, %v2626_v23  }
 0x6f5   :  { %1892 = vrot.lane.b32.xlu1 %v4252_v34, %s2687_s21 }
 0x6f9   :  { %2030 = vrot.lane.b32.xlu1 %v4259_v47, %s2686_s20 }
 0x6fd   :  { %1916 = vrot.lane.b32.xlu1 %v4266_v31, %s2687_s21 }
 0x701   :  { %1890 = vrot.lane.b32.xlu1 %v3108_v28, %s2687_s21 }
 0x705   :  { %2028 = vrot.lane.b32.xlu1 %v5021_v38, %s2686_s20 }
 0x709   :  { %1914 = vrot.lane.b32.xlu1 %v5022_v62, %s2687_s21 }
 0x70d   :  { %1888 = vrot.lane.b32.xlu1 %v5023_v63, %s2687_s21 }
 0x711   :  { %2026 = vrot.lane.b32.xlu1 %v5024_v33, %s2686_s20 }
 0x715   :  { %1912 = vrot.lane.b32.xlu1 %v5025_v18, %s2687_s21 }
 0x719   :  { %1908 = vrot.lane.b32.xlu1 %v4259_v47, %s2687_s21 }
 0x71d   :  { %1906 = vrot.lane.b32.xlu1 %v5021_v38, %s2687_s21 }
 0x764   :  { %v1793_v51 = vpop.xlane.xlu0 %1792 }
 0x765   :  { %v1794_v19 = vmul.f32 0.00390625, %v1793_v51  ;;  %v1834_v56 = vpop.xlane.xlu1 %1833 }
 0x766   :  { %v1835_v2 = vmul.f32 0.00390625, %v1834_v56 }
 0x767   :  { %v1795_v7 = vsub.f32 %v1709_v6, %v1794_v19  ;;  %v1796_v54 = vsub.f32 %v1711_v0, %v1794_v19  ;;  %v5028_v6 = vld [vmem:[#allocation8_spill] sm:$0xff] }
 0x768   :  { %v1836_v42 = vsub.f32 %v1780_v43, %v1835_v2  ;;  %v1837_v4 = vsub.f32 %v1782_v52, %v1835_v2  ;;  %v5030_v52 = vld [vmem:[#allocation7_spill] sm:$0xff] }
 0x769   :  { %v1797_v1 = vmul.f32 %v1795_v7, %v1795_v7  ;;  %v1798_v26 = vmul.f32 %v1796_v54, %v1796_v54  ;;  %v1810_v45 = vpop.permute.xlu1 %1809 }
 0x76a   :  { %v1838_v40 = vmul.f32 %v1836_v42, %v1836_v42  ;;  %v1839_v27 = vmul.f32 %v1837_v4, %v1837_v4 }
 0x76b   :  { %v1799_v49 = vadd.f32 %v1798_v26, %v1797_v1 }
 0x76c   :  { %v1840_v8 = vadd.f32 %v1839_v27, %v1838_v40  ;;  %v4367_v27 = vrot.slane %v4339_v53, %v2825_v11 }
 0x76d   :  { %1800 = vadd.xlane.f32.xlu0 %v1799_v49  ;;  %v4316_v60 = vpop.permute.xlu1 %1825 }
 0x771   :  { %1841 = vadd.xlane.f32.xlu0 %v1840_v8  ;;  %v1893_v50 = vpop.permute.xlu1 %1892 }
 0x775   :  { %v2031_v25 = vpop.permute.xlu1 %2030 }
 0x779   :  { %v4318_v32 = vpop.permute.xlu1 %1916 }
 0x77a   :  { %v4330_v22 = vsel %vm179_vm4, %v4318_v32, %v1893_v50 }
 0x77b   :  { %v2105_v43 = vmul.f32 %v4330_v22, %v5028_v6 }
 0x77d   :  { %v1891_v24 = vpop.permute.xlu1 %1890 }
 0x781   :  { %v4320_v48 = vpop.permute.xlu1 %2028 }
 0x785   :  { %v4356_v23 = vpop.permute.xlu1 %1914 }
 0x787   :  { %1816 = vperm.xlu0 %2654, %v2625_v46  }
 0x78b   :  { %1900 = vrot.lane.b32.xlu0 %v4292_v37, %s2687_s21 }
 0x78f   :  { %2038 = vrot.lane.b32.xlu0 %v4266_v31, %s2686_s20 }
 0x793   :  { %2022 = vrot.lane.b32.xlu0 %v4292_v37, %s2686_s20 }
 0x797   :  { %1898 = vrot.lane.b32.xlu0 %v5026_v39, %s2687_s21 }
 0x79b   :  { %2036 = vrot.lane.b32.xlu0 %v5022_v62, %s2686_s20 }
 0x79f   :  { %2020 = vrot.lane.b32.xlu0 %v5026_v39, %s2686_s20 }
 0x7a3   :  { %1896 = vrot.lane.b32.xlu0 %v5027_v36, %s2687_s21 }
 0x7a7   :  { %2034 = vrot.lane.b32.xlu0 %v5025_v18, %s2686_s20 }
 0x7ab   :  { %2018 = vrot.lane.b32.xlu0 %v5027_v36, %s2686_s20 }
 0x7af   :  { %2014 = vrot.lane.b32.xlu0 %v4252_v34, %s2686_s20 }
 0x7b3   :  { %2012 = vrot.lane.b32.xlu0 %v3108_v28, %s2686_s20 }
 0x7f6   :  { %v1801_v30 = vpop.xlane.xlu0 %1800 }
 0x7f7   :  { %v1802_v61 = vmul.f32 0.00390625, %v1801_v30  ;;  %v1889_v30 = vpop.permute.xlu1 %1888 }
 0x7f9   :  { %v1803_v21 = vadd.f32 1e-05, %v1802_v61 }
 0x7fa   :  { %v1842_v55 = vpop.xlane.xlu0 %1841 }
 0x7fb   :  { %2663 = vrsqrt.f32 %v1803_v21  ;;  %v1843_v58 = vmul.f32 0.00390625, %v1842_v55 }
 0x7fd   :  { %v1844_v35 = vadd.f32 1e-05, %v1843_v58 }
 0x7ff   :  { %2665 = vrsqrt.f32 %v1844_v35 }
 0x802   :  { %v1817_v3 = vpop.permute.xlu0 %1816 }
 0x806   :  { %v4341_v41 = vpop.permute.xlu0 %1900 }
 0x807   :  { %v4348_v0 = vsel %vm179_vm4, %v1893_v50, %v4341_v41 }
 0x808   :  { %5029 = vst [vmem:[#allocation19_spill] sm:$0xff] %v4348_v0  ;;  %v2664_v44 = vpop.eup %2663  ;;  %v2106_v5 = vmul.f32 %v4348_v0, %v5030_v52 }
 0x809   :  { %v1805_v51 = vmul.f32 %v2664_v44, %v1795_v7  ;;  %v1806_v19 = vmul.f32 %v2664_v44, %v1796_v54 }
 0x80a   :  { %v4358_v56 = vpop.permute.xlu0 %2038  ;;  %2243 = vmatprep.subr.mxu0 %v2106_v5 }
 0x80b   :  { %v1812_v2 = vmul.f32 %v1810_v45, %v1805_v51  ;;  %v1813_v1 = vmul.f32 %v1810_v45, %v1806_v19  ;;  %v4363_v26 = vsel %vm217_vm3, %v2031_v25, %v4358_v56  ;;  %2244 = vmatpush1.msra.mxu0 %v2105_v43  ;;  %v2027_v19 = vpop.permute.xlu1 %2026 }
 0x80c   :  { %v2666_v40 = vpop.eup %2665  ;;  %v2233_v7 = vmul.f32 %v4354_v59, %v4363_v26 }
 0x80d   :  { %v1846_v54 = vmul.f32 %v2666_v40, %v1836_v42  ;;  %v1847_v49 = vmul.f32 %v2666_v40, %v1837_v4  ;;  %v1819_v8 = vadd.f32 %v1817_v3, %v1812_v2  ;;  %v1820_v46 = vadd.f32 %v1817_v3, %v1813_v1 }
 0x80e   :  { %v4371_v50 = vpop.permute.xlu0 %2022  ;;  %2338 = vmatprep.subr.mxu1 %v2233_v7 }
 0x80f   :  { %v1848_v61 = vmul.f32 %v1846_v54, %v1810_v45  ;;  %v1849_v21 = vmul.f32 %v1847_v49, %v1810_v45  ;;  %v4376_v55 = vsel %vm217_vm3, %v4371_v50, %v2031_v25  ;;  %vm1822_vm14 = vcmp.gt.f32.partialorder %v1820_v46, 0.0 }
 0x810   :  { %v2232_v58 = vmul.f32 %v4367_v27, %v4376_v55  ;;  %v1829_v42 = vmul.f32 %v4316_v60, %v1820_v46  ;;  %vm1821_vm15 = vcmp.gt.f32.partialorder %v1819_v8, 0.0  ;;  %v1828_v43 = vmul.f32 %v4316_v60, %v1819_v8 }
 0x811   :  { %v1850_v4 = vadd.f32 %v1848_v61, %v1817_v3  ;;  %v1851_v35 = vadd.f32 %v1849_v21, %v1817_v3  ;;  %v4389_v45 = vsel %vm179_vm4, %v4356_v23, %v1891_v24 }
 0x812   :  { %v4382_v44 = vpop.permute.xlu0 %1898  ;;  %v4384_v5 = vsel %vm1822_vm14, %v1820_v46, %v1829_v42  ;;  %2339 = vmatpush1.msra.mxu1 %v2232_v58  ;;  %v4398_v3 = vsel %vm1821_vm15, %v1819_v8, %v1828_v43  ;;  %v4423_v46 = vpop.permute.xlu1 %1912 }
 0x813   :  { %5031 = vst [vmem:[#allocation35_spill] sm:$0xff] %v4384_v5  ;;  %v4394_v25 = vsel %vm179_vm4, %v1891_v24, %v4382_v44  ;;  %1894 = vrot.lane.b32.xlu0 %v4384_v5, %s2687_s21  ;;  %vm1853_vm0 = vcmp.gt.f32.partialorder %v1851_v35, 0.0  ;;  %1886 = vrot.lane.b32.xlu1 %v4398_v3, %s2687_s21  ;;  %v1855_v51 = vmul.f32 %v1851_v35, %v4316_v60  ;;  %vm1852_vm1 = vcmp.gt.f32.partialorder %v1850_v4, 0.0 }
 0x814   :  { %5032 = vst [vmem:[#allocation36_spill] sm:$0xff] %v4394_v25  ;;  %v1854_v2 = vmul.f32 %v1850_v4, %v4316_v60  ;;  %v2102_v1 = vmul.f32 %v4394_v25, %v5030_v52  ;;  %v2101_v24 = vmul.f32 %v4389_v45, %v5028_v6  ;;  %v4439_v58 = vsel %vm179_vm4, %v4423_v46, %v1889_v30 }
 0x815   :  { %v4408_v7 = vsel %vm1853_vm0, %v1851_v35, %v1855_v51  ;;  %v2097_v35 = vmul.f32 %v4439_v58, %v5028_v6 }
 0x816   :  { %v2037_v40 = vpop.permute.xlu0 %2036  ;;  %v4417_v49 = vsel %vm1852_vm1, %v1850_v4, %v1854_v2  ;;  %2245 = vmatprep.subr.mxu0 %v2102_v1 }
 0x817   :  { %v4413_v54 = vsel %vm217_vm3, %v4320_v48, %v2037_v40  ;;  %2032 = vrot.lane.b32.xlu0 %v4408_v7, %s2686_s20  ;;  %5033 = vst [vmem:[#allocation16_spill] sm:$0xff] %v4417_v49  ;;  %2024 = vrot.lane.b32.xlu1 %v4417_v49, %s2686_s20 }
 0x818   :  { %2246 = vmatpush1.msra.mxu0 %v2101_v24  ;;  %v2229_v60 = vmul.f32 %v4354_v59, %v4413_v54 }
 0x81a   :  { %v2021_v8 = vpop.permute.xlu0 %2020  ;;  %2340 = vmatprep.subr.mxu1 %v2229_v60  ;;  %v4477_v60 = vrot.slane %v4339_v53, %v2829_v13 }
 0x81b   :  { %v4428_v61 = vsel %vm217_vm3, %v2021_v8, %v4320_v48  ;;  %2016 = vrot.lane.b32.xlu0 %v4384_v5, %s2686_s20  ;;  %1910 = vrot.lane.b32.xlu1 %v4408_v7, %s2687_s21 }
 0x81c   :  { %v2228_v21 = vmul.f32 %v4367_v27, %v4428_v61  ;;  %5036 = vst [vmem:[#allocation22_spill] sm:$0xff] %v4477_v60 }
 0x81e   :  { %v4441_v42 = vpop.permute.xlu0 %1896  ;;  %2341 = vmatpush1.msra.mxu1 %v2228_v21 }
 0x81f   :  { %v4446_v48 = vsel %vm179_vm4, %v1889_v30, %v4441_v42  ;;  %2010 = vrot.lane.b32.xlu0 %v5023_v63, %s2686_s20  ;;  %1904 = vrot.lane.b32.xlu1 %v5024_v33, %s2687_s21 }
 0x820   :  { %5034 = vst [vmem:[#allocation20_spill] sm:$0xff] %v4446_v48  ;;  %v2098_v4 = vmul.f32 %v4446_v48, %v5030_v52 }
 0x822   :  { %v4456_v43 = vpop.permute.xlu0 %2034  ;;  %2247 = vmatprep.subr.mxu0 %v2098_v4 }
 0x823   :  { %v4461_v30 = vsel %vm217_vm3, %v2027_v19, %v4456_v43  ;;  %2008 = vrot.lane.b32.xlu0 %v4398_v3, %s2686_s20  ;;  %2248 = vmatpush1.msra.mxu0 %v2097_v35 }
 0x824   :  { %5035 = vst [vmem:[#allocation21_spill] sm:$0xff] %v4461_v30  ;;  %1902 = vrot.lane.b32.xlu1 %v4417_v49, %s2687_s21  ;;  %v2225_v51 = vmul.f32 %v4354_v59, %v4461_v30  ;;  %v5049_v49 = vld [vmem:[#allocation9_spill] sm:$0xff] }
 0x826   :  { %v2019_v2 = vpop.permute.xlu0 %2018  ;;  %2342 = vmatprep.subr.mxu1 %v2225_v51 }
 0x827   :  { %v4471_v1 = vsel %vm217_vm3, %v2019_v2, %v2027_v19  ;;  %v4491_v19 = vrot.slane %v4339_v53, %v2831_v14 }
 0x828   :  { %v2224_v24 = vmul.f32 %v4367_v27, %v4471_v1 }
 0x829   :  { %5039 = vst [vmem:[#allocation25_spill] sm:$0xff] %v4491_v19 }
 0x82a   :  { %v2015_v21 = vpop.permute.xlu0 %2014  ;;  %2343 = vmatpush1.msra.mxu1 %v2224_v24 }
 0x82b   :  { %v4482_v4 = vsel %vm217_vm3, %v2015_v21, %v4371_v50  ;;  %v4487_v35 = vsel %vm217_vm3, %v4358_v56, %v2015_v21 }
 0x82c   :  { %5037 = vst [vmem:[#allocation23_spill] sm:$0xff] %v4482_v4  ;;  %5038 = vst [vmem:[#allocation24_spill] sm:$0xff] %v4487_v35  ;;  %v4495_v51 = vmul.f32 %v4477_v60, %v4487_v35  ;;  %v4499_v24 = vmul.f32 %v4491_v19, %v4482_v4  ;;  %v2090_v5 = vmul.f32 %v2064_v57, %v4482_v4  ;;  %v5050_v4 = vld [vmem:[#allocation10_spill] sm:$0xff] }
 0x82e   :  { %5040 = vst [vmem:[#allocation26_spill] sm:$0xff] %v4495_v51  ;;  %5041 = vst [vmem:[#allocation27_spill] sm:$0xff] %v4499_v24  ;;  %v2013_v20 = vpop.permute.xlu0 %2012  ;;  %v4520_v51 = vld [vmem:[%s4861_s5 + $0x8] sm:$0xff] }
 0x82f   :  { %v4503_v50 = vsel %vm217_vm3, %v2013_v20, %v2021_v8  ;;  %v4507_v56 = vsel %vm217_vm3, %v2037_v40, %v2013_v20  ;;  %2307 = vmatprep.mubr.f32.mxu0 %v4520_v51  ;;  %v1909_v8 = vpop.permute.xlu1 %1908 }
 0x830   :  { %5042 = vst [vmem:[#allocation28_spill] sm:$0xff] %v4507_v56  ;;  %v4511_v53 = vmul.f32 %v4477_v60, %v4507_v56  ;;  %v4515_v21 = vmul.f32 %v4491_v19, %v4503_v50 }
 0x832   :  { %5043 = vst [vmem:[#allocation29_spill] sm:$0xff] %v4511_v53  ;;  %5044 = vst [vmem:[#allocation30_spill] sm:$0xff] %v4515_v21 }
 0x833   :  { %v1907_v24 = vpop.permute.xlu1 %1906 }
 0x885   :  { %v4523_v16 = vpop.permute.xlu0 %1894  ;;  %v1887_v20 = vpop.permute.xlu1 %1886 }
 0x886   :  { %v4528_v40 = vsel %vm179_vm4, %v1887_v20, %v4523_v16 }
 0x887   :  { %5045 = vst [vmem:[#allocation31_spill] sm:$0xff] %v4528_v40  ;;  %v2094_v53 = vmul.f32 %v4528_v40, %v5030_v52 }
 0x889   :  { %v2033_v60 = vpop.permute.xlu0 %2032  ;;  %2249 = vmatprep.subr.mxu0 %v2094_v53  ;;  %v2025_v19 = vpop.permute.xlu1 %2024  ;;  %v4550_v53 = vsel %vm179_vm4, %v1909_v8, %v4318_v32  ;;  %v4567_v32 = vld [vmem:[%s4861_s5 + $0x10] sm:$0xff] }
 0x88a   :  { %v4534_v21 = vsel %vm217_vm3, %v2025_v19, %v2033_v60  ;;  %5048 = vst [vmem:[#allocation34_spill] sm:$0xff] %v4567_v32  ;;  %v2108_v36 = vmul.f32 %v4550_v53, %v5049_v49 }
 0x88b   :  { %5046 = vst [vmem:[#allocation33_spill] sm:$0xff] %v4534_v21  ;;  %v2221_v17 = vmul.f32 %v4354_v59, %v4534_v21 }
 0x88d   :  { %v2017_v52 = vpop.permute.xlu0 %2016  ;;  %2344 = vmatprep.subr.mxu1 %v2221_v17  ;;  %v1911_v48 = vpop.permute.xlu1 %1910  ;;  %v4572_v17 = vsel %vm179_vm4, %v1907_v24, %v4356_v23  ;;  %v4588_v23 = vrot.slane %v4539_v15, %v2827_v12 }
 0x88e   :  { %v4554_v40 = vsel %vm217_vm3, %v2017_v52, %v2025_v19  ;;  %v4560_v59 = vsel %vm179_vm4, %v1911_v48, %v1887_v20  ;;  %v2060_v19 = vrot.slane %v4545_v9, %v2825_v11 }
 0x88f   :  { %v2220_v25 = vmul.f32 %v4367_v27, %v4554_v40  ;;  %5047 = vst [vmem:[#allocation32_spill] sm:$0xff] %v4560_v59  ;;  %v4577_v27 = vsel %vm179_vm4, %v4341_v41, %v1909_v8  ;;  %v2093_v20 = vmul.f32 %v4560_v59, %v5028_v6  ;;  %v4593_v41 = vsel %vm179_vm4, %v4382_v44, %v1907_v24 }
 0x890   :  { %v2089_v8 = vmul.f32 %v2060_v19, %v4487_v35  ;;  %v2107_v59 = vmul.f32 %v4577_v27, %v5050_v4  ;;  %v2086_v44 = vmul.f32 %v2064_v57, %v4503_v50  ;;  %v2085_v24 = vmul.f32 %v2060_v19, %v4507_v56 }
 0x891   :  { %v2011_v0 = vpop.permute.xlu0 %2010  ;;  %2345 = vmatpush1.msra.mxu1 %v2220_v25  ;;  %2250 = vmatpush1.msra.mxu0 %v2093_v20  ;;  %v1905_v25 = vpop.permute.xlu1 %1904 }
 0x892   :  { %v4598_v6 = vsel %vm217_vm3, %v2011_v0, %v2019_v2  ;;  %2629 = vmatmul.mubr.msk.f32.vlgmr.msra.gmra.mxu1 %vm2239_vm2, %v4567_v32  ;;  %v4607_v33 = vsel %vm179_vm4, %v1905_v25, %v4423_v46  ;;  %2251 = vmatprep.subr.mxu0 %v2090_v5  ;;  %v2104_v2 = vmul.f32 %v4572_v17, %v5049_v49 }
 0x893   :  { %v4616_v20 = vsel %vm217_vm3, %v4456_v43, %v2011_v0  ;;  %v4621_v32 = vsel %vm179_vm4, %v4441_v42, %v1905_v25  ;;  %2385 = vmatprep.subr.mxu1 %v2108_v36  ;;  %2252 = vmatpush1.msra.mxu0 %v2089_v8  ;;  %v2103_v5 = vmul.f32 %v4593_v41, %v5050_v4 }
 0x894   :  { %5051 = vst [vmem:[#allocation14_spill] sm:$0xff] %v4616_v20  ;;  %2386 = vmatpush1.msra.mxu1 %v2107_v59  ;;  %2253 = vmatprep.subr.mxu0 %v2086_v44  ;;  %v2082_v56 = vmul.f32 %v2064_v57, %v4598_v6  ;;  %v2100_v35 = vmul.f32 %v4607_v33, %v5049_v49 }
 0x895   :  { %v2009_v46 = vpop.permute.xlu0 %2008  ;;  %2387 = vmatprep.subr.mxu1 %v2104_v2  ;;  %2254 = vmatpush1.msra.mxu0 %v2085_v24  ;;  %v1975_v43 = vrot.slane %v4539_v15, %v2825_v11  ;;  %v2081_v59 = vmul.f32 %v2060_v19, %v4616_v20  ;;  %v2099_v8 = vmul.f32 %v4621_v32, %v5050_v4 }
 0x896   :  { %v4630_v0 = vsel %vm217_vm3, %v2009_v46, %v2017_v52  ;;  %v4634_v36 = vsel %vm217_vm3, %v2033_v60, %v2009_v46  ;;  %v1903_v42 = vpop.permute.xlu1 %1902  ;;  %2388 = vmatpush1.msra.mxu1 %v2103_v5  ;;  %v2072_v52 = vrot.slane %v4545_v9, %v2831_v14  ;;  %2255 = vmatprep.subr.mxu0 %v2082_v56 }
 0x897   :  { %5052 = vst [vmem:[#allocation13_spill] sm:$0xff] %v4634_v36  ;;  %v4643_v25 = vsel %vm179_vm4, %v1903_v42, %v1911_v48  ;;  %v2077_v60 = vmul.f32 %v2060_v19, %v4634_v36  ;;  %v4651_v44 = vsel %vm179_vm4, %v4523_v16, %v1903_v42  ;;  %2389 = vmatprep.subr.mxu1 %v2100_v35  ;;  %v5057_v36 = vld [vmem:[#allocation35_spill] sm:$0xff] }
 0x898   :  { %v2005_v2 = vmul.f32 %v4252_v34, %v4588_v23  ;;  %v2095_v24 = vmul.f32 %v4651_v44, %v5050_v4  ;;  %2256 = vmatpush1.msra.mxu0 %v2081_v59  ;;  %2390 = vmatpush1.msra.mxu1 %v2099_v8  ;;  %v2078_v48 = vmul.f32 %v2064_v57, %v4630_v0  ;;  %v4668_v4 = vld [vmem:[%s4854_s1] ss:$8 sm:$0xf] }
 0x899   :  { %v2096_v19 = vmul.f32 %v4643_v25, %v5049_v49  ;;  %v2004_v16 = vmul.f32 %v4266_v31, %v1975_v43  ;;  %2449 = vmatprep.mubr.f32.mxu1 %v4520_v51  ;;  %v2092_v35 = vmul.f32 %v2072_v52, %v4363_v26  ;;  %v1882_v56 = vmul.f32 %v4668_v4, %v4539_v15 }
 0x89a   :  { %2257 = vmatprep.subr.mxu0 %v2078_v48  ;;  %v2091_v49 = vmul.f32 %v2068_v10, %v4376_v55  ;;  %v2001_v9 = vmul.f32 %v4588_v23, %v3108_v28  ;;  %v2088_v51 = vmul.f32 %v2072_v52, %v4413_v54  ;;  %v1983_v57 = vrot.slane %v4539_v15, %v2829_v13 }
 0x89b   :  { %2391 = vmatprep.subr.mxu1 %v2096_v19  ;;  %2258 = vmatpush1.msra.mxu0 %v2077_v60  ;;  %v2087_v5 = vmul.f32 %v2068_v10, %v4428_v61  ;;  %v2000_v46 = vmul.f32 %v1975_v43, %v5022_v62  ;;  %v1987_v42 = vrot.slane %v4539_v15, %v2831_v14 }
 0x89c   :  { %2392 = vmatpush1.msra.mxu1 %v2095_v24  ;;  %2259 = vmatprep.subr.mxu0 %v2005_v2  ;;  %v1997_v59 = vmul.f32 %v4588_v23, %v5023_v63  ;;  %v2084_v8 = vmul.f32 %v2072_v52, %v4461_v30  ;;  %v1996_v60 = vmul.f32 %v1975_v43, %v5025_v18 }
 0x89d   :  { %2393 = vmatprep.subr.mxu1 %v2092_v35  ;;  %2260 = vmatpush1.msra.mxu0 %v2004_v16  ;;  %v1938_v2 = vrot.slane %v1882_v56, %v2825_v11  ;;  %v2083_v24 = vmul.f32 %v2068_v10, %v4471_v1  ;;  %v1942_v48 = vrot.slane %v1882_v56, %v2827_v12 }
 0x89e   :  { %2394 = vmatpush1.msra.mxu1 %v2091_v49  ;;  %2261 = vmatprep.subr.mxu0 %v2001_v9  ;;  %v1993_v15 = vmul.f32 %v4588_v23, %v4398_v3  ;;  %v2080_v19 = vmul.f32 %v2072_v52, %v4534_v21  ;;  %v2007_v16 = vmul.f32 %v4259_v47, %v1987_v42 }
 0x89f   :  { %2395 = vmatprep.subr.mxu1 %v2088_v51  ;;  %2262 = vmatpush1.msra.mxu0 %v2000_v46  ;;  %v2079_v35 = vmul.f32 %v2068_v10, %v4554_v40  ;;  %v1992_v49 = vmul.f32 %v1975_v43, %v4408_v7  ;;  %v2006_v9 = vmul.f32 %v4292_v37, %v1983_v57 }
 0x8a0   :  { %2396 = vmatpush1.msra.mxu1 %v2087_v5  ;;  %2263 = vmatprep.subr.mxu0 %v1997_v59  ;;  %v1968_v51 = vmul.f32 %v1942_v48, %v4330_v22  ;;  %v1967_v5 = vmul.f32 %v1938_v2, %v4550_v53  ;;  %v1964_v23 = vmul.f32 %v1942_v48, %v4389_v45 }
 0x8a1   :  { %2397 = vmatprep.subr.mxu1 %v2084_v8  ;;  %2264 = vmatpush1.msra.mxu0 %v1996_v60  ;;  %v2003_v52 = vmul.f32 %v1987_v42, %v5021_v38  ;;  %v2166_v10 = vrot.slane %v4325_v29, %v2825_v11  ;;  %v1963_v43 = vmul.f32 %v1938_v2, %v4572_v17  ;;  %v5053_v60 = vld [vmem:[#allocation15_spill] sm:$0xff] }
 0x8a2   :  { %2398 = vmatpush1.msra.mxu1 %v2083_v24  ;;  %2265 = vmatprep.subr.mxu0 %v1993_v15  ;;  %v2002_v46 = vmul.f32 %v1983_v57, %v5026_v39  ;;  %v2170_v59 = vrot.slane %v4325_v29, %v2827_v12  ;;  %v1960_v8 = vmul.f32 %v1942_v48, %v4439_v58  ;;  %v5054_v15 = vld [vmem:[#allocation11_spill] sm:$0xff] }
 0x8a3   :  { %2399 = vmatprep.subr.mxu1 %v2080_v19  ;;  %2266 = vmatpush1.msra.mxu0 %v1992_v49  ;;  %v1999_v24 = vmul.f32 %v1987_v42, %v5053_v60  ;;  %v1998_v19 = vmul.f32 %v1983_v57, %v5054_v15  ;;  %v1950_v49 = vrot.slane %v1882_v56, %v2831_v14 }
 0x8a4   :  { %2400 = vmatpush1.msra.mxu1 %v2079_v35  ;;  %2267 = vmatprep.subr.mxu0 %v1968_v51  ;;  %v1959_v35 = vmul.f32 %v1938_v2, %v4607_v33  ;;  %v1955_v21 = vmul.f32 %v1938_v2, %v4643_v25  ;;  %v1994_v30 = vmul.f32 %v1983_v57, %v5057_v36 }
 0x8a5   :  { %2401 = vmatprep.subr.mxu1 %v2007_v16  ;;  %2268 = vmatpush1.msra.mxu0 %v1967_v5  ;;  %v1946_v16 = vrot.slane %v1882_v56, %v2829_v13  ;;  %v5056_v5 = vld [vmem:[#allocation16_spill] sm:$0xff]  ;;  %v2195_v20 = vmul.f32 %v4292_v37, %v2166_v10  ;;  %v1970_v56 = vmul.f32 %v1950_v49, %v4577_v27 }
 0x8a6   :  { %2402 = vmatpush1.msra.mxu1 %v2006_v9  ;;  %2269 = vmatprep.subr.mxu0 %v1964_v23  ;;  %v5055_v9 = vld [vmem:[#allocation32_spill] sm:$0xff]  ;;  %v1995_v23 = vmul.f32 %v1987_v42, %v5056_v5  ;;  %v2178_v42 = vrot.slane %v4325_v29, %v2831_v14  ;;  %v2192_v2 = vmul.f32 %v2170_v59, %v5021_v38 }
 0x8a7   :  { %2403 = vmatprep.subr.mxu1 %v2003_v52  ;;  %2270 = vmatpush1.msra.mxu0 %v1963_v43  ;;  %v1956_v51 = vmul.f32 %v1942_v48, %v5055_v9  ;;  %v2196_v52 = vmul.f32 %v4259_v47, %v2170_v59  ;;  %v5058_v43 = vld [vmem:[#allocation19_spill] sm:$0xff]  ;;  %v1966_v48 = vmul.f32 %v1950_v49, %v4593_v41 }
 0x8a8   :  { %2404 = vmatpush1.msra.mxu1 %v2002_v46  ;;  %2271 = vmatprep.subr.mxu0 %v1960_v8  ;;  %v1969_v46 = vmul.f32 %v1946_v16, %v5058_v43  ;;  %v2174_v57 = vrot.slane %v4325_v29, %v2829_v13  ;;  %v1884_v8 = vmul.f32 %v4668_v4, %v4325_v29 }
 0x8a9   :  { %2405 = vmatprep.subr.mxu1 %v1999_v24  ;;  %2272 = vmatpush1.msra.mxu0 %v1959_v35  ;;  %v5059_v24 = vld [vmem:[#allocation36_spill] sm:$0xff]  ;;  %v1962_v35 = vmul.f32 %v1950_v49, %v4621_v32  ;;  %v1958_v4 = vmul.f32 %v1950_v49, %v4651_v44 }
 0x8aa   :  { %2406 = vmatpush1.msra.mxu1 %v1998_v19  ;;  %2273 = vmatprep.subr.mxu0 %v1956_v51  ;;  %v1965_v19 = vmul.f32 %v1946_v16, %v5059_v24  ;;  %v2187_v51 = vmul.f32 %v2166_v10, %v5054_v15  ;;  %v2133_v29 = vrot.slane %v1884_v8, %v2827_v12 }
 0x8ab   :  { %2407 = vmatprep.subr.mxu1 %v1995_v23  ;;  %2274 = vmatpush1.msra.mxu0 %v1955_v21  ;;  %v2188_v21 = vmul.f32 %v2170_v59, %v5053_v60  ;;  %v2129_v23 = vrot.slane %v1884_v8, %v2825_v11  ;;  %v2183_v11 = vmul.f32 %v2166_v10, %v5057_v36 }
 0x8ac   :  { %2408 = vmatpush1.msra.mxu1 %v1994_v30  ;;  %2275 = vmatprep.subr.mxu0 %v2196_v52  ;;  %v2191_v30 = vmul.f32 %v2166_v10, %v5026_v39  ;;  %v5060_v52 = vld [vmem:[#allocation20_spill] sm:$0xff]  ;;  %v2197_v60 = vmul.f32 %v4266_v31, %v2174_v57  ;;  %v2159_v12 = vmul.f32 %v2133_v29, %v4577_v27 }
 0x8ad   :  { %2409 = vmatprep.subr.mxu1 %v1970_v56  ;;  %2276 = vmatpush2.msra.mxu0 %v2195_v20  ;;  %v1961_v56 = vmul.f32 %v1946_v16, %v5060_v52  ;;  %v2184_v20 = vmul.f32 %v2170_v59, %v5056_v5  ;;  %v2155_v59 = vmul.f32 %v2133_v29, %v4593_v41 }
 0x8ae   :  { %2410 = vmatpush1.msra.mxu1 %v1969_v46  ;;  %2277 = vmatprep.subr.mxu0 %v2192_v2  ;;  %v2198_v46 = vmul.f32 %v4252_v34, %v2178_v42  ;;  %v5061_v2 = vld [vmem:[#allocation31_spill] sm:$0xff]  ;;  %v2154_v49 = vmul.f32 %v2129_v23, %v5059_v24  ;;  %v2193_v10 = vmul.f32 %v2174_v57, %v5022_v62 }
 0x8af   :  { %2411 = vmatprep.subr.mxu1 %v1966_v48  ;;  %2278 = vmatpush2.msra.mxu0 %v2191_v30  ;;  %v1957_v48 = vmul.f32 %v1946_v16, %v5061_v2  ;;  %v2194_v16 = vmul.f32 %v2178_v42, %v3108_v28  ;;  %v2151_v27 = vmul.f32 %v2133_v29, %v4621_v32 }
 0x8b0   :  { %2412 = vmatpush1.msra.mxu1 %v1965_v19  ;;  %2279 = vmatprep.subr.mxu0 %v2188_v21  ;;  %v2158_v19 = vmul.f32 %v2129_v23, %v5058_v43  ;;  %v2190_v43 = vmul.f32 %v2178_v42, %v5023_v63  ;;  %v2150_v30 = vmul.f32 %v2129_v23, %v5060_v52  ;;  %v5062_v52 = vld [vmem:[#allocation3_spill] sm:$0xff] }
 0x8b1   :  { %2413 = vmatprep.subr.mxu1 %v1962_v35  ;;  %2280 = vmatpush2.msra.mxu0 %v2187_v51  ;;  %v2189_v41 = vmul.f32 %v2174_v57, %v5025_v18  ;;  %v2147_v24 = vmul.f32 %v2133_v29, %v4651_v44  ;;  %v2141_v21 = vrot.slane %v1884_v8, %v2831_v14  ;;  %v5064_v29 = vld [vmem:[#allocation23_spill] sm:$0xff] }
 0x8b2   :  { %2414 = vmatpush1.msra.mxu1 %v1961_v56  ;;  %2281 = vmatprep.subr.mxu0 %v2184_v20  ;;  %v2137_v35 = vrot.slane %v1884_v8, %v2829_v13  ;;  %v2146_v32 = vmul.f32 %v2129_v23, %v5061_v2  ;;  %v2185_v51 = vmul.f32 %v2174_v57, %v4408_v7 }
 0x8b3   :  { %2415 = vmatprep.subr.mxu1 %v1958_v4  ;;  %2282 = vmatpush2.msra.mxu0 %v2183_v11  ;;  %v2122_v56 = vmul.f32 %v4376_v55, %v5062_v52  ;;  %v2161_v20 = vmul.f32 %v2141_v21, %v4330_v22  ;;  %v2118_v13 = vmul.f32 %v4428_v61, %v5062_v52  ;;  %v5070_v11 = vld [vmem:[#allocation21_spill] sm:$0xff] }
 0x8b4   :  { %2416 = vmatpush1.msra.mxu1 %v1957_v48  ;;  %2283 = vmatprep.subr.mxu0 %v2159_v12  ;;  %v2160_v44 = vmul.f32 %v2137_v35, %v4550_v53  ;;  %v2157_v57 = vmul.f32 %v2141_v21, %v4389_v45  ;;  %v2156_v8 = vmul.f32 %v2137_v35, %v4572_v17  ;;  %v5069_v48 = vld [vmem:[#allocation14_spill] sm:$0xff] }
 0x8b5   :  { %2417 = vmatprep.subr.mxu1 %v2198_v46  ;;  %2284 = vmatpush2.msra.mxu0 %v2158_v19  ;;  %v2114_v22 = vmul.f32 %v4471_v1, %v5062_v52  ;;  %v2153_v53 = vmul.f32 %v2141_v21, %v4439_v58  ;;  %v2152_v61 = vmul.f32 %v2137_v35, %v4607_v33  ;;  %v5065_v58 = vld [vmem:[#allocation4_spill] sm:$0xff]  ;;  %v5067_v46 = vld [vmem:[#allocation5_spill] sm:$0xff] }
 0x8b6   :  { %2418 = vmatpush2.msra.mxu1 %v2197_v60  ;;  %2285 = vmatprep.subr.mxu0 %v2155_v59  ;;  %v2186_v60 = vmul.f32 %v2178_v42, %v4398_v3  ;;  %v5063_v42 = vld [vmem:[#allocation6_spill] sm:$0xff]  ;;  %v2110_v45 = vmul.f32 %v4554_v40, %v5062_v52  ;;  %v2148_v1 = vmul.f32 %v2137_v35, %v4643_v25  ;;  %v5066_v33 = vld [vmem:[#allocation24_spill] sm:$0xff] }
 0x8b7   :  { %2419 = vmatprep.subr.mxu1 %v2194_v16  ;;  %2286 = vmatpush2.msra.mxu0 %v2154_v49  ;;  %v2121_v14 = vmul.f32 %v5064_v29, %v5063_v42  ;;  %v2117_v55 = vmul.f32 %v4503_v50, %v5063_v42  ;;  %v2113_v23 = vmul.f32 %v4598_v6, %v5063_v42  ;;  %v5068_v40 = vld [vmem:[#allocation28_spill] sm:$0xff]  ;;  %v5078_v49 = vld [vmem:[#allocation29_spill] sm:$0xff]  ;;  %v2633_v52 = vld [vmem:[%s4857_s8 + $0x18] sm:$0xff] }
 0x8b8   :  { %2420 = vmatpush2.msra.mxu1 %v2193_v10  ;;  %2287 = vmatprep.subr.mxu0 %v2151_v27  ;;  %v2149_v50 = vmul.f32 %v2141_v21, %v5055_v9  ;;  %v2109_v17 = vmul.f32 %v4630_v0, %v5063_v42  ;;  %v2124_v4 = vmul.f32 %v5066_v33, %v5065_v58 }
 0x8b9   :  { %2421 = vmatprep.subr.mxu1 %v2190_v43  ;;  %2288 = vmatpush2.msra.mxu0 %v2150_v30  ;;  %v2123_v2 = vmul.f32 %v4363_v26, %v5067_v46  ;;  %v2120_v9 = vmul.f32 %v5068_v40, %v5065_v58  ;;  %v2119_v25 = vmul.f32 %v4413_v54, %v5067_v46 }
 0x8ba   :  { %2422 = vmatpush2.msra.mxu1 %v2189_v41  ;;  %2289 = vmatprep.subr.mxu0 %v2147_v24  ;;  %v2116_v26 = vmul.f32 %v5069_v48, %v5065_v58  ;;  %v2115_v12 = vmul.f32 %v5070_v11, %v5067_v46 }
 0x8bb   :  { %2423 = vmatprep.subr.mxu1 %v2186_v60  ;;  %2290 = vmatpush2.msra.mxu0 %v2146_v32 }
 0x8bc   :  { %2424 = vmatpush2.msra.mxu1 %v2185_v51  ;;  %2291 = vmatprep.subr.mxu0 %v2122_v56  ;;  %v2631_v51 = vld [vmem:[%s4856_s6 + $0x18] sm:$0xff] }
 0x8bd   :  { %2425 = vmatprep.subr.mxu1 %v2161_v20  ;;  %2292 = vmatpush2.msra.mxu0 %v2121_v14 }
 0x8be   :  { %2426 = vmatpush2.msra.mxu1 %v2160_v44  ;;  %2293 = vmatprep.subr.mxu0 %v2118_v13 }
 0x8bf   :  { %2427 = vmatprep.subr.mxu1 %v2157_v57  ;;  %2294 = vmatpush2.msra.mxu0 %v2117_v55 }
 0x8c0   :  { %2428 = vmatpush2.msra.mxu1 %v2156_v8  ;;  %2295 = vmatprep.subr.mxu0 %v2114_v22 }
 0x8c1   :  { %2429 = vmatprep.subr.mxu1 %v2153_v53  ;;  %2296 = vmatpush2.msra.mxu0 %v2113_v23 }
 0x8c2   :  { %2430 = vmatpush2.msra.mxu1 %v2152_v61  ;;  %2297 = vmatprep.subr.mxu0 %v2110_v45  ;;  %v2632_v45 = vld [vmem:[%s4858_s7 + $0x18] sm:$0xff] }
 0x8c3   :  { %2431 = vmatprep.subr.mxu1 %v2149_v50  ;;  %2298 = vmatpush2.msra.mxu0 %v2109_v17 }
 0x8c4   :  { %2432 = vmatpush2.msra.mxu1 %v2148_v1  ;;  %2299 = vmatprep.subr.mxu0 %v4292_v37  ;;  %v5071_v37 = vld [vmem:[#allocation13_spill] sm:$0xff] }
 0x8c5   :  { %2433 = vmatprep.subr.mxu1 %v2124_v4  ;;  %2300 = vmatpush2.msra.mxu0 %v4252_v34  ;;  %v2112_v54 = vmul.f32 %v5071_v37, %v5065_v58  ;;  %v5072_v34 = vld [vmem:[#allocation33_spill] sm:$0xff] }
 0x8c6   :  { %2434 = vmatpush2.msra.mxu1 %v2123_v2  ;;  %2301 = vmatprep.subr.mxu0 %v5026_v39  ;;  %v2111_v19 = vmul.f32 %v5072_v34, %v5067_v46  ;;  %v2236_v39 = vld [vmem:[%s4861_s5] sm:$0xff] }
 0x8c7   :  { %2435 = vmatprep.subr.mxu1 %v2120_v9  ;;  %2302 = vmatpush2.msra.mxu0 %v3108_v28  ;;  %v5073_v28 = vld [vmem:[#allocation27_spill] sm:$0xff] }
 0x8c8   :  { %2436 = vmatpush2.msra.mxu1 %v2119_v25  ;;  %2303 = vmatprep.subr.mxu0 %v5054_v15  ;;  %v5074_v15 = vld [vmem:[#allocation26_spill] sm:$0xff] }
 0x8c9   :  { %2437 = vmatprep.subr.mxu1 %v2116_v26  ;;  %2304 = vmatpush2.msra.mxu0 %v5023_v63  ;;  %v5075_v63 = vld [vmem:[#allocation30_spill] sm:$0xff] }
 0x8ca   :  { %2438 = vmatpush2.msra.mxu1 %v2115_v12  ;;  %2305 = vmatprep.subr.mxu0 %v5057_v36  ;;  %v5076_v36 = vld [vmem:[#allocation25_spill] sm:$0xff] }
 0x8cb   :  { %2439 = vmatprep.subr.mxu1 %v2112_v54  ;;  %2306 = vmatpush2.msra.mxu0 %v4398_v3  ;;  %v2227_v59 = vmul.f32 %v5076_v36, %v4598_v6  ;;  %v5077_v3 = vld [vmem:[#allocation22_spill] sm:$0xff] }
 0x8cc   :  { %2440 = vmatpush2.msra.mxu1 %v2111_v19  ;;  %2308 = vmatmul.mubr.f32.vlgmr.msra.gmra.mxu0 %v2236_v39  ;;  %v2226_v16 = vmul.f32 %v5077_v3, %v5069_v48 }
 0x8cd   :  { %2441 = vmatprep.subr.mxu1 %v4266_v31  ;;  %2480 = vmatprep.subr.mxu0 %v5073_v28  ;;  %v2223_v31 = vmul.f32 %v5076_v36, %v4630_v0 }
 0x8ce   :  { %2442 = vmatpush2.msra.mxu1 %v4259_v47  ;;  %2481 = vmatpush1.msra.mxu0 %v5074_v15  ;;  %v5079_v47 = vld [vmem:[#allocation15_spill] sm:$0xff] }
 0x8cf   :  { %2443 = vmatprep.subr.mxu1 %v5022_v62  ;;  %2482 = vmatprep.subr.mxu0 %v5075_v63  ;;  %v2222_v62 = vmul.f32 %v5077_v3, %v5071_v37 }
 0x8d0   :  { %2444 = vmatpush2.msra.mxu1 %v5021_v38  ;;  %2483 = vmatpush1.msra.mxu0 %v5078_v49  ;;  %v5080_v38 = vmov 0.0  }
 0x8d1   :  { %2445 = vmatprep.subr.mxu1 %v5025_v18  ;;  %2484 = vmatprep.subr.mxu0 %v2227_v59  ;;  %v5081_v18 = vld [vmem:[#allocation34_spill] sm:$0xff] }
 0x8d2   :  { %2446 = vmatpush2.msra.mxu1 %v5079_v47  ;;  %2485 = vmatpush1.msra.mxu0 %v2226_v16 }
 0x8d3   :  { %2447 = vmatprep.subr.mxu1 %v4408_v7  ;;  %2486 = vmatprep.subr.mxu0 %v2223_v31 }
 0x8d4   :  { %2448 = vmatpush2.msra.mxu1 %v5056_v5  ;;  %2487 = vmatpush1.msra.mxu0 %v2222_v62 }
 0x8d5   :  { %2520 = vmatprep.mubr.f32.mxu0 %v5080_v38  ;;  %2450 = vmatmul.mubr.f32.vlgmr.msra.gmra.mxu1 %v2236_v39 }
 0x8d6   :  { %2630 = vmatmul.mubr.msk.f32.vlgmr.msra.gmra.mxu0 %vm2239_vm2, %v5081_v18 }
 0x952   :  { %v2380_v6 = vpop.f32.mrf.mxu1 }
 0x954   :  { %v2382_v27 = vpop.f32.mrf.mxu1 }
 0x98c   :  { %v2309_v10 = vpop.f32.mrf.mxu0 }
 0x98d   :  { %v2381_v43 = vadd.f32 %v2380_v6, %v2309_v10 }
 0x98e   :  { %v2311_v0 = vpop.f32.mrf.mxu0 }
 0x98f   :  { %v2383_v30 = vadd.f32 %v2382_v27, %v2311_v0 }
 0x991   :  { %v2533_v41 = vadd.f32 %v2383_v30, %v2381_v43 }
 0x993   :  { %2534 = vadd.xlane.f32.xlu1 %v2533_v41 }
 0x995   :  { %v2451_v24 = vpop.f32.mrf.mxu1 }
 0x996   :  { %v2522_v7 = vpop.f32.mrf.mxu0 }
 0x997   :  { %v2453_v60 = vpop.f32.mrf.mxu1  ;;  %v2523_v5 = vadd.f32 %v2522_v7, %v2451_v24 }
 0x998   :  { %v2524_v21 = vpop.f32.mrf.mxu0 }
 0x999   :  { %v2525_v35 = vadd.f32 %v2524_v21, %v2453_v60 }
 0x99b   :  { %v2574_v32 = vadd.f32 %v2525_v35, %v2523_v5 }
 0x99d   :  { %2575 = vadd.xlane.f32.xlu0 %v2574_v32 }
 0x9a4   :  { %2551 = vperm.xlu1 %2653, %v2631_v51  }
 0x9a8   :  { %2567 = vperm.xlu1 %2653, %v2633_v52  }
 0xa1c   :  { %v2535_v56 = vpop.xlane.xlu1 %2534 }
 0xa1d   :  { %v2536_v20 = vmul.f32 0.00390625, %v2535_v56 }
 0xa1f   :  { %v2537_v44 = vsub.f32 %v2381_v43, %v2536_v20  ;;  %v2538_v42 = vsub.f32 %v2383_v30, %v2536_v20 }
 0xa20   :  { %v2552_v2 = vpop.permute.xlu1 %2551 }
 0xa21   :  { %v2539_v29 = vmul.f32 %v2537_v44, %v2537_v44  ;;  %v2540_v14 = vmul.f32 %v2538_v42, %v2538_v42 }
 0xa23   :  { %v2541_v13 = vadd.f32 %v2540_v14, %v2539_v29 }
 0xa24   :  { %v2568_v37 = vpop.permute.xlu1 %2567 }
 0xa25   :  { %2542 = vadd.xlane.f32.xlu0 %v2541_v13 }
 0xa26   :  { %v2576_v57 = vpop.xlane.xlu0 %2575 }
 0xa27   :  { %v2577_v8 = vmul.f32 0.00390625, %v2576_v57 }
 0xa29   :  { %v2578_v55 = vsub.f32 %v2523_v5, %v2577_v8  ;;  %v2579_v22 = vsub.f32 %v2525_v35, %v2577_v8 }
 0xa2b   :  { %v2580_v53 = vmul.f32 %v2578_v55, %v2578_v55  ;;  %v2581_v23 = vmul.f32 %v2579_v22, %v2579_v22 }
 0xa2d   :  { %v2582_v61 = vadd.f32 %v2581_v23, %v2580_v53 }
 0xa2f   :  { %2583 = vadd.xlane.f32.xlu0 %v2582_v61 }
 0xa45   :  { %2558 = vperm.xlu0 %2654, %v2632_v45  }
 0xaae   :  { %v2543_v50 = vpop.xlane.xlu0 %2542 }
 0xaaf   :  { %v2544_v17 = vmul.f32 0.00390625, %v2543_v50 }
 0xab1   :  { %v2545_v1 = vadd.f32 1e-05, %v2544_v17 }
 0xab3   :  { %2667 = vrsqrt.f32 %v2545_v1 }
 0xab8   :  { %v2584_v58 = vpop.xlane.xlu0 %2583 }
 0xab9   :  { %v2585_v33 = vmul.f32 0.00390625, %v2584_v58 }
 0xabb   :  { %v2586_v4 = vadd.f32 1e-05, %v2585_v33 }
 0xabd   :  { %2669 = vrsqrt.f32 %v2586_v4 }
 0xac0   :  { %v2668_v46 = vpop.eup %2667  ;;  %v2559_v26 = vpop.permute.xlu0 %2558 }
 0xac1   :  { %v2547_v40 = vmul.f32 %v2668_v46, %v2537_v44  ;;  %v2548_v9 = vmul.f32 %v2668_v46, %v2538_v42 }
 0xac3   :  { %v2554_v25 = vmul.f32 %v2552_v2, %v2547_v40  ;;  %v2555_v48 = vmul.f32 %v2552_v2, %v2548_v9 }
 0xac5   :  { %v2561_v11 = vadd.f32 %v2559_v26, %v2554_v25  ;;  %v2562_v12 = vadd.f32 %v2559_v26, %v2555_v48 }
 0xac7   :  { %vm2563_vm3 = vcmp.gt.f32.partialorder %v2561_v11, 0.0  ;;  %vm2564_vm4 = vcmp.gt.f32.partialorder %v2562_v12, 0.0  ;;  %v2570_v54 = vmul.f32 %v2568_v37, %v2561_v11  ;;  %v2571_v34 = vmul.f32 %v2568_v37, %v2562_v12 }
 0xac9   :  { %v2572_v39 = vsel %vm2563_vm3, %v2561_v11, %v2570_v54  ;;  %v2573_v28 = vsel %vm2564_vm4, %v2562_v12, %v2571_v34 }
 0xaca   :  { %v2670_v19 = vpop.eup %2669  ;;  %2600 = vst [vmem:[%s4862_s9] sm:$0xff] %v2572_v39  ;;  %2601 = vst [vmem:[%s4862_s9 + $0x8] sm:$0xff] %v2573_v28 }
 0xacb   :  { %v2588_v15 = vmul.f32 %v2670_v19, %v2578_v55  ;;  %v2589_v63 = vmul.f32 %v2670_v19, %v2579_v22 }
 0xacd   :  { %v2590_v36 = vmul.f32 %v2588_v15, %v2552_v2  ;;  %v2591_v59 = vmul.f32 %v2589_v63, %v2552_v2 }
 0xacf   :  { %v2592_v3 = vadd.f32 %v2590_v36, %v2559_v26  ;;  %v2593_v16 = vadd.f32 %v2591_v59, %v2559_v26 }
 0xad1   :  { %vm2594_vm5 = vcmp.gt.f32.partialorder %v2592_v3, 0.0  ;;  %vm2595_vm6 = vcmp.gt.f32.partialorder %v2593_v16, 0.0  ;;  %v2596_v49 = vmul.f32 %v2592_v3, %v2568_v37  ;;  %v2597_v47 = vmul.f32 %v2593_v16, %v2568_v37 }
 0xad3   :  { %v2598_v31 = vsel %vm2594_vm5, %v2592_v3, %v2596_v49  ;;  %v2599_v62 = vsel %vm2595_vm6, %v2593_v16, %v2597_v47 }
 0xad4   :  { %2602 = vst [vmem:[%s4862_s9 + $0x10] sm:$0xff] %v2598_v31  ;;  %2603 = vst [vmem:[%s4862_s9 + $0x18] sm:$0xff] %v2599_v62 }

</bundles_post_ra>
